<compile_context>
chip_gen: v7x
topology: tpu7x:2x2x1
jax: 0.10.0
libtpu: 0.0.40
codegen_flags: <defaults>
</compile_context>

<pallas_src>
import jax
import jax.numpy as jnp
from jax.experimental import pallas as pl
from jax.experimental.pallas import tpu as pltpu


HIDDEN = 768        # ALBERT / head hidden size (hardcoded 768 in the module)
PROJ = 512          # Seq2SeqHead.projection output size
NUM_LABELS = 4
LOGIT_PAD = 128     # pad classification logits to a full lane width
VOCAB = 100


# ----------------------------------------------------------------------------
# Fused Pallas kernel: encoder surrogate + seq2seq projection + classification head
# ----------------------------------------------------------------------------
def fused_kernel(x_ref, mask_ref, x0_ref, mask0_ref,
                 enc_w_ref, enc_b_ref,
                 proj_w_ref, proj_b_ref,
                 dense_w_ref, dense_b_ref,
                 out_w_ref, out_b_ref,
                 proj_out_ref, logits_ref):
    # ---- surrogate encoder over every token: shared = tanh(x @ W + b) * mask
    # (f32 MXU accumulate, bf16 tanh/mask epilogue; `shared` never leaves VMEM)
    h = jnp.dot(x_ref[...], enc_w_ref[...], preferred_element_type=jnp.float32)
    shared = jnp.tanh((h + enc_b_ref[...]).astype(jnp.bfloat16)) * mask_ref[...]

    # ---- Seq2SeqHead.projection over every token (768 -> 512), bf16 output
    proj = jnp.dot(shared, proj_w_ref[...], preferred_element_type=jnp.float32)
    proj_out_ref[...] = (proj + proj_b_ref[...]).astype(proj_out_ref.dtype)

    # ---- pooled = shared[:, 0] for each sequence: recomputed from the token-0 rows
    # with one tiny matmul (identical bf16 math to the full rows; no sel-matmul/iota,
    # no strided reads).
    h0 = jnp.dot(x0_ref[...], enc_w_ref[...], preferred_element_type=jnp.float32)
    pooled = jnp.tanh((h0 + enc_b_ref[...]).astype(jnp.bfloat16)) * mask0_ref[...]

    # ---- ClassificationHead: out_proj(tanh(dense(pooled)))  (dropout = identity, eval)
    d = jnp.dot(pooled, dense_w_ref[...], preferred_element_type=jnp.float32)
    d = jnp.tanh((d + dense_b_ref[...]).astype(jnp.bfloat16))
    logits = jnp.dot(d, out_w_ref[...], preferred_element_type=jnp.float32)
    logits_ref[...] = (logits + out_b_ref[...]).astype(logits_ref.dtype)


# ----------------------------------------------------------------------------
# Tile sizing / VMEM budgeting
# ----------------------------------------------------------------------------
def _pick_tile_b(batch, seq, max_rows=2048):
    """Batch tile: ~<=max_rows token rows per tile, sublane-safe (multiple of 8 or
    the whole batch).  Never falls back to an oversized whole-batch tile when the
    batch exceeds the budget; the wrapper pads the batch instead."""
    if batch * seq <= max_rows:
        return batch                      # single tile covering the whole batch
    tb = max(1, max_rows // seq)
    if tb >= 8:
        tb = (tb // 8) * 8                # multiple of 8 (sublane)
    else:
        tb = min(batch, 8)                # sublane floor for very long sequences
    return min(tb, batch)


def _vmem_limit_bytes(tile_r, tile_b):
    """Estimate the per-tile VMEM footprint (double-buffered I/O + resident weights
    + f32/bf16 temps) and clamp to a range safe on v5e/v6e (128 MiB) and v7x (64 MiB)."""
    bf2, f4 = 2, 4
    act = tile_r * (HIDDEN * bf2 * 2          # x tile, double-buffered
                    + 128 * bf2 * 2           # mask tile (lane-padded), double-buffered
                    + PROJ * bf2 * 2          # projected output tile, double-buffered
                    + HIDDEN * f4 + PROJ * f4 + HIDDEN * bf2)   # compute temps
    pooled = tile_b * (HIDDEN * bf2 * 2 + 128 * bf2 * 2
                       + LOGIT_PAD * f4 * 2 + HIDDEN * (f4 + bf2) * 2)
    weights = 2 * ((HIDDEN * HIDDEN * 2 + HIDDEN * PROJ + HIDDEN * LOGIT_PAD) * bf2
                   + (2 * HIDDEN + PROJ + LOGIT_PAD) * f4)
    est = act + pooled + weights + (4 << 20)  # headroom
    return int(min(max(est, 32 << 20), 56 << 20))


# ----------------------------------------------------------------------------
# pallas_call wrapper
# ----------------------------------------------------------------------------
def fused_forward_pallas(x, mask, x0, mask0, params, batch, seq):
    """x: (B*S, H) bf16, mask: (B*S, 1) bf16, x0: (B, H) bf16, mask0: (B, 1) bf16
       -> projected (B*S, PROJ) bf16, logits (B, 128) f32."""
    rows = batch * seq
    tile_b = _pick_tile_b(batch, seq)
    grid_n = pl.cdiv(batch, tile_b)
    padded_b = grid_n * tile_b
    if padded_b != batch:                 # pad the batch instead of a whole-batch tile
        pad_b = padded_b - batch
        x = jnp.pad(x, ((0, pad_b * seq), (0, 0)))
        mask = jnp.pad(mask, ((0, pad_b * seq), (0, 0)))
        x0 = jnp.pad(x0, ((0, pad_b), (0, 0)))
        mask0 = jnp.pad(mask0, ((0, pad_b), (0, 0)))
    tile_r = tile_b * seq

    const2 = lambda i: (0, 0)             # weights/biases stay VMEM-resident
    row_map = lambda i: (i, 0)

    projected, logits = pl.pallas_call(
        fused_kernel,
        out_shape=(
            jax.ShapeDtypeStruct((padded_b * seq, PROJ), jnp.bfloat16),
            jax.ShapeDtypeStruct((padded_b, LOGIT_PAD), jnp.float32),
        ),
        grid=(grid_n,),
        in_specs=[
            pl.BlockSpec((tile_r, HIDDEN), row_map),       # x (bf16)
            pl.BlockSpec((tile_r, 1), row_map),            # mask (bf16)
            pl.BlockSpec((tile_b, HIDDEN), row_map),       # x0: token-0 rows (bf16)
            pl.BlockSpec((tile_b, 1), row_map),            # mask0 (bf16)
            pl.BlockSpec((HIDDEN, HIDDEN), const2),        # enc_w
            pl.BlockSpec((1, HIDDEN), const2),             # enc_b
            pl.BlockSpec((HIDDEN, PROJ), const2),          # proj_w
            pl.BlockSpec((1, PROJ), const2),               # proj_b
            pl.BlockSpec((HIDDEN, HIDDEN), const2),        # dense_w
            pl.BlockSpec((1, HIDDEN), const2),             # dense_b
            pl.BlockSpec((HIDDEN, LOGIT_PAD), const2),     # out_w (padded to 128 lanes)
            pl.BlockSpec((1, LOGIT_PAD), const2),          # out_b (padded)
        ],
        out_specs=(
            pl.BlockSpec((tile_r, PROJ), row_map),         # projected (bf16, lane-dense)
            pl.BlockSpec((tile_b, LOGIT_PAD), row_map),    # logits (lane-dense)
        ),
        compiler_params=pltpu.CompilerParams(
            dimension_semantics=("parallel",),             # megacore on v7x
            vmem_limit_bytes=_vmem_limit_bytes(tile_r, tile_b),
        ),
    )(x, mask, x0, mask0,
      params["enc_w"], params["enc_b"],
      params["proj_w"], params["proj_b"],
      params["dense_w"], params["dense_b"],
      params["out_w_pad"], params["out_b_pad"])

    return projected[:rows], logits[:batch]


# ----------------------------------------------------------------------------
# Deterministic parameter init (shapes follow the nn.Module __init__)
# ----------------------------------------------------------------------------
def init_params(key):
    ks = jax.random.split(key, 5)
    s = 0.02
    out_w = s * jax.random.normal(ks[3], (HIDDEN, NUM_LABELS), jnp.float32)
    out_w_pad = jnp.zeros((HIDDEN, LOGIT_PAD), jnp.float32).at[:, :NUM_LABELS].set(out_w)
    return {
        # embedding table stored in bf16 so the gather writes bf16 (half HBM traffic)
        "embed":     (s * jax.random.normal(ks[0], (VOCAB, HIDDEN), jnp.float32)).astype(jnp.bfloat16),
        # surrogate encoder layer
        "enc_w":     (s * jax.random.normal(ks[1], (HIDDEN, HIDDEN), jnp.float32)).astype(jnp.bfloat16),
        "enc_b":     jnp.zeros((1, HIDDEN), jnp.float32),
        # ClassificationHead
        "dense_w":   (s * jax.random.normal(ks[2], (HIDDEN, HIDDEN), jnp.float32)).astype(jnp.bfloat16),
        "dense_b":   jnp.zeros((1, HIDDEN), jnp.float32),
        "out_w_pad": out_w_pad.astype(jnp.bfloat16),
        "out_b_pad": jnp.zeros((1, LOGIT_PAD), jnp.float32),
        # Seq2SeqHead.projection (768 -> 512)
        "proj_w":    (s * jax.random.normal(ks[4], (HIDDEN, PROJ), jnp.float32)).astype(jnp.bfloat16),
        "proj_b":    jnp.zeros((1, PROJ), jnp.float32),
    }


# ----------------------------------------------------------------------------
# Forward (embedding glue in plain JAX, everything else in one Pallas kernel)
# ----------------------------------------------------------------------------
def multitask_forward(params, input_ids, attention_mask):
    B, S = input_ids.shape

    # Embedding lookup (glue); bf16 activations straight into the kernel.
    x = jnp.take(params["embed"], input_ids.reshape(-1), axis=0)          # (B*S, H) bf16
    mask = attention_mask.astype(jnp.bfloat16).reshape(B * S, 1)
    x0 = jnp.take(params["embed"], input_ids[:, 0], axis=0)               # (B, H) bf16
    mask0 = attention_mask[:, 0].astype(jnp.bfloat16).reshape(B, 1)

    # TODO(synk): the pretrained multi-layer ALBERT self-attention encoder is not
    # translatable here; a single dense+tanh layer (masked) stands in for
    # `self.encoder(...).last_hidden_state` inside the fused kernel.
    projected, logits_padded = fused_forward_pallas(x, mask, x0, mask0, params, B, S)

    label_logits = logits_padded[:, :NUM_LABELS]         # (B, num_labels) f32
    projected = projected.reshape(B, S, PROJ)            # (B, S, 512) bf16

    # TODO(synk): T5ForConditionalGeneration (decoder + lm_head producing
    # seq2seq_output.logits) has no Pallas equivalent; we return the projected
    # encoder states that would be fed to it as `encoder_outputs`.
    return label_logits, projected


# ----------------------------------------------------------------------------
# Pure-JAX reference of the same surrogate math (for a sanity check)
# ----------------------------------------------------------------------------
def _reference_forward(params, input_ids, attention_mask):
    B, S = input_ids.shape
    x = jnp.take(params["embed"], input_ids.reshape(-1), axis=0)          # bf16 (B*S, H)
    mask = attention_mask.astype(jnp.bfloat16).reshape(B * S, 1)

    h = jnp.dot(x, params["enc_w"], preferred_element_type=jnp.float32) + params["enc_b"]
    shared = jnp.tanh(h.astype(jnp.bfloat16)) * mask                      # bf16

    proj = jnp.dot(shared, params["proj_w"], preferred_element_type=jnp.float32) + params["proj_b"]
    projected = proj.astype(jnp.bfloat16).reshape(B, S, PROJ)

    pooled = shared.reshape(B, S, HIDDEN)[:, 0]
    d = jnp.dot(pooled, params["dense_w"], preferred_element_type=jnp.float32) + params["dense_b"]
    d = jnp.tanh(d.astype(jnp.bfloat16))
    logits = jnp.dot(d, params["out_w_pad"], preferred_element_type=jnp.float32) + params["out_b_pad"]
    return logits[:, :NUM_LABELS], projected


# ----------------------------------------------------------------------------
if __name__ == "__main__":
    import numpy as np

    key = jax.random.PRNGKey(0)
    pkey, dkey = jax.random.split(key)

    params = init_params(pkey)

    B, S = 2, 8
    input_ids = jax.random.randint(dkey, (B, S), 0, VOCAB, dtype=jnp.int32)
    attention_mask = jnp.ones((B, S), dtype=jnp.int32)

    label_logits, seq2seq_states = multitask_forward(params, input_ids, attention_mask)
    jax.block_until_ready((label_logits, seq2seq_states))

    assert label_logits.shape == (B, NUM_LABELS)
    assert seq2seq_states.shape == (B, S, PROJ)

    # Sanity check against a pure-JAX reference of the same surrogate math.
    ref_logits, ref_states = _reference_forward(params, input_ids, attention_mask)
    np.testing.assert_allclose(np.asarray(label_logits.astype(jnp.float32)),
                               np.asarray(ref_logits.astype(jnp.float32)),
                               rtol=5e-2, atol=2e-2)
    np.testing.assert_allclose(np.asarray(seq2seq_states.astype(jnp.float32)),
                               np.asarray(ref_states.astype(jnp.float32)),
                               rtol=5e-2, atol=2e-2)

    print("KERNEL_OK")
</pallas_src>

<mosaic_0001>
module attributes {stable_mosaic.version = 11 : i64} {
  func.func @fused_kernel(%arg0: i32, %arg1: memref<16x768xbf16, #tpu.memory_space<vmem>>, %arg2: memref<16x1xbf16, #tpu.memory_space<vmem>>, %arg3: memref<2x768xbf16, #tpu.memory_space<vmem>>, %arg4: memref<2x1xbf16, #tpu.memory_space<vmem>>, %arg5: memref<768x768xbf16, #tpu.memory_space<vmem>>, %arg6: memref<1x768xf32, #tpu.memory_space<vmem>>, %arg7: memref<768x512xbf16, #tpu.memory_space<vmem>>, %arg8: memref<1x512xf32, #tpu.memory_space<vmem>>, %arg9: memref<768x768xbf16, #tpu.memory_space<vmem>>, %arg10: memref<1x768xf32, #tpu.memory_space<vmem>>, %arg11: memref<768x128xbf16, #tpu.memory_space<vmem>>, %arg12: memref<1x128xf32, #tpu.memory_space<vmem>>, %arg13: memref<16x512xbf16, #tpu.memory_space<vmem>>, %arg14: memref<2x128xf32, #tpu.memory_space<vmem>>) attributes {dimension_semantics = [#tpu.dimension_semantics<parallel>], iteration_bounds = array<i64: 1>, scalar_prefetch = 0 : i64, scratch_operands = 0 : i64, tpu.core_type = #tpu.core_type<tc>, window_params = [{transform_indices = @transform_0, window_bounds = array<i64: 16, 768>}, {transform_indices = @transform_1, window_bounds = array<i64: 16, 1>}, {transform_indices = @transform_2, window_bounds = array<i64: 2, 768>}, {transform_indices = @transform_3, window_bounds = array<i64: 2, 1>}, {pipeline_mode = #tpu.pipeline_mode<synchronous>, transform_indices = @transform_4, window_bounds = array<i64: 768, 768>}, {pipeline_mode = #tpu.pipeline_mode<synchronous>, transform_indices = @transform_5, window_bounds = array<i64: 1, 768>}, {pipeline_mode = #tpu.pipeline_mode<synchronous>, transform_indices = @transform_6, window_bounds = array<i64: 768, 512>}, {pipeline_mode = #tpu.pipeline_mode<synchronous>, transform_indices = @transform_7, window_bounds = array<i64: 1, 512>}, {pipeline_mode = #tpu.pipeline_mode<synchronous>, transform_indices = @transform_8, window_bounds = array<i64: 768, 768>}, {pipeline_mode = #tpu.pipeline_mode<synchronous>, transform_indices = @transform_9, window_bounds = array<i64: 1, 768>}, {pipeline_mode = #tpu.pipeline_mode<synchronous>, transform_indices = @transform_10, window_bounds = array<i64: 768, 128>}, {pipeline_mode = #tpu.pipeline_mode<synchronous>, transform_indices = @transform_11, window_bounds = array<i64: 1, 128>}, {transform_indices = @transform_12, window_bounds = array<i64: 16, 512>}, {transform_indices = @transform_13, window_bounds = array<i64: 2, 128>}]} {
    %c0 = arith.constant 0 : index
    %c0_0 = arith.constant 0 : index
    %0 = vector.load %arg1[%c0, %c0_0] : memref<16x768xbf16, #tpu.memory_space<vmem>>, vector<16x768xbf16>
    %c0_1 = arith.constant 0 : index
    %c0_2 = arith.constant 0 : index
    %1 = vector.load %arg5[%c0_1, %c0_2] : memref<768x768xbf16, #tpu.memory_space<vmem>>, vector<768x768xbf16>
    %cst = arith.constant dense<0.000000e+00> : vector<16x768xf32>
    %2 = tpu.matmul %0, %1, %cst {dimension_numbers = #tpu.dot_dimension_numbers<[1], [0], [0], [1], [0, 0, 1, 1], [], []>} : vector<16x768xbf16>, vector<768x768xbf16>, vector<16x768xf32> -> vector<16x768xf32>
    %c0_3 = arith.constant 0 : index
    %c0_4 = arith.constant 0 : index
    %3 = vector.load %arg6[%c0_3, %c0_4] : memref<1x768xf32, #tpu.memory_space<vmem>>, vector<1x768xf32>
    %4 = vector.broadcast %3 : vector<1x768xf32> to vector<16x768xf32>
    %5 = arith.addf %2, %4 : vector<16x768xf32>
    %6 = arith.truncf %5 : vector<16x768xf32> to vector<16x768xbf16>
    %7 = math.tanh %6 : vector<16x768xbf16>
    %c0_5 = arith.constant 0 : index
    %c0_6 = arith.constant 0 : index
    %8 = vector.load %arg2[%c0_5, %c0_6] : memref<16x1xbf16, #tpu.memory_space<vmem>>, vector<16x1xbf16>
    %9 = vector.broadcast %8 : vector<16x1xbf16> to vector<16x768xbf16>
    %10 = arith.mulf %7, %9 : vector<16x768xbf16>
    %c0_7 = arith.constant 0 : index
    %c0_8 = arith.constant 0 : index
    %11 = vector.load %arg7[%c0_7, %c0_8] : memref<768x512xbf16, #tpu.memory_space<vmem>>, vector<768x512xbf16>
    %cst_9 = arith.constant dense<0.000000e+00> : vector<16x512xf32>
    %12 = tpu.matmul %10, %11, %cst_9 {dimension_numbers = #tpu.dot_dimension_numbers<[1], [0], [0], [1], [0, 0, 1, 1], [], []>} : vector<16x768xbf16>, vector<768x512xbf16>, vector<16x512xf32> -> vector<16x512xf32>
    %c0_10 = arith.constant 0 : index
    %c0_11 = arith.constant 0 : index
    %13 = vector.load %arg8[%c0_10, %c0_11] : memref<1x512xf32, #tpu.memory_space<vmem>>, vector<1x512xf32>
    %14 = vector.broadcast %13 : vector<1x512xf32> to vector<16x512xf32>
    %15 = arith.addf %12, %14 : vector<16x512xf32>
    %16 = arith.truncf %15 : vector<16x512xf32> to vector<16x512xbf16>
    %c0_12 = arith.constant 0 : index
    %c0_13 = arith.constant 0 : index
    %17 = vector.load %arg13[%c0_12, %c0_13] : memref<16x512xbf16, #tpu.memory_space<vmem>>, vector<16x512xbf16>
    tpu.vector_store %arg13[%c0_12, %c0_13], %16 {strides = array<i32>} : memref<16x512xbf16, #tpu.memory_space<vmem>>, vector<16x512xbf16>,
    %c0_14 = arith.constant 0 : index
    %c0_15 = arith.constant 0 : index
    %18 = vector.load %arg3[%c0_14, %c0_15] : memref<2x768xbf16, #tpu.memory_space<vmem>>, vector<2x768xbf16>
    %c0_16 = arith.constant 0 : index
    %c0_17 = arith.constant 0 : index
    %19 = vector.load %arg5[%c0_16, %c0_17] : memref<768x768xbf16, #tpu.memory_space<vmem>>, vector<768x768xbf16>
    %cst_18 = arith.constant dense<0.000000e+00> : vector<2x768xf32>
    %20 = tpu.matmul %18, %19, %cst_18 {dimension_numbers = #tpu.dot_dimension_numbers<[1], [0], [0], [1], [0, 0, 1, 1], [], []>} : vector<2x768xbf16>, vector<768x768xbf16>, vector<2x768xf32> -> vector<2x768xf32>
    %c0_19 = arith.constant 0 : index
    %c0_20 = arith.constant 0 : index
    %21 = vector.load %arg6[%c0_19, %c0_20] : memref<1x768xf32, #tpu.memory_space<vmem>>, vector<1x768xf32>
    %22 = vector.broadcast %21 : vector<1x768xf32> to vector<2x768xf32>
    %23 = arith.addf %20, %22 : vector<2x768xf32>
    %24 = arith.truncf %23 : vector<2x768xf32> to vector<2x768xbf16>
    %25 = math.tanh %24 : vector<2x768xbf16>
    %c0_21 = arith.constant 0 : index
    %c0_22 = arith.constant 0 : index
    %26 = vector.load %arg4[%c0_21, %c0_22] : memref<2x1xbf16, #tpu.memory_space<vmem>>, vector<2x1xbf16>
    %27 = vector.broadcast %26 : vector<2x1xbf16> to vector<2x768xbf16>
    %28 = arith.mulf %25, %27 : vector<2x768xbf16>
    %c0_23 = arith.constant 0 : index
    %c0_24 = arith.constant 0 : index
    %29 = vector.load %arg9[%c0_23, %c0_24] : memref<768x768xbf16, #tpu.memory_space<vmem>>, vector<768x768xbf16>
    %cst_25 = arith.constant dense<0.000000e+00> : vector<2x768xf32>
    %30 = tpu.matmul %28, %29, %cst_25 {dimension_numbers = #tpu.dot_dimension_numbers<[1], [0], [0], [1], [0, 0, 1, 1], [], []>} : vector<2x768xbf16>, vector<768x768xbf16>, vector<2x768xf32> -> vector<2x768xf32>
    %c0_26 = arith.constant 0 : index
    %c0_27 = arith.constant 0 : index
    %31 = vector.load %arg10[%c0_26, %c0_27] : memref<1x768xf32, #tpu.memory_space<vmem>>, vector<1x768xf32>
    %32 = vector.broadcast %31 : vector<1x768xf32> to vector<2x768xf32>
    %33 = arith.addf %30, %32 : vector<2x768xf32>
    %34 = arith.truncf %33 : vector<2x768xf32> to vector<2x768xbf16>
    %35 = math.tanh %34 : vector<2x768xbf16>
    %c0_28 = arith.constant 0 : index
    %c0_29 = arith.constant 0 : index
    %36 = vector.load %arg11[%c0_28, %c0_29] : memref<768x128xbf16, #tpu.memory_space<vmem>>, vector<768x128xbf16>
    %cst_30 = arith.constant dense<0.000000e+00> : vector<2x128xf32>
    %37 = tpu.matmul %35, %36, %cst_30 {dimension_numbers = #tpu.dot_dimension_numbers<[1], [0], [0], [1], [0, 0, 1, 1], [], []>} : vector<2x768xbf16>, vector<768x128xbf16>, vector<2x128xf32> -> vector<2x128xf32>
    %c0_31 = arith.constant 0 : index
    %c0_32 = arith.constant 0 : index
    %38 = vector.load %arg12[%c0_31, %c0_32] : memref<1x128xf32, #tpu.memory_space<vmem>>, vector<1x128xf32>
    %39 = vector.broadcast %38 : vector<1x128xf32> to vector<2x128xf32>
    %40 = arith.addf %37, %39 : vector<2x128xf32>
    %c0_33 = arith.constant 0 : index
    %c0_34 = arith.constant 0 : index
    %41 = vector.load %arg14[%c0_33, %c0_34] : memref<2x128xf32, #tpu.memory_space<vmem>>, vector<2x128xf32>
    tpu.vector_store %arg14[%c0_33, %c0_34], %40 {strides = array<i32>} : memref<2x128xf32, #tpu.memory_space<vmem>>, vector<2x128xf32>,
    return
  }
  func.func @transform_0(%arg0: i32) -> (i32, i32) {
    %c0_i32 = arith.constant 0 : i32
    %c0_i32_0 = arith.constant 0 : i32
    return %arg0, %c0_i32 : i32, i32
  }
  func.func @transform_1(%arg0: i32) -> (i32, i32) {
    %c0_i32 = arith.constant 0 : i32
    %c0_i32_0 = arith.constant 0 : i32
    return %arg0, %c0_i32 : i32, i32
  }
  func.func @transform_2(%arg0: i32) -> (i32, i32) {
    %c0_i32 = arith.constant 0 : i32
    %c0_i32_0 = arith.constant 0 : i32
    return %arg0, %c0_i32 : i32, i32
  }
  func.func @transform_3(%arg0: i32) -> (i32, i32) {
    %c0_i32 = arith.constant 0 : i32
    %c0_i32_0 = arith.constant 0 : i32
    return %arg0, %c0_i32 : i32, i32
  }
  func.func @transform_4(%arg0: i32) -> (i32, i32) {
    %c0_i32 = arith.constant 0 : i32
    %c0_i32_0 = arith.constant 0 : i32
    %c0_i32_1 = arith.constant 0 : i32
    return %c0_i32, %c0_i32_0 : i32, i32
  }
  func.func @transform_5(%arg0: i32) -> (i32, i32) {
    %c0_i32 = arith.constant 0 : i32
    %c0_i32_0 = arith.constant 0 : i32
    %c0_i32_1 = arith.constant 0 : i32
    return %c0_i32, %c0_i32_0 : i32, i32
  }
  func.func @transform_6(%arg0: i32) -> (i32, i32) {
    %c0_i32 = arith.constant 0 : i32
    %c0_i32_0 = arith.constant 0 : i32
    %c0_i32_1 = arith.constant 0 : i32
    return %c0_i32, %c0_i32_0 : i32, i32
  }
  func.func @transform_7(%arg0: i32) -> (i32, i32) {
    %c0_i32 = arith.constant 0 : i32
    %c0_i32_0 = arith.constant 0 : i32
    %c0_i32_1 = arith.constant 0 : i32
    return %c0_i32, %c0_i32_0 : i32, i32
  }
  func.func @transform_8(%arg0: i32) -> (i32, i32) {
    %c0_i32 = arith.constant 0 : i32
    %c0_i32_0 = arith.constant 0 : i32
    %c0_i32_1 = arith.constant 0 : i32
    return %c0_i32, %c0_i32_0 : i32, i32
  }
  func.func @transform_9(%arg0: i32) -> (i32, i32) {
    %c0_i32 = arith.constant 0 : i32
    %c0_i32_0 = arith.constant 0 : i32
    %c0_i32_1 = arith.constant 0 : i32
    return %c0_i32, %c0_i32_0 : i32, i32
  }
  func.func @transform_10(%arg0: i32) -> (i32, i32) {
    %c0_i32 = arith.constant 0 : i32
    %c0_i32_0 = arith.constant 0 : i32
    %c0_i32_1 = arith.constant 0 : i32
    return %c0_i32, %c0_i32_0 : i32, i32
  }
  func.func @transform_11(%arg0: i32) -> (i32, i32) {
    %c0_i32 = arith.constant 0 : i32
    %c0_i32_0 = arith.constant 0 : i32
    %c0_i32_1 = arith.constant 0 : i32
    return %c0_i32, %c0_i32_0 : i32, i32
  }
  func.func @transform_12(%arg0: i32) -> (i32, i32) {
    %c0_i32 = arith.constant 0 : i32
    %c0_i32_0 = arith.constant 0 : i32
    return %arg0, %c0_i32 : i32, i32
  }
  func.func @transform_13(%arg0: i32) -> (i32, i32) {
    %c0_i32 = arith.constant 0 : i32
    %c0_i32_0 = arith.constant 0 : i32
    return %arg0, %c0_i32 : i32, i32
  }
}

</mosaic_0001>

<bundles_post_ra>
// kernel: tpu_custom_call.1
= control target key start
LH: loop header
LB: loop body
LE: loop exit
PB: predicated region body
PF: predicated region fallthrough
CT: control target
= control target key end

     0   :  { %19 = vsyncpa [#allocation3], 0  ;;  %s12634_s0 = inlined_call_operand.hbm [shape: bf16[16,768], index: 0, kind: input, shape index: {}]   ;;  %s12635_s1 = inlined_call_operand.vmem [shape: bf16[16,1], index: 1, kind: input, shape index: {}]   ;;  %s12636_s2 = inlined_call_operand.hbm [shape: bf16[2,768], index: 2, kind: input, shape index: {}]   ;;  %s12637_s3 = inlined_call_operand.hbm [shape: bf16[2,1], index: 3, kind: input, shape index: {}]   ;;  %s12638_s4 = inlined_call_operand.hbm [shape: bf16[768,768], index: 4, kind: input, shape index: {}]   ;;  %s12639_s5 = inlined_call_operand.hbm [shape: f32[1,768], index: 5, kind: input, shape index: {}]   ;;  %s12640_s6 = inlined_call_operand.hbm [shape: bf16[768,512], index: 6, kind: input, shape index: {}]   ;;  %s12641_s7 = inlined_call_operand.hbm [shape: f32[1,512], index: 7, kind: input, shape index: {}]   ;;  %s12642_s8 = inlined_call_operand.hbm [shape: bf16[768,768], index: 8, kind: input, shape index: {}]   ;;  %s12643_s9 = inlined_call_operand.hbm [shape: f32[1,768], index: 9, kind: input, shape index: {}]   ;;  %s12644_s10 = inlined_call_operand.hbm [shape: bf16[768,128], index: 10, kind: input, shape index: {}]   ;;  %s12645_s11 = inlined_call_operand.hbm [shape: f32[1,128], index: 11, kind: input, shape index: {}]   ;;  %s12646_s12 = inlined_call_operand.hbm [shape: bf16[16,512], index: 12, kind: output, shape index: {0}]   ;;  %s12647_s13 = inlined_call_operand.hbm [shape: f32[2,128], index: 13, kind: output, shape index: {1}]  }
   0x1   :  { %20 = vsyncpa [#allocation6], 0 }
   0x2   :  { %21 = vsyncpa [#allocation9], 0 }
   0x3   :  { %22 = vsyncpa [#allocation12], 0 }
   0x4   :  { %23 = vsyncpa [#allocation15], 0 }
   0x5   :  { %24 = vsyncpa [#allocation18], 0 }
   0x6   :  { %25 = vsyncpa [#allocation4], 0 }
   0x7   :  { %26 = vsyncpa [#allocation22], 0  ;;  %s12146_s25 = smov [#allocation5]   ;;  %s11844_s29 = scalar_lea.hbm %s12636_s2, 96 }
   0x8   :  { %s47_s26 = sshll.u32 %s12146_s25, 4  ;;  %p11845_p0 = scmp.ne.s32.totalorder %s12636_s2, %s11844_s29  ;;  %s48_s26 = int_to_ptr.vmem [resolvable:$true] %s47_s26 }
   0x9   :  { %p11848_p1 = scmp.lt.u32.totalorder %s11844_s29, %s12636_s2 }
   0xb   :  { %p11850_p2 = pnand %p11848_p1, %p11845_p0 }
   0xd   :  { %11853 = shalt.err (!%p11850_p2)
}
   0xe   :  { %s11854_s17 = scalar_lea.vmem %s48_s26, 96  ;;  %p11859_p4 = scmp.lt.s32.totalorder %s48_s26, %s48_s26 }
   0xf   :  { %p11855_p3 = scmp.ne.s32.totalorder %s48_s26, %s11854_s17  ;;  %p11860_p5 = scmp.lt.s32.totalorder %s11854_s17, %s11854_s17 }
  0x11   :  { %p11861_p6 = por %p11860_p5, %p11859_p4 }
  0x13   :  { %p11862_p7 = pnand %p11861_p6, %p11855_p3 }
  0x15   :  { %11865 = shalt.err (!%p11862_p7)
}
  0x16   :  { %50 = dma.hbm_to_vmem [thread:$0]  %s12636_s2, 96, %s48_s26, [#allocation6]  }
  0x17   :  { %s12147_s20 = smov [#allocation8]   ;;  %s12148_s22 = smov [#allocation11]  }
  0x18   :  { %s66_s21 = sshll.u32 %s12147_s20, 4  ;;  %s88_s23 = sshll.u32 %s12148_s22, 4  ;;  %s67_s21 = int_to_ptr.vmem [resolvable:$true] %s66_s21  ;;  %s89_s23 = int_to_ptr.vmem [resolvable:$true] %s88_s23 }
  0x19   :  { %s11866_s27 = scalar_lea.hbm %s12638_s4, 36864 }
  0x1a   :  { %p11867_p8 = scmp.ne.s32.totalorder %s12638_s4, %s11866_s27  ;;  %p11870_p9 = scmp.lt.u32.totalorder %s11866_s27, %s12638_s4 }
  0x1c   :  { %p11872_p10 = pnand %p11870_p9, %p11867_p8 }
  0x1e   :  { %11875 = shalt.err (!%p11872_p10)
}
  0x1f   :  { %s11876_s2 = scalar_lea.vmem %s67_s21, 36864  ;;  %p11881_p12 = scmp.lt.s32.totalorder %s67_s21, %s67_s21 }
  0x20   :  { %p11877_p11 = scmp.ne.s32.totalorder %s67_s21, %s11876_s2  ;;  %p11882_p13 = scmp.lt.s32.totalorder %s11876_s2, %s11876_s2 }
  0x22   :  { %p11883_p0 = por %p11882_p13, %p11881_p12 }
  0x24   :  { %p11884_p1 = pnand %p11883_p0, %p11877_p11 }
  0x26   :  { %11887 = shalt.err (!%p11884_p1)
}
  0x27   :  { %s12149_s26 = smov 384   ;;  %s12150_s15 = smov 24  }
  0x28   :  { %72 = dma.hbm_to_vmem [thread:$0]  %s12638_s4, 36864, %s67_s21, [#allocation9], %s12149_s26, %s12149_s26, %s12150_s15  }
  0x29   :  { %s11888_s20 = scalar_lea.hbm %s12640_s6, 24576 }
  0x2a   :  { %p11889_p2 = scmp.ne.s32.totalorder %s12640_s6, %s11888_s20  ;;  %p11892_p3 = scmp.lt.u32.totalorder %s11888_s20, %s12640_s6 }
  0x2c   :  { %p11894_p4 = pnand %p11892_p3, %p11889_p2 }
  0x2e   :  { %11897 = shalt.err (!%p11894_p4)
}
  0x2f   :  { %s11898_s28 = scalar_lea.vmem %s89_s23, 24576  ;;  %p11903_p6 = scmp.lt.s32.totalorder %s89_s23, %s89_s23 }
  0x30   :  { %p11899_p5 = scmp.ne.s32.totalorder %s89_s23, %s11898_s28  ;;  %p11904_p7 = scmp.lt.s32.totalorder %s11898_s28, %s11898_s28 }
  0x32   :  { %p11905_p8 = por %p11904_p7, %p11903_p6 }
  0x34   :  { %p11906_p9 = pnand %p11905_p8, %p11899_p5 }
  0x36   :  { %11909 = shalt.err (!%p11906_p9)
}
  0x37   :  { %s12151_s4 = smov 256   ;;  %s12152_s21 = smov 16  }
  0x38   :  { %94 = dma.hbm_to_vmem [thread:$0]  %s12640_s6, 24576, %s89_s23, [#allocation12], %s12151_s4, %s12151_s4, %s12152_s21  }
  0x39   :  { %s12153_s14 = smov [#allocation14]   ;;  %s12154_s16 = smov [#allocation17]  }
  0x3a   :  { %s110_s2 = sshll.u32 %s12153_s14, 4  ;;  %s132_s17 = sshll.u32 %s12154_s16, 4  ;;  %s111_s2 = int_to_ptr.vmem [resolvable:$true] %s110_s2  ;;  %s133_s17 = int_to_ptr.vmem [resolvable:$true] %s132_s17 }
  0x3b   :  { %s11910_s20 = scalar_lea.hbm %s12642_s8, 36864 }
  0x3c   :  { %p11911_p10 = scmp.ne.s32.totalorder %s12642_s8, %s11910_s20  ;;  %p11914_p11 = scmp.lt.u32.totalorder %s11910_s20, %s12642_s8 }
  0x3e   :  { %p11916_p12 = pnand %p11914_p11, %p11911_p10 }
  0x40   :  { %11919 = shalt.err (!%p11916_p12)
}
  0x41   :  { %s11920_s6 = scalar_lea.vmem %s111_s2, 36864  ;;  %p11925_p0 = scmp.lt.s32.totalorder %s111_s2, %s111_s2 }
  0x42   :  { %p11921_p13 = scmp.ne.s32.totalorder %s111_s2, %s11920_s6  ;;  %p11926_p1 = scmp.lt.s32.totalorder %s11920_s6, %s11920_s6 }
  0x44   :  { %p11927_p2 = por %p11926_p1, %p11925_p0 }
  0x46   :  { %p11928_p3 = pnand %p11927_p2, %p11921_p13 }
  0x48   :  { %11931 = shalt.err (!%p11928_p3)
}
  0x49   :  { %116 = dma.hbm_to_vmem [thread:$0]  %s12642_s8, 36864, %s111_s2, [#allocation15], %s12149_s26, %s12149_s26, %s12150_s15  }
  0x4a   :  { %s11932_s14 = scalar_lea.hbm %s12644_s10, 6144 }
  0x4b   :  { %p11933_p4 = scmp.ne.s32.totalorder %s12644_s10, %s11932_s14  ;;  %p11936_p5 = scmp.lt.u32.totalorder %s11932_s14, %s12644_s10 }
  0x4d   :  { %p11938_p6 = pnand %p11936_p5, %p11933_p4 }
  0x4f   :  { %11941 = shalt.err (!%p11938_p6)
}
  0x50   :  { %s11942_s22 = scalar_lea.vmem %s133_s17, 6144  ;;  %p11947_p8 = scmp.lt.s32.totalorder %s133_s17, %s133_s17 }
  0x51   :  { %p11943_p7 = scmp.ne.s32.totalorder %s133_s17, %s11942_s22  ;;  %p11948_p9 = scmp.lt.s32.totalorder %s11942_s22, %s11942_s22 }
  0x53   :  { %p11949_p10 = por %p11948_p9, %p11947_p8 }
  0x55   :  { %p11950_p11 = pnand %p11949_p10, %p11943_p7 }
  0x57   :  { %11953 = shalt.err (!%p11950_p11)
}
  0x58   :  { %s12155_s8 = smov 64   ;;  %s12156_s2 = smov 4  }
  0x59   :  { %138 = dma.hbm_to_vmem [thread:$0]  %s12644_s10, 6144, %s133_s17, [#allocation18], %s12155_s8, %s12155_s8, %s12156_s2  }
  0x5a   :  { %s12157_s27 = smov [#allocation2]   ;;  %s12158_s23 = smov [#allocation7]  }
  0x5b   :  { %s32_s6 = sshll.u32 %s12157_s27, 4  ;;  %s57_s28 = sshll.u32 %s12158_s23, 4  ;;  %s33_s6 = int_to_ptr.vmem [resolvable:$true] %s32_s6  ;;  %s58_s28 = int_to_ptr.vmem [resolvable:$true] %s57_s28 }
  0x5c   :  { %s11954_s14 = scalar_lea.hbm %s12634_s0, 768 }
  0x5d   :  { %p11955_p12 = scmp.ne.s32.totalorder %s12634_s0, %s11954_s14  ;;  %p11958_p13 = scmp.lt.u32.totalorder %s11954_s14, %s12634_s0 }
  0x5f   :  { %p11960_p0 = pnand %p11958_p13, %p11955_p12 }
  0x61   :  { %11963 = shalt.err (!%p11960_p0)
}
  0x62   :  { %s11964_s10 = scalar_lea.vmem %s33_s6, 768  ;;  %p11969_p2 = scmp.lt.s32.totalorder %s33_s6, %s33_s6 }
  0x63   :  { %p11965_p1 = scmp.ne.s32.totalorder %s33_s6, %s11964_s10  ;;  %p11970_p3 = scmp.lt.s32.totalorder %s11964_s10, %s11964_s10 }
  0x65   :  { %p11971_p4 = por %p11970_p3, %p11969_p2 }
  0x67   :  { %p11972_p5 = pnand %p11971_p4, %p11965_p1 }
  0x69   :  { %11975 = shalt.err (!%p11972_p5)
}
  0x6a   :  { %38 = dma.hbm_to_vmem [thread:$0]  %s12634_s0, 768, %s33_s6, [#allocation3], %s12149_s26, %s12149_s26, %s12150_s15  }
  0x6b   :  { %s11976_s24 = scalar_lea.hbm %s12637_s3, 16 }
  0x6c   :  { %p11977_p6 = scmp.ne.s32.totalorder %s12637_s3, %s11976_s24  ;;  %p11980_p7 = scmp.lt.u32.totalorder %s11976_s24, %s12637_s3 }
  0x6e   :  { %p11982_p8 = pnand %p11980_p7, %p11977_p6 }
  0x70   :  { %11985 = shalt.err (!%p11982_p8)
}
  0x71   :  { %s11986_s30 = scalar_lea.vmem %s58_s28, 16  ;;  %s11990_s14 = scalar_lea.vmem %s58_s28, 32 }
  0x72   :  { %p11987_p9 = scmp.ne.s32.totalorder %s58_s28, %s11986_s30  ;;  %p11991_p10 = scmp.lt.s32.totalorder %s58_s28, %s58_s28 }
  0x73   :  { %p11992_p11 = scmp.lt.s32.totalorder %s11990_s14, %s11986_s30 }
  0x75   :  { %p11993_p12 = por %p11992_p11, %p11991_p10 }
  0x77   :  { %p11994_p13 = pnand %p11993_p12, %p11987_p9 }
  0x79   :  { %11997 = shalt.err (!%p11994_p13)
}
  0x7a   :  { %60 = dma.hbm_to_vmem [thread:$0]  %s12637_s3, 16, %s58_s28, [#allocation6]  }
  0x7b   :  { %s12159_s15 = smov [#allocation10]   ;;  %s12160_s16 = smov [#allocation13]  }
  0x7c   :  { %s79_s6 = sshll.u32 %s12159_s15, 4  ;;  %s101_s18 = sshll.u32 %s12160_s16, 4  ;;  %s80_s6 = int_to_ptr.vmem [resolvable:$true] %s79_s6  ;;  %s102_s18 = int_to_ptr.vmem [resolvable:$true] %s101_s18 }
  0x7d   :  { %s11998_s10 = scalar_lea.hbm %s12639_s5, 96 }
  0x7e   :  { %p11999_p0 = scmp.ne.s32.totalorder %s12639_s5, %s11998_s10  ;;  %p12002_p1 = scmp.lt.u32.totalorder %s11998_s10, %s12639_s5 }
  0x80   :  { %p12004_p2 = pnand %p12002_p1, %p11999_p0 }
  0x82   :  { %12007 = shalt.err (!%p12004_p2)
}
  0x83   :  { %s12008_s3 = scalar_lea.vmem %s80_s6, 96  ;;  %p12013_p4 = scmp.lt.s32.totalorder %s80_s6, %s80_s6 }
  0x84   :  { %p12009_p3 = scmp.ne.s32.totalorder %s80_s6, %s12008_s3  ;;  %p12014_p5 = scmp.lt.s32.totalorder %s12008_s3, %s12008_s3 }
  0x86   :  { %p12015_p6 = por %p12014_p5, %p12013_p4 }
  0x88   :  { %p12016_p7 = pnand %p12015_p6, %p12009_p3 }
  0x8a   :  { %12019 = shalt.err (!%p12016_p7)
}
  0x8b   :  { %82 = dma.hbm_to_vmem [thread:$0]  %s12639_s5, 96, %s80_s6, [#allocation9]  }
  0x8c   :  { %s12020_s23 = scalar_lea.hbm %s12641_s7, 64 }
  0x8d   :  { %p12021_p8 = scmp.ne.s32.totalorder %s12641_s7, %s12020_s23  ;;  %p12024_p9 = scmp.lt.u32.totalorder %s12020_s23, %s12641_s7 }
  0x8f   :  { %p12026_p10 = pnand %p12024_p9, %p12021_p8 }
  0x91   :  { %12029 = shalt.err (!%p12026_p10)
}
  0x92   :  { %s12030_s26 = scalar_lea.vmem %s102_s18, 64  ;;  %p12035_p12 = scmp.lt.s32.totalorder %s102_s18, %s102_s18 }
  0x93   :  { %p12031_p11 = scmp.ne.s32.totalorder %s102_s18, %s12030_s26  ;;  %p12036_p13 = scmp.lt.s32.totalorder %s12030_s26, %s12030_s26 }
  0x95   :  { %p12037_p0 = por %p12036_p13, %p12035_p12 }
  0x97   :  { %p12038_p1 = pnand %p12037_p0, %p12031_p11 }
  0x99   :  { %12041 = shalt.err (!%p12038_p1)
}
  0x9a   :  { %104 = dma.hbm_to_vmem [thread:$0]  %s12641_s7, 64, %s102_s18, [#allocation12]  }
  0x9b   :  { %s12161_s6 = smov [#allocation16]   ;;  %s12162_s19 = smov [#allocation19]  }
  0x9c   :  { %s123_s16 = sshll.u32 %s12161_s6, 4  ;;  %s145_s20 = sshll.u32 %s12162_s19, 4  ;;  %s124_s16 = int_to_ptr.vmem [resolvable:$true] %s123_s16  ;;  %s146_s20 = int_to_ptr.vmem [resolvable:$true] %s145_s20 }
  0x9d   :  { %s12042_s22 = scalar_lea.hbm %s12643_s9, 96 }
  0x9e   :  { %p12043_p2 = scmp.ne.s32.totalorder %s12643_s9, %s12042_s22  ;;  %p12046_p3 = scmp.lt.u32.totalorder %s12042_s22, %s12643_s9 }
  0xa0   :  { %p12048_p4 = pnand %p12046_p3, %p12043_p2 }
  0xa2   :  { %12051 = shalt.err (!%p12048_p4)
}
  0xa3   :  { %s12052_s7 = scalar_lea.vmem %s124_s16, 96  ;;  %p12057_p6 = scmp.lt.s32.totalorder %s124_s16, %s124_s16 }
  0xa4   :  { %p12053_p5 = scmp.ne.s32.totalorder %s124_s16, %s12052_s7  ;;  %p12058_p7 = scmp.lt.s32.totalorder %s12052_s7, %s12052_s7 }
  0xa6   :  { %p12059_p8 = por %p12058_p7, %p12057_p6 }
  0xa8   :  { %p12060_p9 = pnand %p12059_p8, %p12053_p5 }
  0xaa   :  { %12063 = shalt.err (!%p12060_p9)
}
  0xab   :  { %126 = dma.hbm_to_vmem [thread:$0]  %s12643_s9, 96, %s124_s16, [#allocation15]  }
  0xac   :  { %s12064_s23 = scalar_lea.hbm %s12645_s11, 16 }
  0xad   :  { %p12065_p10 = scmp.ne.s32.totalorder %s12645_s11, %s12064_s23  ;;  %p12068_p11 = scmp.lt.u32.totalorder %s12064_s23, %s12645_s11 }
  0xaf   :  { %p12070_p12 = pnand %p12068_p11, %p12065_p10 }
  0xb1   :  { %12073 = shalt.err (!%p12070_p12)
}
  0xb2   :  { %s12074_s26 = scalar_lea.vmem %s146_s20, 16  ;;  %s12078_s5 = scalar_lea.vmem %s146_s20, 32 }
  0xb3   :  { %p12075_p13 = scmp.ne.s32.totalorder %s146_s20, %s12074_s26  ;;  %p12079_p0 = scmp.lt.s32.totalorder %s146_s20, %s146_s20 }
  0xb4   :  { %p12080_p1 = scmp.lt.s32.totalorder %s12078_s5, %s12074_s26 }
  0xb6   :  { %p12081_p2 = por %p12080_p1, %p12079_p0 }
  0xb8   :  { %p12082_p3 = pnand %p12081_p2, %p12075_p13 }
  0xba   :  { %12085 = shalt.err (!%p12082_p3)
}
  0xbb   :  { %148 = dma.hbm_to_vmem [thread:$0]  %s12645_s11, 16, %s146_s20, [#allocation18]  }
  0xbc   :  { %12130 = dma.done.wait [#allocation3], 768  }
  0xbd   :  { %12131 = vsyncadd [#allocation3], 4294966528 }
  0xbe   :  { %12132 = dma.done.wait [#allocation6], 112  }
  0xbf   :  { %12133 = vsyncadd [#allocation6], 4294967184 }
  0xc0   :  { %12134 = dma.done.wait [#allocation9], 36960  }
  0xc1   :  { %12135 = vsyncadd [#allocation9], 4294930336 }
  0xc2   :  { %12136 = dma.done.wait [#allocation12], 24640  }
  0xc3   :  { %12137 = vsyncadd [#allocation12], 4294942656 }
  0xc4   :  { %12138 = dma.done.wait [#allocation15], 36960  }
  0xc5   :  { %12139 = vsyncadd [#allocation15], 4294930336 }
  0xc6   :  { %12140 = dma.done.wait [#allocation18], 6160  }
  0xc7   :  { %12141 = vsyncadd [#allocation18], 4294961136  ;;  %v10161_v0 = vld [vmem:[#allocation8 + $0x4] ss:$24 sps:$4 sm:$0xff]   ;;  %v10165_v2 = vld [vmem:[#allocation8] ss:$24 sps:$4 sm:$0xff]  }
  0xc8   :  { %v10163_v1 = vld [vmem:[#allocation8 + $0x304] ss:$24 sps:$4 sm:$0xff]   ;;  %1979 = vmatprep.subr.bf16.mxu1 %v10161_v0  ;;  %v10166_v3 = vld [vmem:[#allocation8 + $0x300] ss:$24 sps:$4 sm:$0xff]   ;;  %v10167_v4 = vld [vmem:[#allocation8 + $0x34] ss:$24 sps:$4 sm:$0xff]  }
  0xc9   :  { %2022 = vmatprep.subr.bf16.mxu0 %v10163_v1  ;;  %1980 = vmatpush1.bf16.msra.mxu1 %v10165_v2  ;;  %v10169_v5 = vld [vmem:[#allocation8 + $0x334] ss:$24 sps:$4 sm:$0xff]   ;;  %v10171_v6 = vld [vmem:[#allocation8 + $0x30] ss:$24 sps:$4 sm:$0xff]   ;;  %v10173_v8 = vld [vmem:[#allocation8 + $0x64] ss:$24 sps:$4 sm:$0xff]  }
  0xca   :  { %2023 = vmatpush1.bf16.msra.mxu0 %v10166_v3  ;;  %1981 = vmatprep.subr.bf16.mxu1 %v10167_v4  ;;  %v10172_v7 = vld [vmem:[#allocation8 + $0x330] ss:$24 sps:$4 sm:$0xff]   ;;  %v10175_v9 = vld [vmem:[#allocation8 + $0x364] ss:$24 sps:$4 sm:$0xff]   ;;  %v10177_v10 = vld [vmem:[#allocation8 + $0x60] ss:$24 sps:$4 sm:$0xff]  }
  0xcb   :  { %2024 = vmatprep.subr.bf16.mxu0 %v10169_v5  ;;  %v10178_v11 = vld [vmem:[#allocation8 + $0x360] ss:$24 sps:$4 sm:$0xff]   ;;  %v10179_v12 = vld [vmem:[#allocation8 + $0x94] ss:$24 sps:$4 sm:$0xff]   ;;  %v10183_v14 = vld [vmem:[#allocation8 + $0x90] ss:$24 sps:$4 sm:$0xff]  }
  0xcc   :  { %v10181_v13 = vld [vmem:[#allocation8 + $0x394] ss:$24 sps:$4 sm:$0xff]   ;;  %v10184_v15 = vld [vmem:[#allocation8 + $0x390] ss:$24 sps:$4 sm:$0xff]   ;;  %v10185_v16 = vld [vmem:[#allocation8 + $0xc4] ss:$24 sps:$4 sm:$0xff]  }
  0xcd   :  { %1982 = vmatpush1.bf16.msra.mxu1 %v10171_v6  ;;  %v10187_v17 = vld [vmem:[#allocation8 + $0x3c4] ss:$24 sps:$4 sm:$0xff]   ;;  %v10189_v18 = vld [vmem:[#allocation8 + $0xc0] ss:$24 sps:$4 sm:$0xff]   ;;  %v10191_v20 = vld [vmem:[#allocation8 + $0xf4] ss:$24 sps:$4 sm:$0xff]  }
  0xce   :  { %2025 = vmatpush1.bf16.msra.mxu0 %v10172_v7  ;;  %1983 = vmatprep.subr.bf16.mxu1 %v10173_v8  ;;  %v10190_v19 = vld [vmem:[#allocation8 + $0x3c0] ss:$24 sps:$4 sm:$0xff]   ;;  %v10193_v21 = vld [vmem:[#allocation8 + $0x3f4] ss:$24 sps:$4 sm:$0xff]   ;;  %v10195_v22 = vld [vmem:[#allocation8 + $0xf0] ss:$24 sps:$4 sm:$0xff]  }
  0xcf   :  { %2026 = vmatprep.subr.bf16.mxu0 %v10175_v9  ;;  %v10196_v23 = vld [vmem:[#allocation8 + $0x3f0] ss:$24 sps:$4 sm:$0xff]   ;;  %v10197_v24 = vld [vmem:[#allocation8 + $0x124] ss:$24 sps:$4 sm:$0xff]   ;;  %v10201_v26 = vld [vmem:[#allocation8 + $0x120] ss:$24 sps:$4 sm:$0xff]  }
  0xd0   :  { %v10199_v25 = vld [vmem:[#allocation8 + $0x424] ss:$24 sps:$4 sm:$0xff]   ;;  %v10202_v27 = vld [vmem:[#allocation8 + $0x420] ss:$24 sps:$4 sm:$0xff]   ;;  %v10203_v28 = vld [vmem:[#allocation8 + $0x154] ss:$24 sps:$4 sm:$0xff]  }
  0xd1   :  { %1984 = vmatpush1.bf16.msra.mxu1 %v10177_v10  ;;  %v10205_v29 = vld [vmem:[#allocation8 + $0x454] ss:$24 sps:$4 sm:$0xff]   ;;  %v10207_v30 = vld [vmem:[#allocation8 + $0x150] ss:$24 sps:$4 sm:$0xff]   ;;  %v10209_v32 = vld [vmem:[#allocation8 + $0x184] ss:$24 sps:$4 sm:$0xff]  }
  0xd2   :  { %2027 = vmatpush1.bf16.msra.mxu0 %v10178_v11  ;;  %1985 = vmatprep.subr.bf16.mxu1 %v10179_v12  ;;  %v10208_v31 = vld [vmem:[#allocation8 + $0x450] ss:$24 sps:$4 sm:$0xff]   ;;  %v10211_v33 = vld [vmem:[#allocation8 + $0x484] ss:$24 sps:$4 sm:$0xff]   ;;  %v10213_v34 = vld [vmem:[#allocation8 + $0x180] ss:$24 sps:$4 sm:$0xff]  }
  0xd3   :  { %2028 = vmatprep.subr.bf16.mxu0 %v10181_v13  ;;  %v10214_v35 = vld [vmem:[#allocation8 + $0x480] ss:$24 sps:$4 sm:$0xff]   ;;  %v10215_v36 = vld [vmem:[#allocation8 + $0x1b4] ss:$24 sps:$4 sm:$0xff]   ;;  %v10219_v38 = vld [vmem:[#allocation8 + $0x1b0] ss:$24 sps:$4 sm:$0xff]  }
  0xd4   :  { %v10217_v37 = vld [vmem:[#allocation8 + $0x4b4] ss:$24 sps:$4 sm:$0xff]   ;;  %v10220_v39 = vld [vmem:[#allocation8 + $0x4b0] ss:$24 sps:$4 sm:$0xff]   ;;  %v10221_v40 = vld [vmem:[#allocation8 + $0x1e4] ss:$24 sps:$4 sm:$0xff]  }
  0xd5   :  { %1986 = vmatpush1.bf16.msra.mxu1 %v10183_v14  ;;  %v10223_v41 = vld [vmem:[#allocation8 + $0x4e4] ss:$24 sps:$4 sm:$0xff]   ;;  %v10225_v42 = vld [vmem:[#allocation8 + $0x1e0] ss:$24 sps:$4 sm:$0xff]   ;;  %v10227_v44 = vld [vmem:[#allocation8 + $0x214] ss:$24 sps:$4 sm:$0xff]  }
  0xd6   :  { %2029 = vmatpush1.bf16.msra.mxu0 %v10184_v15  ;;  %1987 = vmatprep.subr.bf16.mxu1 %v10185_v16  ;;  %v10226_v43 = vld [vmem:[#allocation8 + $0x4e0] ss:$24 sps:$4 sm:$0xff]   ;;  %v10229_v45 = vld [vmem:[#allocation8 + $0x514] ss:$24 sps:$4 sm:$0xff]   ;;  %v10231_v46 = vld [vmem:[#allocation8 + $0x210] ss:$24 sps:$4 sm:$0xff]  }
  0xd7   :  { %2030 = vmatprep.subr.bf16.mxu0 %v10187_v17  ;;  %v10232_v47 = vld [vmem:[#allocation8 + $0x510] ss:$24 sps:$4 sm:$0xff]   ;;  %v10233_v48 = vld [vmem:[#allocation8 + $0x244] ss:$24 sps:$4 sm:$0xff]   ;;  %v12384_v50 = vld [vmem:[#allocation2 + $0xc] ss:$24 sps:$4 sm:$0xff]  }
  0xd8   :  { %v12382_v49 = vld [vmem:[#allocation2 + $0x4] ss:$24 sps:$4 sm:$0xff]   ;;  %2054 = vmatprep.mubr.bf16.mxu0 %v12384_v50  ;;  %v10237_v52 = vld [vmem:[#allocation8 + $0x240] ss:$24 sps:$4 sm:$0xff]   ;;  %v10243_v56 = vld [vmem:[#allocation8 + $0x270] ss:$24 sps:$4 sm:$0xff]  }
  0xd9   :  { %1988 = vmatpush1.bf16.msra.mxu1 %v10189_v18  ;;  %v10235_v51 = vld [vmem:[#allocation8 + $0x544] ss:$24 sps:$4 sm:$0xff]   ;;  %2011 = vmatprep.mubr.bf16.mxu1 %v12382_v49  ;;  %v10238_v53 = vld [vmem:[#allocation8 + $0x540] ss:$24 sps:$4 sm:$0xff]   ;;  %v10239_v54 = vld [vmem:[#allocation8 + $0x274] ss:$24 sps:$4 sm:$0xff]  }
  0xda   :  { %2031 = vmatpush1.bf16.msra.mxu0 %v10190_v19  ;;  %1989 = vmatprep.subr.bf16.mxu1 %v10191_v20  ;;  %v10241_v55 = vld [vmem:[#allocation8 + $0x574] ss:$24 sps:$4 sm:$0xff]   ;;  %v10244_v57 = vld [vmem:[#allocation8 + $0x570] ss:$24 sps:$4 sm:$0xff]   ;;  %v10245_v58 = vld [vmem:[#allocation8 + $0x2a4] ss:$24 sps:$4 sm:$0xff]  }
  0xdb   :  { %2032 = vmatprep.subr.bf16.mxu0 %v10193_v21  ;;  %v10247_v59 = vld [vmem:[#allocation8 + $0x5a4] ss:$24 sps:$4 sm:$0xff]   ;;  %v10249_v60 = vld [vmem:[#allocation8 + $0x2a0] ss:$24 sps:$4 sm:$0xff]   ;;  %v10251_v62 = vld [vmem:[#allocation8 + $0x2d4] ss:$24 sps:$4 sm:$0xff]  }
  0xdc   :  { %v10250_v61 = vld [vmem:[#allocation8 + $0x5a0] ss:$24 sps:$4 sm:$0xff]   ;;  %v10253_v63 = vld [vmem:[#allocation8 + $0x5d4] ss:$24 sps:$4 sm:$0xff]   ;;  %v10255_v0 = vld [vmem:[#allocation8 + $0x2d0] ss:$24 sps:$4 sm:$0xff]  }
  0xdd   :  { %1990 = vmatpush1.bf16.msra.mxu1 %v10195_v22  ;;  %v10256_v1 = vld [vmem:[#allocation8 + $0x5d0] ss:$24 sps:$4 sm:$0xff]   ;;  %v10264_v2 = vld [vmem:[#allocation8 + $0x604] ss:$24 sps:$4 sm:$0xff]   ;;  %v10262_v5 = vld [vmem:[#allocation8 + $0x600] ss:$24 sps:$4 sm:$0xff]  }
  0xde   :  { %2033 = vmatpush1.bf16.msra.mxu0 %v10196_v23  ;;  %1991 = vmatprep.subr.bf16.mxu1 %v10197_v24  ;;  %v10267_v3 = vld [vmem:[#allocation8 + $0xc] ss:$24 sps:$4 sm:$0xff]   ;;  %v12388_v4 = vld [vmem:[#allocation2] ss:$24 sps:$4 sm:$0xff]   ;;  %v10274_v9 = vld [vmem:[#allocation8 + $0x3c] ss:$24 sps:$4 sm:$0xff]  }
  0xdf   :  { %2034 = vmatprep.subr.bf16.mxu0 %v10199_v25  ;;  %v10265_v6 = vld [vmem:[#allocation8 + $0x8] ss:$24 sps:$4 sm:$0xff]   ;;  %v10271_v8 = vld [vmem:[#allocation8 + $0x634] ss:$24 sps:$4 sm:$0xff]   ;;  %v10272_v11 = vld [vmem:[#allocation8 + $0x38] ss:$24 sps:$4 sm:$0xff]  }
  0xe0   :  { %v12390_v7 = vld [vmem:[#allocation2 + $0x8] ss:$24 sps:$4 sm:$0xff]   ;;  %v10277_v12 = vld [vmem:[#allocation8 + $0x664] ss:$24 sps:$4 sm:$0xff]   ;;  %v10275_v14 = vld [vmem:[#allocation8 + $0x660] ss:$24 sps:$4 sm:$0xff]  }
  0xe1   :  { %1992 = vmatpush1.bf16.msra.mxu1 %v10201_v26  ;;  %v10269_v10 = vld [vmem:[#allocation8 + $0x630] ss:$24 sps:$4 sm:$0xff]   ;;  %v10280_v13 = vld [vmem:[#allocation8 + $0x6c] ss:$24 sps:$4 sm:$0xff]   ;;  %v10286_v17 = vld [vmem:[#allocation8 + $0x9c] ss:$24 sps:$4 sm:$0xff]  }
  0xe2   :  { %2035 = vmatpush1.bf16.msra.mxu0 %v10202_v27  ;;  %1993 = vmatprep.subr.bf16.mxu1 %v10203_v28  ;;  %v10278_v15 = vld [vmem:[#allocation8 + $0x68] ss:$24 sps:$4 sm:$0xff]   ;;  %v10283_v16 = vld [vmem:[#allocation8 + $0x694] ss:$24 sps:$4 sm:$0xff]   ;;  %v10284_v19 = vld [vmem:[#allocation8 + $0x98] ss:$24 sps:$4 sm:$0xff]  }
  0xe3   :  { %2036 = vmatprep.subr.bf16.mxu0 %v10205_v29  ;;  %v10281_v18 = vld [vmem:[#allocation8 + $0x690] ss:$24 sps:$4 sm:$0xff]   ;;  %v10289_v20 = vld [vmem:[#allocation8 + $0x6c4] ss:$24 sps:$4 sm:$0xff]   ;;  %v10287_v22 = vld [vmem:[#allocation8 + $0x6c0] ss:$24 sps:$4 sm:$0xff]  }
  0xe4   :  { %v10292_v21 = vld [vmem:[#allocation8 + $0xcc] ss:$24 sps:$4 sm:$0xff]   ;;  %v10290_v23 = vld [vmem:[#allocation8 + $0xc8] ss:$24 sps:$4 sm:$0xff]   ;;  %v10298_v25 = vld [vmem:[#allocation8 + $0xfc] ss:$24 sps:$4 sm:$0xff]  }
  0xe5   :  { %1994 = vmatpush1.bf16.msra.mxu1 %v10207_v30  ;;  %v10295_v24 = vld [vmem:[#allocation8 + $0x6f4] ss:$24 sps:$4 sm:$0xff]   ;;  %v10293_v26 = vld [vmem:[#allocation8 + $0x6f0] ss:$24 sps:$4 sm:$0xff]   ;;  %v10301_v28 = vld [vmem:[#allocation8 + $0x724] ss:$24 sps:$4 sm:$0xff]  }
  0xe6   :  { %2037 = vmatpush1.bf16.msra.mxu0 %v10208_v31  ;;  %1995 = vmatprep.subr.bf16.mxu1 %v10209_v32  ;;  %v10296_v27 = vld [vmem:[#allocation8 + $0xf8] ss:$24 sps:$4 sm:$0xff]   ;;  %v10304_v29 = vld [vmem:[#allocation8 + $0x12c] ss:$24 sps:$4 sm:$0xff]   ;;  %v10302_v31 = vld [vmem:[#allocation8 + $0x128] ss:$24 sps:$4 sm:$0xff]  }
  0xe7   :  { %2038 = vmatprep.subr.bf16.mxu0 %v10211_v33  ;;  %v10299_v30 = vld [vmem:[#allocation8 + $0x720] ss:$24 sps:$4 sm:$0xff]   ;;  %v10307_v32 = vld [vmem:[#allocation8 + $0x754] ss:$24 sps:$4 sm:$0xff]  }
  0xe8   :  { %v10310_v33 = vld [vmem:[#allocation8 + $0x15c] ss:$24 sps:$4 sm:$0xff]  }
  0xe9   :  { %1996 = vmatpush1.bf16.msra.mxu1 %v10213_v34  ;;  %v12395_v34 = vld [vmem:[#allocation2 + $0x14] ss:$24 sps:$4 sm:$0xff]  }
  0xea   :  { %2039 = vmatpush1.bf16.msra.mxu0 %v10214_v35  ;;  %1997 = vmatprep.subr.bf16.mxu1 %v10215_v36  ;;  %v10305_v35 = vld [vmem:[#allocation8 + $0x750] ss:$24 sps:$4 sm:$0xff]  }
  0xeb   :  { %2040 = vmatprep.subr.bf16.mxu0 %v10217_v37  ;;  %v10308_v36 = vld [vmem:[#allocation8 + $0x158] ss:$24 sps:$4 sm:$0xff]   ;;  %v10313_v37 = vld [vmem:[#allocation8 + $0x784] ss:$24 sps:$4 sm:$0xff]  }
  0xed   :  { %1998 = vmatpush1.bf16.msra.mxu1 %v10219_v38  ;;  %v10316_v38 = vld [vmem:[#allocation8 + $0x18c] ss:$24 sps:$4 sm:$0xff]  }
  0xee   :  { %2041 = vmatpush1.bf16.msra.mxu0 %v10220_v39  ;;  %1999 = vmatprep.subr.bf16.mxu1 %v10221_v40  ;;  %v12163_v39 = vmov 0   ;;  %v10311_v40 = vld [vmem:[#allocation8 + $0x780] ss:$24 sps:$4 sm:$0xff]  }
  0xef   :  { %2042 = vmatprep.subr.bf16.mxu0 %v10223_v41  ;;  %10159 = vset.pattern.permute.xlu0 %v12163_v39  ;;  %v10314_v41 = vld [vmem:[#allocation8 + $0x188] ss:$24 sps:$4 sm:$0xff]  }
  0xf0   :  { %10160 = vset.pattern.permute.xlu1 %v12163_v39  ;;  %v10409_v39 = vld [vmem:[#allocation8 + $0x164] ss:$24 sps:$4 sm:$0xff]  }
  0xf1   :  { %2000 = vmatpush1.bf16.msra.mxu1 %v10225_v42  ;;  %v10319_v42 = vld [vmem:[#allocation8 + $0x7b4] ss:$24 sps:$4 sm:$0xff]  }
  0xf2   :  { %2043 = vmatpush1.bf16.msra.mxu0 %v10226_v43  ;;  %2001 = vmatprep.subr.bf16.mxu1 %v10227_v44  ;;  %v10322_v43 = vld [vmem:[#allocation8 + $0x1bc] ss:$24 sps:$4 sm:$0xff]   ;;  %v10317_v44 = vld [vmem:[#allocation8 + $0x7b0] ss:$24 sps:$4 sm:$0xff]  }
  0xf3   :  { %2044 = vmatprep.subr.bf16.mxu0 %v10229_v45  ;;  %v10320_v45 = vld [vmem:[#allocation8 + $0x1b8] ss:$24 sps:$4 sm:$0xff]  }
  0xf5   :  { %2002 = vmatpush1.bf16.msra.mxu1 %v10231_v46  ;;  %v10325_v46 = vld [vmem:[#allocation8 + $0x7e4] ss:$24 sps:$4 sm:$0xff]  }
  0xf6   :  { %2045 = vmatpush1.bf16.msra.mxu0 %v10232_v47  ;;  %2003 = vmatprep.subr.bf16.mxu1 %v10233_v48  ;;  %v10328_v47 = vld [vmem:[#allocation8 + $0x1ec] ss:$24 sps:$4 sm:$0xff]   ;;  %v10323_v48 = vld [vmem:[#allocation8 + $0x7e0] ss:$24 sps:$4 sm:$0xff]  }
  0xf7   :  { %2046 = vmatprep.subr.bf16.mxu0 %v10235_v51  ;;  %v10326_v51 = vld [vmem:[#allocation8 + $0x1e8] ss:$24 sps:$4 sm:$0xff]  }
  0xf9   :  { %2004 = vmatpush1.bf16.msra.mxu1 %v10237_v52  ;;  %v10331_v52 = vld [vmem:[#allocation8 + $0x814] ss:$24 sps:$4 sm:$0xff]  }
  0xfa   :  { %2047 = vmatpush1.bf16.msra.mxu0 %v10238_v53  ;;  %2005 = vmatprep.subr.bf16.mxu1 %v10239_v54  ;;  %v10334_v53 = vld [vmem:[#allocation8 + $0x21c] ss:$24 sps:$4 sm:$0xff]   ;;  %v10329_v54 = vld [vmem:[#allocation8 + $0x810] ss:$24 sps:$4 sm:$0xff]  }
  0xfb   :  { %2048 = vmatprep.subr.bf16.mxu0 %v10241_v55  ;;  %v10332_v55 = vld [vmem:[#allocation8 + $0x218] ss:$24 sps:$4 sm:$0xff]  }
  0xfd   :  { %2006 = vmatpush1.bf16.msra.mxu1 %v10243_v56  ;;  %v10337_v56 = vld [vmem:[#allocation8 + $0x844] ss:$24 sps:$4 sm:$0xff]  }
  0xfe   :  { %2049 = vmatpush1.bf16.msra.mxu0 %v10244_v57  ;;  %2007 = vmatprep.subr.bf16.mxu1 %v10245_v58  ;;  %v10340_v57 = vld [vmem:[#allocation8 + $0x24c] ss:$24 sps:$4 sm:$0xff]   ;;  %v10335_v58 = vld [vmem:[#allocation8 + $0x840] ss:$24 sps:$4 sm:$0xff]  }
  0xff   :  { %2050 = vmatprep.subr.bf16.mxu0 %v10247_v59  ;;  %v10338_v59 = vld [vmem:[#allocation8 + $0x248] ss:$24 sps:$4 sm:$0xff]  }
 0x101   :  { %2008 = vmatpush1.bf16.msra.mxu1 %v10249_v60  ;;  %v10343_v60 = vld [vmem:[#allocation8 + $0x874] ss:$24 sps:$4 sm:$0xff]  }
 0x102   :  { %2051 = vmatpush1.bf16.msra.mxu0 %v10250_v61  ;;  %2009 = vmatprep.subr.bf16.mxu1 %v10251_v62  ;;  %v10346_v61 = vld [vmem:[#allocation8 + $0x27c] ss:$24 sps:$4 sm:$0xff]   ;;  %v10341_v62 = vld [vmem:[#allocation8 + $0x870] ss:$24 sps:$4 sm:$0xff]  }
 0x103   :  { %2052 = vmatprep.subr.bf16.mxu0 %v10253_v63  ;;  %v10344_v63 = vld [vmem:[#allocation8 + $0x278] ss:$24 sps:$4 sm:$0xff]  }
 0x105   :  { %2010 = vmatpush1.bf16.msra.mxu1 %v10255_v0  ;;  %v10349_v0 = vld [vmem:[#allocation8 + $0x8a4] ss:$24 sps:$4 sm:$0xff]  }
 0x106   :  { %2053 = vmatpush1.bf16.msra.mxu0 %v10256_v1  ;;  %2108 = vmatprep.subr.bf16.mxu1 %v10267_v3  ;;  %v10352_v1 = vld [vmem:[#allocation8 + $0x2ac] ss:$24 sps:$4 sm:$0xff]   ;;  %v10350_v3 = vld [vmem:[#allocation8 + $0x2a8] ss:$24 sps:$4 sm:$0xff]  }
 0x107   :  { %2065 = vmatprep.subr.bf16.mxu0 %v10264_v2  ;;  %v10347_v2 = vld [vmem:[#allocation8 + $0x8a0] ss:$24 sps:$4 sm:$0xff]  }
 0x108   :  { %2012 = vmatmul.mubr.bf16.vlgmr.msra.gmra.mrb[0].mxu1 %v12388_v4 }
 0x109   :  { %2055 = vmatmul.mubr.bf16.vlgmr.msra.gmra.mrb[0].mxu0 %v12390_v7  ;;  %2109 = vmatpush1.bf16.msra.mxu1 %v10265_v6  ;;  %v10358_v6 = vld [vmem:[#allocation8 + $0x2dc] ss:$24 sps:$4 sm:$0xff]  }
 0x10a   :  { %2066 = vmatpush1.bf16.msra.mxu0 %v10262_v5  ;;  %2110 = vmatprep.subr.bf16.mxu1 %v10274_v9  ;;  %v10355_v5 = vld [vmem:[#allocation8 + $0x8d4] ss:$24 sps:$4 sm:$0xff]   ;;  %v10356_v9 = vld [vmem:[#allocation8 + $0x2d8] ss:$24 sps:$4 sm:$0xff]  }
 0x10b   :  { %2067 = vmatprep.subr.bf16.mxu0 %v10271_v8  ;;  %2140 = vmatprep.mubr.bf16.mxu1 %v12382_v49  ;;  %v10353_v8 = vld [vmem:[#allocation8 + $0x8d0] ss:$24 sps:$4 sm:$0xff]  }
 0x10c   :  { %2097 = vmatprep.mubr.bf16.mxu0 %v12395_v34 }
 0x10d   :  { %2111 = vmatpush1.bf16.msra.mxu1 %v10272_v11  ;;  %v10367_v11 = vld [vmem:[#allocation8 + $0x14] ss:$24 sps:$4 sm:$0xff]  }
 0x10e   :  { %2068 = vmatpush1.bf16.msra.mxu0 %v10269_v10  ;;  %2112 = vmatprep.subr.bf16.mxu1 %v10280_v13  ;;  %v10364_v10 = vld [vmem:[#allocation8 + $0x30c] ss:$24 sps:$4 sm:$0xff]   ;;  %v10362_v13 = vld [vmem:[#allocation8 + $0x308] ss:$24 sps:$4 sm:$0xff]  }
 0x10f   :  { %2069 = vmatprep.subr.bf16.mxu0 %v10277_v12  ;;  %v12398_v12 = vld [vmem:[#allocation2 + $0x10] ss:$24 sps:$4 sm:$0xff]  }
 0x111   :  { %2113 = vmatpush1.bf16.msra.mxu1 %v10278_v15  ;;  %v10370_v15 = vld [vmem:[#allocation8 + $0x33c] ss:$24 sps:$4 sm:$0xff]  }
 0x112   :  { %2070 = vmatpush1.bf16.msra.mxu0 %v10275_v14  ;;  %2114 = vmatprep.subr.bf16.mxu1 %v10286_v17  ;;  %v10365_v14 = vld [vmem:[#allocation8 + $0x10] ss:$24 sps:$4 sm:$0xff]  }
 0x113   :  { %2071 = vmatprep.subr.bf16.mxu0 %v10283_v16  ;;  %v10373_v16 = vld [vmem:[#allocation8 + $0x44] ss:$24 sps:$4 sm:$0xff]   ;;  %v10368_v17 = vld [vmem:[#allocation8 + $0x338] ss:$24 sps:$4 sm:$0xff]  }
 0x115   :  { %2115 = vmatpush1.bf16.msra.mxu1 %v10284_v19  ;;  %v10376_v19 = vld [vmem:[#allocation8 + $0x36c] ss:$24 sps:$4 sm:$0xff]  }
 0x116   :  { %2072 = vmatpush1.bf16.msra.mxu0 %v10281_v18  ;;  %2116 = vmatprep.subr.bf16.mxu1 %v10292_v21  ;;  %v10371_v18 = vld [vmem:[#allocation8 + $0x40] ss:$24 sps:$4 sm:$0xff]  }
 0x117   :  { %2073 = vmatprep.subr.bf16.mxu0 %v10289_v20  ;;  %v10379_v20 = vld [vmem:[#allocation8 + $0x74] ss:$24 sps:$4 sm:$0xff]   ;;  %v10374_v21 = vld [vmem:[#allocation8 + $0x368] ss:$24 sps:$4 sm:$0xff]  }
 0x119   :  { %2117 = vmatpush1.bf16.msra.mxu1 %v10290_v23  ;;  %v10382_v23 = vld [vmem:[#allocation8 + $0x39c] ss:$24 sps:$4 sm:$0xff]  }
 0x11a   :  { %2074 = vmatpush1.bf16.msra.mxu0 %v10287_v22  ;;  %2118 = vmatprep.subr.bf16.mxu1 %v10298_v25  ;;  %v10377_v22 = vld [vmem:[#allocation8 + $0x70] ss:$24 sps:$4 sm:$0xff]  }
 0x11b   :  { %2075 = vmatprep.subr.bf16.mxu0 %v10295_v24  ;;  %v10385_v24 = vld [vmem:[#allocation8 + $0xa4] ss:$24 sps:$4 sm:$0xff]   ;;  %v10380_v25 = vld [vmem:[#allocation8 + $0x398] ss:$24 sps:$4 sm:$0xff]  }
 0x11d   :  { %2119 = vmatpush1.bf16.msra.mxu1 %v10296_v27  ;;  %v10388_v27 = vld [vmem:[#allocation8 + $0x3cc] ss:$24 sps:$4 sm:$0xff]  }
 0x11e   :  { %2076 = vmatpush1.bf16.msra.mxu0 %v10293_v26  ;;  %2120 = vmatprep.subr.bf16.mxu1 %v10304_v29  ;;  %v10383_v26 = vld [vmem:[#allocation8 + $0xa0] ss:$24 sps:$4 sm:$0xff]  }
 0x11f   :  { %2077 = vmatprep.subr.bf16.mxu0 %v10301_v28  ;;  %v10391_v28 = vld [vmem:[#allocation8 + $0xd4] ss:$24 sps:$4 sm:$0xff]   ;;  %v10386_v29 = vld [vmem:[#allocation8 + $0x3c8] ss:$24 sps:$4 sm:$0xff]  }
 0x121   :  { %2121 = vmatpush1.bf16.msra.mxu1 %v10302_v31  ;;  %v10392_v31 = vld [vmem:[#allocation8 + $0x3f8] ss:$24 sps:$4 sm:$0xff]  }
 0x122   :  { %2078 = vmatpush1.bf16.msra.mxu0 %v10299_v30  ;;  %2122 = vmatprep.subr.bf16.mxu1 %v10310_v33  ;;  %v10397_v30 = vld [vmem:[#allocation8 + $0x104] ss:$24 sps:$4 sm:$0xff]  }
 0x123   :  { %2079 = vmatprep.subr.bf16.mxu0 %v10307_v32  ;;  %v10395_v32 = vld [vmem:[#allocation8 + $0x100] ss:$24 sps:$4 sm:$0xff]   ;;  %v10400_v33 = vld [vmem:[#allocation8 + $0x42c] ss:$24 sps:$4 sm:$0xff]  }
 0x125   :  { %2123 = vmatpush1.bf16.msra.mxu1 %v10308_v36  ;;  %v10398_v36 = vld [vmem:[#allocation8 + $0x428] ss:$24 sps:$4 sm:$0xff]  }
 0x126   :  { %2080 = vmatpush1.bf16.msra.mxu0 %v10305_v35  ;;  %2124 = vmatprep.subr.bf16.mxu1 %v10316_v38  ;;  %v10403_v35 = vld [vmem:[#allocation8 + $0x134] ss:$24 sps:$4 sm:$0xff]  }
 0x127   :  { %2081 = vmatprep.subr.bf16.mxu0 %v10313_v37  ;;  %v10401_v37 = vld [vmem:[#allocation8 + $0x130] ss:$24 sps:$4 sm:$0xff]   ;;  %v10406_v38 = vld [vmem:[#allocation8 + $0x45c] ss:$24 sps:$4 sm:$0xff]  }
 0x129   :  { %2125 = vmatpush1.bf16.msra.mxu1 %v10314_v41  ;;  %v10404_v41 = vld [vmem:[#allocation8 + $0x458] ss:$24 sps:$4 sm:$0xff]  }
 0x12a   :  { %2082 = vmatpush1.bf16.msra.mxu0 %v10311_v40  ;;  %2126 = vmatprep.subr.bf16.mxu1 %v10322_v43  ;;  %v2378_v40 = vld [vmem:[%s12635_s1] sm:$0xf]  ;;  %v2379_v43 = vld [vmem:[%s12635_s1 + $0x4] sm:$0xf]  ;;  %s12166_s1 = smov [#allocation20]  }
 0x12b   :  { %2083 = vmatprep.subr.bf16.mxu0 %v10319_v42  ;;  %2382 = vperm.xlu0 %10159, %v2378_v40   ;;  %v10407_v42 = vld [vmem:[#allocation8 + $0x160] ss:$24 sps:$4 sm:$0xff]   ;;  %s8800_s20 = sshll.u32 %s12166_s1, 4  ;;  %s8801_s20 = int_to_ptr.vmem [resolvable:$true] %s8800_s20 }
 0x12c   :  { %v10494_v40 = vld [vmem:[#allocation8 + $0x728] ss:$24 sps:$4 sm:$0xff]   ;;  %s12086_s10 = scalar_lea.vmem %s8801_s20, 512  ;;  %p12091_p5 = scmp.lt.s32.totalorder %s8801_s20, %s8801_s20 }
 0x12d   :  { %2127 = vmatpush1.bf16.msra.mxu1 %v10320_v45  ;;  %v10415_v45 = vld [vmem:[#allocation8 + $0x194] ss:$24 sps:$4 sm:$0xff]   ;;  %p12087_p4 = scmp.ne.s32.totalorder %s8801_s20, %s12086_s10  ;;  %p12092_p6 = scmp.lt.s32.totalorder %s12086_s10, %s12086_s10 }
 0x12e   :  { %2084 = vmatpush1.bf16.msra.mxu0 %v10317_v44  ;;  %2128 = vmatprep.subr.bf16.mxu1 %v10328_v47  ;;  %v10412_v44 = vld [vmem:[#allocation8 + $0x48c] ss:$24 sps:$4 sm:$0xff]   ;;  %v10413_v47 = vld [vmem:[#allocation8 + $0x190] ss:$24 sps:$4 sm:$0xff]  }
 0x12f   :  { %2085 = vmatprep.subr.bf16.mxu0 %v10325_v46  ;;  %2394 = vperm.xlu0 %10159, %v2379_v43   ;;  %v10410_v46 = vld [vmem:[#allocation8 + $0x488] ss:$24 sps:$4 sm:$0xff]   ;;  %v10505_v43 = vld [vmem:[#allocation8 + $0x464] ss:$24 sps:$4 sm:$0xff]   ;;  %p12093_p7 = por %p12092_p6, %p12091_p5 }
 0x131   :  { %2129 = vmatpush1.bf16.msra.mxu1 %v10326_v51  ;;  %v10421_v51 = vld [vmem:[#allocation8 + $0x1c4] ss:$24 sps:$4 sm:$0xff]   ;;  %p12094_p8 = pnand %p12093_p7, %p12087_p4 }
 0x132   :  { %2086 = vmatpush1.bf16.msra.mxu0 %v10323_v48  ;;  %2130 = vmatprep.subr.bf16.mxu1 %v10334_v53  ;;  %v10418_v48 = vld [vmem:[#allocation8 + $0x4bc] ss:$24 sps:$4 sm:$0xff]   ;;  %v10419_v53 = vld [vmem:[#allocation8 + $0x1c0] ss:$24 sps:$4 sm:$0xff]  }
 0x133   :  { %2087 = vmatprep.subr.bf16.mxu0 %v10331_v52  ;;  %v10416_v52 = vld [vmem:[#allocation8 + $0x4b8] ss:$24 sps:$4 sm:$0xff]  }
 0x135   :  { %2131 = vmatpush1.bf16.msra.mxu1 %v10332_v55  ;;  %v10427_v55 = vld [vmem:[#allocation8 + $0x1f4] ss:$24 sps:$4 sm:$0xff]  }
 0x136   :  { %2088 = vmatpush1.bf16.msra.mxu0 %v10329_v54  ;;  %2132 = vmatprep.subr.bf16.mxu1 %v10340_v57  ;;  %v10424_v54 = vld [vmem:[#allocation8 + $0x4ec] ss:$24 sps:$4 sm:$0xff]   ;;  %v10425_v57 = vld [vmem:[#allocation8 + $0x1f0] ss:$24 sps:$4 sm:$0xff]  }
 0x137   :  { %2089 = vmatprep.subr.bf16.mxu0 %v10337_v56  ;;  %v10422_v56 = vld [vmem:[#allocation8 + $0x4e8] ss:$24 sps:$4 sm:$0xff]  }
 0x139   :  { %2133 = vmatpush1.bf16.msra.mxu1 %v10338_v59  ;;  %v10433_v59 = vld [vmem:[#allocation8 + $0x224] ss:$24 sps:$4 sm:$0xff]  }
 0x13a   :  { %2090 = vmatpush1.bf16.msra.mxu0 %v10335_v58  ;;  %2134 = vmatprep.subr.bf16.mxu1 %v10346_v61  ;;  %v10430_v58 = vld [vmem:[#allocation8 + $0x51c] ss:$24 sps:$4 sm:$0xff]   ;;  %v10431_v61 = vld [vmem:[#allocation8 + $0x220] ss:$24 sps:$4 sm:$0xff]  }
 0x13b   :  { %2091 = vmatprep.subr.bf16.mxu0 %v10343_v60  ;;  %v10428_v60 = vld [vmem:[#allocation8 + $0x518] ss:$24 sps:$4 sm:$0xff]  }
 0x13d   :  { %2135 = vmatpush1.bf16.msra.mxu1 %v10344_v63  ;;  %v10439_v63 = vld [vmem:[#allocation8 + $0x254] ss:$24 sps:$4 sm:$0xff]  }
 0x13e   :  { %2092 = vmatpush1.bf16.msra.mxu0 %v10341_v62  ;;  %2136 = vmatprep.subr.bf16.mxu1 %v10352_v1  ;;  %v10436_v62 = vld [vmem:[#allocation8 + $0x54c] ss:$24 sps:$4 sm:$0xff]   ;;  %v10437_v1 = vld [vmem:[#allocation8 + $0x250] ss:$24 sps:$4 sm:$0xff]  }
 0x13f   :  { %2093 = vmatprep.subr.bf16.mxu0 %v10349_v0  ;;  %v10434_v0 = vld [vmem:[#allocation8 + $0x548] ss:$24 sps:$4 sm:$0xff]  }
 0x141   :  { %2137 = vmatpush1.bf16.msra.mxu1 %v10350_v3  ;;  %v10445_v3 = vld [vmem:[#allocation8 + $0x284] ss:$24 sps:$4 sm:$0xff]  }
 0x142   :  { %2094 = vmatpush1.bf16.msra.mxu0 %v10347_v2  ;;  %2138 = vmatprep.subr.bf16.mxu1 %v10358_v6  ;;  %v10442_v2 = vld [vmem:[#allocation8 + $0x57c] ss:$24 sps:$4 sm:$0xff]   ;;  %v10443_v6 = vld [vmem:[#allocation8 + $0x280] ss:$24 sps:$4 sm:$0xff]  }
 0x143   :  { %2095 = vmatprep.subr.bf16.mxu0 %v10355_v5  ;;  %v10440_v5 = vld [vmem:[#allocation8 + $0x578] ss:$24 sps:$4 sm:$0xff]  }
 0x145   :  { %2139 = vmatpush1.bf16.msra.mxu1 %v10356_v9  ;;  %v10451_v9 = vld [vmem:[#allocation8 + $0x2b4] ss:$24 sps:$4 sm:$0xff]  }
 0x146   :  { %2096 = vmatpush1.bf16.msra.mxu0 %v10353_v8  ;;  %2151 = vmatprep.subr.bf16.mxu1 %v10364_v10  ;;  %v10448_v8 = vld [vmem:[#allocation8 + $0x5ac] ss:$24 sps:$4 sm:$0xff]   ;;  %v10446_v10 = vld [vmem:[#allocation8 + $0x5a8] ss:$24 sps:$4 sm:$0xff]  }
 0x147   :  { %2237 = vmatprep.subr.bf16.mxu0 %v10367_v11  ;;  %v10449_v11 = vld [vmem:[#allocation8 + $0x2b0] ss:$24 sps:$4 sm:$0xff]  }
 0x148   :  { %2141 = vmatmul.mubr.bf16.vlgmr.msra.gmra.mrb[4].mxu1 %v12388_v4 }
 0x149   :  { %2098 = vmatmul.mubr.bf16.vlgmr.msra.gmra.mrb[0].mxu0 %v12398_v12  ;;  %2152 = vmatpush1.bf16.msra.mxu1 %v10362_v13  ;;  %v10454_v13 = vld [vmem:[#allocation8 + $0x5dc] ss:$24 sps:$4 sm:$0xff]  }
 0x14a   :  { %2238 = vmatpush1.bf16.msra.mxu0 %v10365_v14  ;;  %2153 = vmatprep.subr.bf16.mxu1 %v10370_v15  ;;  %v10457_v14 = vld [vmem:[#allocation8 + $0x2e4] ss:$24 sps:$4 sm:$0xff]   ;;  %v10452_v15 = vld [vmem:[#allocation8 + $0x5d8] ss:$24 sps:$4 sm:$0xff]  }
 0x14b   :  { %2239 = vmatprep.subr.bf16.mxu0 %v10373_v16  ;;  %2183 = vmatprep.mubr.bf16.mxu1 %v12384_v50  ;;  %v10389_v50 = vld [vmem:[#allocation8 + $0xd0] ss:$24 sps:$4 sm:$0xff]   ;;  %v10455_v16 = vld [vmem:[#allocation8 + $0x2e0] ss:$24 sps:$4 sm:$0xff]  }
 0x14c   :  { %2269 = vmatprep.mubr.bf16.mxu0 %v12382_v49  ;;  %v10394_v49 = vld [vmem:[#allocation8 + $0x3fc] ss:$24 sps:$4 sm:$0xff]  }
 0x14d   :  { %2154 = vmatpush1.bf16.msra.mxu1 %v10368_v17  ;;  %v10460_v17 = vld [vmem:[#allocation8 + $0x60c] ss:$24 sps:$4 sm:$0xff]  }
 0x14e   :  { %2240 = vmatpush1.bf16.msra.mxu0 %v10371_v18  ;;  %2155 = vmatprep.subr.bf16.mxu1 %v10376_v19  ;;  %v10463_v18 = vld [vmem:[#allocation8 + $0x314] ss:$24 sps:$4 sm:$0xff]   ;;  %v10458_v19 = vld [vmem:[#allocation8 + $0x608] ss:$24 sps:$4 sm:$0xff]  }
 0x14f   :  { %2241 = vmatprep.subr.bf16.mxu0 %v10379_v20  ;;  %v10461_v20 = vld [vmem:[#allocation8 + $0x310] ss:$24 sps:$4 sm:$0xff]  }
 0x151   :  { %2156 = vmatpush1.bf16.msra.mxu1 %v10374_v21  ;;  %v10466_v21 = vld [vmem:[#allocation8 + $0x63c] ss:$24 sps:$4 sm:$0xff]  }
 0x152   :  { %2242 = vmatpush1.bf16.msra.mxu0 %v10377_v22  ;;  %2157 = vmatprep.subr.bf16.mxu1 %v10382_v23  ;;  %v10469_v22 = vld [vmem:[#allocation8 + $0x344] ss:$24 sps:$4 sm:$0xff]   ;;  %v10464_v23 = vld [vmem:[#allocation8 + $0x638] ss:$24 sps:$4 sm:$0xff]  }
 0x153   :  { %2243 = vmatprep.subr.bf16.mxu0 %v10385_v24  ;;  %v10467_v24 = vld [vmem:[#allocation8 + $0x340] ss:$24 sps:$4 sm:$0xff]  }
 0x155   :  { %2158 = vmatpush1.bf16.msra.mxu1 %v10380_v25  ;;  %v10472_v25 = vld [vmem:[#allocation8 + $0x66c] ss:$24 sps:$4 sm:$0xff]  }
 0x156   :  { %2244 = vmatpush1.bf16.msra.mxu0 %v10383_v26  ;;  %2159 = vmatprep.subr.bf16.mxu1 %v10388_v27  ;;  %v10475_v26 = vld [vmem:[#allocation8 + $0x374] ss:$24 sps:$4 sm:$0xff]  }
 0x157   :  { %2245 = vmatprep.subr.bf16.mxu0 %v10391_v28  ;;  %v11839_v27 = vld [vmem:[#allocation2 + $0xc] ss:$24 sps:$4 sm:$0xff]   ;;  %v10470_v28 = vld [vmem:[#allocation8 + $0x668] ss:$24 sps:$4 sm:$0xff]  }
 0x159   :  { %2160 = vmatpush1.bf16.msra.mxu1 %v10386_v29  ;;  %v10473_v29 = vld [vmem:[#allocation8 + $0x370] ss:$24 sps:$4 sm:$0xff]  }
 0x15a   :  { %2246 = vmatpush1.bf16.msra.mxu0 %v10389_v50  ;;  %2161 = vmatprep.subr.bf16.mxu1 %v10394_v49  ;;  %v10478_v50 = vld [vmem:[#allocation8 + $0x69c] ss:$24 sps:$4 sm:$0xff]   ;;  %v10479_v49 = vld [vmem:[#allocation8 + $0x3a0] ss:$24 sps:$4 sm:$0xff]  }
 0x15b   :  { %2247 = vmatprep.subr.bf16.mxu0 %v10397_v30  ;;  %v10484_v30 = vld [vmem:[#allocation8 + $0x6cc] ss:$24 sps:$4 sm:$0xff]  }
 0x15d   :  { %2162 = vmatpush1.bf16.msra.mxu1 %v10392_v31  ;;  %v10487_v31 = vld [vmem:[#allocation8 + $0x3d4] ss:$24 sps:$4 sm:$0xff]  }
 0x15e   :  { %2248 = vmatpush1.bf16.msra.mxu0 %v10395_v32  ;;  %2163 = vmatprep.subr.bf16.mxu1 %v10400_v33  ;;  %v10482_v32 = vld [vmem:[#allocation8 + $0x6c8] ss:$24 sps:$4 sm:$0xff]   ;;  %v10490_v33 = vld [vmem:[#allocation8 + $0x6fc] ss:$24 sps:$4 sm:$0xff]  }
 0x15f   :  { %2249 = vmatprep.subr.bf16.mxu0 %v10403_v35  ;;  %v10493_v35 = vld [vmem:[#allocation8 + $0x404] ss:$24 sps:$4 sm:$0xff]  }
 0x161   :  { %2164 = vmatpush1.bf16.msra.mxu1 %v10398_v36  ;;  %v10488_v36 = vld [vmem:[#allocation8 + $0x6f8] ss:$24 sps:$4 sm:$0xff]  }
 0x162   :  { %2250 = vmatpush1.bf16.msra.mxu0 %v10401_v37  ;;  %2165 = vmatprep.subr.bf16.mxu1 %v10406_v38  ;;  %v10491_v37 = vld [vmem:[#allocation8 + $0x400] ss:$24 sps:$4 sm:$0xff]   ;;  %v10496_v38 = vld [vmem:[#allocation8 + $0x72c] ss:$24 sps:$4 sm:$0xff]  }
 0x163   :  { %2251 = vmatprep.subr.bf16.mxu0 %v10409_v39  ;;  %v10499_v39 = vld [vmem:[#allocation8 + $0x434] ss:$24 sps:$4 sm:$0xff]  }
 0x165   :  { %2166 = vmatpush1.bf16.msra.mxu1 %v10404_v41  ;;  %v10497_v41 = vld [vmem:[#allocation8 + $0x430] ss:$24 sps:$4 sm:$0xff]  }
 0x166   :  { %2252 = vmatpush1.bf16.msra.mxu0 %v10407_v42  ;;  %2167 = vmatprep.subr.bf16.mxu1 %v10412_v44  ;;  %v10502_v42 = vld [vmem:[#allocation8 + $0x75c] ss:$24 sps:$4 sm:$0xff]   ;;  %v10500_v44 = vld [vmem:[#allocation8 + $0x758] ss:$24 sps:$4 sm:$0xff]  }
 0x167   :  { %2253 = vmatprep.subr.bf16.mxu0 %v10415_v45  ;;  %v10503_v45 = vld [vmem:[#allocation8 + $0x460] ss:$24 sps:$4 sm:$0xff]  }
 0x169   :  { %2168 = vmatpush1.bf16.msra.mxu1 %v10410_v46  ;;  %v10508_v46 = vld [vmem:[#allocation8 + $0x78c] ss:$24 sps:$4 sm:$0xff]  }
 0x16a   :  { %2254 = vmatpush1.bf16.msra.mxu0 %v10413_v47  ;;  %2169 = vmatprep.subr.bf16.mxu1 %v10418_v48  ;;  %v10511_v47 = vld [vmem:[#allocation8 + $0x494] ss:$24 sps:$4 sm:$0xff]   ;;  %v10506_v48 = vld [vmem:[#allocation8 + $0x788] ss:$24 sps:$4 sm:$0xff]  }
 0x16b   :  { %2255 = vmatprep.subr.bf16.mxu0 %v10421_v51  ;;  %v10509_v51 = vld [vmem:[#allocation8 + $0x490] ss:$24 sps:$4 sm:$0xff]  }
 0x16d   :  { %2170 = vmatpush1.bf16.msra.mxu1 %v10416_v52  ;;  %v10514_v52 = vld [vmem:[#allocation8 + $0x7bc] ss:$24 sps:$4 sm:$0xff]  }
 0x16e   :  { %2256 = vmatpush1.bf16.msra.mxu0 %v10419_v53  ;;  %2171 = vmatprep.subr.bf16.mxu1 %v10424_v54  ;;  %v10517_v53 = vld [vmem:[#allocation8 + $0x4c4] ss:$24 sps:$4 sm:$0xff]   ;;  %v10512_v54 = vld [vmem:[#allocation8 + $0x7b8] ss:$24 sps:$4 sm:$0xff]  }
 0x16f   :  { %2257 = vmatprep.subr.bf16.mxu0 %v10427_v55  ;;  %v10515_v55 = vld [vmem:[#allocation8 + $0x4c0] ss:$24 sps:$4 sm:$0xff]  }
 0x171   :  { %2172 = vmatpush1.bf16.msra.mxu1 %v10422_v56  ;;  %v10520_v56 = vld [vmem:[#allocation8 + $0x7ec] ss:$24 sps:$4 sm:$0xff]  }
 0x172   :  { %2258 = vmatpush1.bf16.msra.mxu0 %v10425_v57  ;;  %2173 = vmatprep.subr.bf16.mxu1 %v10430_v58  ;;  %v10523_v57 = vld [vmem:[#allocation8 + $0x4f4] ss:$24 sps:$4 sm:$0xff]   ;;  %v10518_v58 = vld [vmem:[#allocation8 + $0x7e8] ss:$24 sps:$4 sm:$0xff]  }
 0x173   :  { %2259 = vmatprep.subr.bf16.mxu0 %v10433_v59  ;;  %v10521_v59 = vld [vmem:[#allocation8 + $0x4f0] ss:$24 sps:$4 sm:$0xff]  }
 0x175   :  { %2174 = vmatpush1.bf16.msra.mxu1 %v10428_v60  ;;  %v10526_v60 = vld [vmem:[#allocation8 + $0x81c] ss:$24 sps:$4 sm:$0xff]  }
 0x176   :  { %2260 = vmatpush1.bf16.msra.mxu0 %v10431_v61  ;;  %2175 = vmatprep.subr.bf16.mxu1 %v10436_v62  ;;  %v10529_v61 = vld [vmem:[#allocation8 + $0x524] ss:$24 sps:$4 sm:$0xff]   ;;  %v10524_v62 = vld [vmem:[#allocation8 + $0x818] ss:$24 sps:$4 sm:$0xff]  }
 0x177   :  { %2261 = vmatprep.subr.bf16.mxu0 %v10439_v63  ;;  %v10527_v63 = vld [vmem:[#allocation8 + $0x520] ss:$24 sps:$4 sm:$0xff]  }
 0x179   :  { %2176 = vmatpush1.bf16.msra.mxu1 %v10434_v0  ;;  %v10532_v0 = vld [vmem:[#allocation8 + $0x84c] ss:$24 sps:$4 sm:$0xff]  }
 0x17a   :  { %2262 = vmatpush1.bf16.msra.mxu0 %v10437_v1  ;;  %2177 = vmatprep.subr.bf16.mxu1 %v10442_v2  ;;  %v10535_v1 = vld [vmem:[#allocation8 + $0x554] ss:$24 sps:$4 sm:$0xff]   ;;  %v10530_v2 = vld [vmem:[#allocation8 + $0x848] ss:$24 sps:$4 sm:$0xff]  }
 0x17b   :  { %2263 = vmatprep.subr.bf16.mxu0 %v10445_v3  ;;  %v10533_v3 = vld [vmem:[#allocation8 + $0x550] ss:$24 sps:$4 sm:$0xff]  }
 0x17d   :  { %2178 = vmatpush1.bf16.msra.mxu1 %v10440_v5  ;;  %v10538_v5 = vld [vmem:[#allocation8 + $0x87c] ss:$24 sps:$4 sm:$0xff]  }
 0x17e   :  { %2264 = vmatpush1.bf16.msra.mxu0 %v10443_v6  ;;  %2179 = vmatprep.subr.bf16.mxu1 %v10448_v8  ;;  %v10541_v6 = vld [vmem:[#allocation8 + $0x584] ss:$24 sps:$4 sm:$0xff]   ;;  %v10536_v8 = vld [vmem:[#allocation8 + $0x878] ss:$24 sps:$4 sm:$0xff]  }
 0x17f   :  { %2265 = vmatprep.subr.bf16.mxu0 %v10451_v9  ;;  %v10539_v9 = vld [vmem:[#allocation8 + $0x580] ss:$24 sps:$4 sm:$0xff]  }
 0x181   :  { %2180 = vmatpush1.bf16.msra.mxu1 %v10446_v10  ;;  %v10544_v10 = vld [vmem:[#allocation8 + $0x8ac] ss:$24 sps:$4 sm:$0xff]  }
 0x182   :  { %2266 = vmatpush1.bf16.msra.mxu0 %v10449_v11  ;;  %2181 = vmatprep.subr.bf16.mxu1 %v10454_v13  ;;  %v10547_v11 = vld [vmem:[#allocation8 + $0x5b4] ss:$24 sps:$4 sm:$0xff]   ;;  %v10542_v13 = vld [vmem:[#allocation8 + $0x8a8] ss:$24 sps:$4 sm:$0xff]  }
 0x183   :  { %2267 = vmatprep.subr.bf16.mxu0 %v10457_v14  ;;  %v10545_v14 = vld [vmem:[#allocation8 + $0x5b0] ss:$24 sps:$4 sm:$0xff]  }
 0x185   :  { %2182 = vmatpush1.bf16.msra.mxu1 %v10452_v15  ;;  %v10550_v15 = vld [vmem:[#allocation8 + $0x8dc] ss:$24 sps:$4 sm:$0xff]  }
 0x186   :  { %2268 = vmatpush1.bf16.msra.mxu0 %v10455_v16  ;;  %2194 = vmatprep.subr.bf16.mxu1 %v10460_v17  ;;  %v10553_v16 = vld [vmem:[#allocation8 + $0x5e4] ss:$24 sps:$4 sm:$0xff]   ;;  %v10548_v17 = vld [vmem:[#allocation8 + $0x8d8] ss:$24 sps:$4 sm:$0xff]  }
 0x187   :  { %2280 = vmatprep.subr.bf16.mxu0 %v10463_v18  ;;  %v10551_v18 = vld [vmem:[#allocation8 + $0x5e0] ss:$24 sps:$4 sm:$0xff]  }
 0x188   :  { %2184 = vmatmul.mubr.bf16.vlgmr.msra.gmra.mrb[4].mxu1 %v12390_v7  ;;  %v10476_v7 = vld [vmem:[#allocation8 + $0x698] ss:$24 sps:$4 sm:$0xff]  }
 0x189   :  { %2270 = vmatmul.mubr.bf16.vlgmr.msra.gmra.mrb[4].mxu0 %v12388_v4  ;;  %2195 = vmatpush1.bf16.msra.mxu1 %v10458_v19  ;;  %v10481_v4 = vld [vmem:[#allocation8 + $0x3a4] ss:$24 sps:$4 sm:$0xff]   ;;  %v10556_v19 = vld [vmem:[#allocation8 + $0x614] ss:$24 sps:$4 sm:$0xff]  }
 0x18a   :  { %2281 = vmatpush1.bf16.msra.mxu0 %v10461_v20  ;;  %2196 = vmatprep.subr.bf16.mxu1 %v10466_v21  ;;  %v10589_v20 = vld [vmem:[#allocation11 + $0x4] ss:$16 sps:$4 sm:$0xff]  }
 0x18b   :  { %2282 = vmatprep.subr.bf16.mxu0 %v10469_v22  ;;  %2226 = vmatprep.mubr.bf16.mxu1 %v12395_v34  ;;  %v10485_v34 = vld [vmem:[#allocation8 + $0x3d0] ss:$24 sps:$4 sm:$0xff]  }
 0x18c   :  { %2312 = vmatprep.mubr.bf16.mxu0 %v11839_v27  ;;  %v10554_v21 = vld [vmem:[#allocation8 + $0x610] ss:$24 sps:$4 sm:$0xff]  }
 0x18d   :  { %2197 = vmatpush1.bf16.msra.mxu1 %v10464_v23  ;;  %v10587_v22 = vld [vmem:[#allocation11] ss:$16 sps:$4 sm:$0xff]  }
 0x18e   :  { %2283 = vmatpush1.bf16.msra.mxu0 %v10467_v24  ;;  %2198 = vmatprep.subr.bf16.mxu1 %v10472_v25  ;;  %v10559_v23 = vld [vmem:[#allocation8 + $0x644] ss:$24 sps:$4 sm:$0xff]   ;;  %v11840_v25 = vld [vmem:[#allocation2 + $0x8] ss:$24 sps:$4 sm:$0xff]  }
 0x18f   :  { %2284 = vmatprep.subr.bf16.mxu0 %v10475_v26  ;;  %v10595_v24 = vld [vmem:[#allocation11 + $0x24] ss:$16 sps:$4 sm:$0xff]   ;;  %v10593_v27 = vld [vmem:[#allocation11 + $0x20] ss:$16 sps:$4 sm:$0xff]  }
 0x190   :  { %v10557_v26 = vld [vmem:[#allocation8 + $0x640] ss:$24 sps:$4 sm:$0xff]  }
 0x191   :  { %2199 = vmatpush1.bf16.msra.mxu1 %v10470_v28  ;;  %v10562_v28 = vld [vmem:[#allocation8 + $0x674] ss:$24 sps:$4 sm:$0xff]  }
 0x192   :  { %2285 = vmatpush1.bf16.msra.mxu0 %v10473_v29  ;;  %2200 = vmatprep.subr.bf16.mxu1 %v10478_v50  ;;  %v10601_v29 = vld [vmem:[#allocation11 + $0x44] ss:$16 sps:$4 sm:$0xff]  }
 0x193   :  { %2286 = vmatprep.subr.bf16.mxu0 %v10481_v4  ;;  %v11841_v50 = vld [vmem:[#allocation2 + $0x14] ss:$24 sps:$4 sm:$0xff]   ;;  %v10560_v4 = vld [vmem:[#allocation8 + $0x670] ss:$24 sps:$4 sm:$0xff]  }
 0x195   :  { %2201 = vmatpush1.bf16.msra.mxu1 %v10476_v7  ;;  %v10565_v7 = vld [vmem:[#allocation8 + $0x6a4] ss:$24 sps:$4 sm:$0xff]  }
 0x196   :  { %2287 = vmatpush1.bf16.msra.mxu0 %v10479_v49  ;;  %2202 = vmatprep.subr.bf16.mxu1 %v10484_v30  ;;  %v10599_v49 = vld [vmem:[#allocation11 + $0x40] ss:$16 sps:$4 sm:$0xff]  }
 0x197   :  { %2288 = vmatprep.subr.bf16.mxu0 %v10487_v31  ;;  %v10563_v30 = vld [vmem:[#allocation8 + $0x6a0] ss:$24 sps:$4 sm:$0xff]   ;;  %v10568_v31 = vld [vmem:[#allocation8 + $0x6d4] ss:$24 sps:$4 sm:$0xff]  }
 0x199   :  { %2203 = vmatpush1.bf16.msra.mxu1 %v10482_v32  ;;  %v10605_v32 = vld [vmem:[#allocation11 + $0x60] ss:$16 sps:$4 sm:$0xff]  }
 0x19a   :  { %2289 = vmatpush1.bf16.msra.mxu0 %v10485_v34  ;;  %2204 = vmatprep.subr.bf16.mxu1 %v10490_v33  ;;  %v10613_v34 = vld [vmem:[#allocation11 + $0x84] ss:$16 sps:$4 sm:$0xff]  }
 0x19b   :  { %2290 = vmatprep.subr.bf16.mxu0 %v10493_v35  ;;  %v10566_v33 = vld [vmem:[#allocation8 + $0x6d0] ss:$24 sps:$4 sm:$0xff]   ;;  %v10571_v35 = vld [vmem:[#allocation8 + $0x704] ss:$24 sps:$4 sm:$0xff]  }
 0x19d   :  { %2205 = vmatpush1.bf16.msra.mxu1 %v10488_v36  ;;  %v10611_v36 = vld [vmem:[#allocation11 + $0x80] ss:$16 sps:$4 sm:$0xff]  }
 0x19e   :  { %2291 = vmatpush1.bf16.msra.mxu0 %v10491_v37  ;;  %2206 = vmatprep.subr.bf16.mxu1 %v10496_v38  ;;  %v10619_v37 = vld [vmem:[#allocation11 + $0xa4] ss:$16 sps:$4 sm:$0xff]  }
 0x19f   :  { %2292 = vmatprep.subr.bf16.mxu0 %v10499_v39  ;;  %v10569_v38 = vld [vmem:[#allocation8 + $0x700] ss:$24 sps:$4 sm:$0xff]   ;;  %v10574_v39 = vld [vmem:[#allocation8 + $0x734] ss:$24 sps:$4 sm:$0xff]  }
 0x1a1   :  { %2207 = vmatpush1.bf16.msra.mxu1 %v10494_v40  ;;  %v10617_v40 = vld [vmem:[#allocation11 + $0xa0] ss:$16 sps:$4 sm:$0xff]  }
 0x1a2   :  { %2293 = vmatpush1.bf16.msra.mxu0 %v10497_v41  ;;  %2208 = vmatprep.subr.bf16.mxu1 %v10502_v42  ;;  %v10625_v41 = vld [vmem:[#allocation11 + $0xc4] ss:$16 sps:$4 sm:$0xff]  }
 0x1a3   :  { %2294 = vmatprep.subr.bf16.mxu0 %v10505_v43 }
 0x1a5   :  { %2209 = vmatpush1.bf16.msra.mxu1 %v10500_v44 }
 0x1a6   :  { %2295 = vmatpush1.bf16.msra.mxu0 %v10503_v45  ;;  %2210 = vmatprep.subr.bf16.mxu1 %v10508_v46  ;;  %v10572_v45 = vld [vmem:[#allocation8 + $0x730] ss:$24 sps:$4 sm:$0xff]  }
 0x1a7   :  { %2296 = vmatprep.subr.bf16.mxu0 %v10511_v47  ;;  %v10623_v46 = vld [vmem:[#allocation11 + $0xc0] ss:$16 sps:$4 sm:$0xff]  }
 0x1a9   :  { %2211 = vmatpush1.bf16.msra.mxu1 %v10506_v48  ;;  %v10577_v48 = vld [vmem:[#allocation8 + $0x764] ss:$24 sps:$4 sm:$0xff]  }
 0x1aa   :  { %2297 = vmatpush1.bf16.msra.mxu0 %v10509_v51  ;;  %2212 = vmatprep.subr.bf16.mxu1 %v10514_v52  ;;  %v10631_v51 = vld [vmem:[#allocation11 + $0xe4] ss:$16 sps:$4 sm:$0xff]  }
 0x1ab   :  { %2298 = vmatprep.subr.bf16.mxu0 %v10517_v53  ;;  %v10575_v52 = vld [vmem:[#allocation8 + $0x760] ss:$24 sps:$4 sm:$0xff]   ;;  %v10580_v53 = vld [vmem:[#allocation8 + $0x794] ss:$24 sps:$4 sm:$0xff]  }
 0x1ad   :  { %2213 = vmatpush1.bf16.msra.mxu1 %v10512_v54  ;;  %v10629_v54 = vld [vmem:[#allocation11 + $0xe0] ss:$16 sps:$4 sm:$0xff]  }
 0x1ae   :  { %2299 = vmatpush1.bf16.msra.mxu0 %v10515_v55  ;;  %2214 = vmatprep.subr.bf16.mxu1 %v10520_v56  ;;  %v10637_v55 = vld [vmem:[#allocation11 + $0x104] ss:$16 sps:$4 sm:$0xff]  }
 0x1af   :  { %2300 = vmatprep.subr.bf16.mxu0 %v10523_v57  ;;  %v10578_v56 = vld [vmem:[#allocation8 + $0x790] ss:$24 sps:$4 sm:$0xff]   ;;  %v10583_v57 = vld [vmem:[#allocation8 + $0x7c4] ss:$24 sps:$4 sm:$0xff]  }
 0x1b1   :  { %2215 = vmatpush1.bf16.msra.mxu1 %v10518_v58  ;;  %v10635_v58 = vld [vmem:[#allocation11 + $0x100] ss:$16 sps:$4 sm:$0xff]  }
 0x1b2   :  { %2301 = vmatpush1.bf16.msra.mxu0 %v10521_v59  ;;  %2216 = vmatprep.subr.bf16.mxu1 %v10526_v60  ;;  %v10643_v59 = vld [vmem:[#allocation11 + $0x124] ss:$16 sps:$4 sm:$0xff]  }
 0x1b3   :  { %2302 = vmatprep.subr.bf16.mxu0 %v10529_v61  ;;  %v10581_v60 = vld [vmem:[#allocation8 + $0x7c0] ss:$24 sps:$4 sm:$0xff]   ;;  %v10586_v61 = vld [vmem:[#allocation8 + $0x7f4] ss:$24 sps:$4 sm:$0xff]  }
 0x1b5   :  { %2217 = vmatpush1.bf16.msra.mxu1 %v10524_v62  ;;  %v10641_v62 = vld [vmem:[#allocation11 + $0x120] ss:$16 sps:$4 sm:$0xff]  }
 0x1b6   :  { %2303 = vmatpush1.bf16.msra.mxu0 %v10527_v63  ;;  %2218 = vmatprep.subr.bf16.mxu1 %v10532_v0  ;;  %v10649_v63 = vld [vmem:[#allocation11 + $0x144] ss:$16 sps:$4 sm:$0xff]  }
 0x1b7   :  { %2304 = vmatprep.subr.bf16.mxu0 %v10535_v1  ;;  %v10584_v0 = vld [vmem:[#allocation8 + $0x7f0] ss:$24 sps:$4 sm:$0xff]   ;;  %v10592_v1 = vld [vmem:[#allocation8 + $0x824] ss:$24 sps:$4 sm:$0xff]  }
 0x1b9   :  { %2219 = vmatpush1.bf16.msra.mxu1 %v10530_v2  ;;  %v10647_v2 = vld [vmem:[#allocation11 + $0x140] ss:$16 sps:$4 sm:$0xff]  }
 0x1ba   :  { %2305 = vmatpush1.bf16.msra.mxu0 %v10533_v3  ;;  %2220 = vmatprep.subr.bf16.mxu1 %v10538_v5  ;;  %v10655_v3 = vld [vmem:[#allocation11 + $0x164] ss:$16 sps:$4 sm:$0xff]  }
 0x1bb   :  { %2306 = vmatprep.subr.bf16.mxu0 %v10541_v6  ;;  %v10590_v5 = vld [vmem:[#allocation8 + $0x820] ss:$24 sps:$4 sm:$0xff]  }
 0x1bc   :  { %v10653_v6 = vld [vmem:[#allocation11 + $0x160] ss:$16 sps:$4 sm:$0xff]  }
 0x1bd   :  { %2221 = vmatpush1.bf16.msra.mxu1 %v10536_v8  ;;  %v10598_v8 = vld [vmem:[#allocation8 + $0x854] ss:$24 sps:$4 sm:$0xff]  }
 0x1be   :  { %2307 = vmatpush1.bf16.msra.mxu0 %v10539_v9  ;;  %2222 = vmatprep.subr.bf16.mxu1 %v10544_v10  ;;  %v10661_v9 = vld [vmem:[#allocation11 + $0x184] ss:$16 sps:$4 sm:$0xff]  }
 0x1bf   :  { %2308 = vmatprep.subr.bf16.mxu0 %v10547_v11  ;;  %v10596_v10 = vld [vmem:[#allocation8 + $0x850] ss:$24 sps:$4 sm:$0xff]  }
 0x1c0   :  { %v10659_v11 = vld [vmem:[#allocation11 + $0x180] ss:$16 sps:$4 sm:$0xff]  }
 0x1c1   :  { %2223 = vmatpush1.bf16.msra.mxu1 %v10542_v13  ;;  %v10604_v13 = vld [vmem:[#allocation8 + $0x884] ss:$24 sps:$4 sm:$0xff]  }
 0x1c2   :  { %2309 = vmatpush1.bf16.msra.mxu0 %v10545_v14  ;;  %2224 = vmatprep.subr.bf16.mxu1 %v10550_v15  ;;  %v10667_v14 = vld [vmem:[#allocation11 + $0x1a4] ss:$16 sps:$4 sm:$0xff]  }
 0x1c3   :  { %2310 = vmatprep.subr.bf16.mxu0 %v10553_v16  ;;  %v10602_v15 = vld [vmem:[#allocation8 + $0x880] ss:$24 sps:$4 sm:$0xff]  }
 0x1c4   :  { %v10665_v16 = vld [vmem:[#allocation11 + $0x1a0] ss:$16 sps:$4 sm:$0xff]  }
 0x1c5   :  { %2225 = vmatpush1.bf16.msra.mxu1 %v10548_v17  ;;  %v10610_v17 = vld [vmem:[#allocation8 + $0x8b4] ss:$24 sps:$4 sm:$0xff]  }
 0x1c6   :  { %2311 = vmatpush1.bf16.msra.mxu0 %v10551_v18  ;;  %3590 = vmatprep.subr.bf16.mxu1 %v10589_v20  ;;  %v10673_v18 = vld [vmem:[#allocation11 + $0x1c4] ss:$16 sps:$4 sm:$0xff]   ;;  %v10671_v20 = vld [vmem:[#allocation11 + $0x1c0] ss:$16 sps:$4 sm:$0xff]  }
 0x1c7   :  { %2323 = vmatprep.subr.bf16.mxu0 %v10556_v19  ;;  %v10608_v19 = vld [vmem:[#allocation8 + $0x8b0] ss:$24 sps:$4 sm:$0xff]  }
 0x1c8   :  { %2227 = vmatmul.mubr.bf16.vlgmr.msra.gmra.mrb[4].mxu1 %v12398_v12  ;;  %v10607_v12 = vld [vmem:[#allocation11 + $0x64] ss:$16 sps:$4 sm:$0xff]  }
 0x1c9   :  { %2313 = vmatmul.mubr.bf16.vlgmr.msra.gmra.mrb[4].mxu0 %v11840_v25  ;;  %3591 = vmatpush1.bf16.msra.mxu1 %v10587_v22  ;;  %v10679_v22 = vld [vmem:[#allocation11 + $0x1e4] ss:$16 sps:$4 sm:$0xff]   ;;  %v10622_v25 = vld [vmem:[#allocation11 + $0xc] ss:$16 sps:$4 sm:$0xff]  }
 0x1ca   :  { %2324 = vmatpush1.bf16.msra.mxu0 %v10554_v21  ;;  %3592 = vmatprep.subr.bf16.mxu1 %v10595_v24  ;;  %v10616_v21 = vld [vmem:[#allocation8 + $0x8e4] ss:$24 sps:$4 sm:$0xff]  }
 0x1cb   :  { %2325 = vmatprep.subr.bf16.mxu0 %v10559_v23  ;;  %2355 = vmatprep.mubr.bf16.mxu0 %v11841_v50  ;;  %v10614_v23 = vld [vmem:[#allocation8 + $0x8e0] ss:$24 sps:$4 sm:$0xff]  }
 0x1cc   :  { %v10677_v24 = vld [vmem:[#allocation11 + $0x1e0] ss:$16 sps:$4 sm:$0xff]  }
 0x1cd   :  { %3593 = vmatpush1.bf16.msra.mxu1 %v10593_v27  ;;  %v10620_v27 = vld [vmem:[#allocation11 + $0x8] ss:$16 sps:$4 sm:$0xff]  }
 0x1ce   :  { %2326 = vmatpush1.bf16.msra.mxu0 %v10557_v26  ;;  %3594 = vmatprep.subr.bf16.mxu1 %v10601_v29  ;;  %v10700_v26 = vld [vmem:[#allocation11 + $0x204] ss:$16 sps:$4 sm:$0xff]   ;;  %v10626_v29 = vld [vmem:[#allocation11 + $0x28] ss:$16 sps:$4 sm:$0xff]  }
 0x1cf   :  { %2327 = vmatprep.subr.bf16.mxu0 %v10562_v28  ;;  %v10628_v28 = vld [vmem:[#allocation11 + $0x2c] ss:$16 sps:$4 sm:$0xff]  }
 0x1d0   :  { %v11842_v50 = vld [vmem:[#allocation2 + $0x10] ss:$24 sps:$4 sm:$0xff]  }
 0x1d1   :  { %3595 = vmatpush1.bf16.msra.mxu1 %v10599_v49  ;;  %v10632_v49 = vld [vmem:[#allocation11 + $0x48] ss:$16 sps:$4 sm:$0xff]  }
 0x1d2   :  { %2328 = vmatpush1.bf16.msra.mxu0 %v10560_v4  ;;  %3596 = vmatprep.subr.bf16.mxu1 %v10607_v12  ;;  %v10634_v4 = vld [vmem:[#allocation11 + $0x4c] ss:$16 sps:$4 sm:$0xff]  }
 0x1d3   :  { %2329 = vmatprep.subr.bf16.mxu0 %v10565_v7  ;;  %v479_v7 = vlaneseq  ;;  %v10640_v12 = vld [vmem:[#allocation11 + $0x6c] ss:$16 sps:$4 sm:$0xff]  }
 0x1d5   :  { %3597 = vmatpush1.bf16.msra.mxu1 %v10605_v32  ;;  %v10646_v32 = vld [vmem:[#allocation11 + $0x8c] ss:$16 sps:$4 sm:$0xff]  }
 0x1d6   :  { %2330 = vmatpush1.bf16.msra.mxu0 %v10563_v30  ;;  %3598 = vmatprep.subr.bf16.mxu1 %v10613_v34  ;;  %v12422_v30 = vshrl.u32 %v479_v7, 7  ;;  %v12424_v34 = vld [vmem:[#allocation10] sm:$0x3f] }
 0x1d7   :  { %2331 = vmatprep.subr.bf16.mxu0 %v10568_v31  ;;  %v10638_v31 = vld [vmem:[#allocation11 + $0x68] ss:$16 sps:$4 sm:$0xff]  }
 0x1d8   :  { %v10692_v7 = vld [vmem:[#allocation11 + $0x1c8] ss:$16 sps:$4 sm:$0xff]  }
 0x1d9   :  { %3599 = vmatpush1.bf16.msra.mxu1 %v10611_v36  ;;  %v10644_v36 = vld [vmem:[#allocation11 + $0x88] ss:$16 sps:$4 sm:$0xff]  }
 0x1da   :  { %2332 = vmatpush1.bf16.msra.mxu0 %v10566_v33  ;;  %3600 = vmatprep.subr.bf16.mxu1 %v10619_v37  ;;  %v12427_v33 = vsub.s32 0, %v12422_v30  ;;  %v10652_v37 = vld [vmem:[#allocation11 + $0xac] ss:$16 sps:$4 sm:$0xff]  }
 0x1db   :  { %2333 = vmatprep.subr.bf16.mxu0 %v10571_v35  ;;  %v12414_v42 = vpop.f32.mrb[0].mxu1  ;;  %v12430_v35 = vsub.s32 1, %v12422_v30 }
 0x1dc   :  { %v12416_v43 = vpop.f32.mrb[1].mxu1 }
 0x1dd   :  { %v12418_v44 = vpop.f32.mrb[2].mxu1  ;;  %3601 = vmatpush1.bf16.msra.mxu1 %v10617_v40  ;;  %v10650_v40 = vld [vmem:[#allocation11 + $0xa8] ss:$16 sps:$4 sm:$0xff]  }
 0x1de   :  { %2334 = vmatpush1.bf16.msra.mxu0 %v10569_v38  ;;  %v12420_v47 = vpop.f32.mrb[3].mxu1  ;;  %3602 = vmatprep.subr.bf16.mxu1 %v10625_v41  ;;  %v482_v38 = vrot.slane %v12424_v34, %v12427_v33  ;;  %v10658_v41 = vld [vmem:[#allocation11 + $0xcc] ss:$16 sps:$4 sm:$0xff]  }
 0x1df   :  { %2335 = vmatprep.subr.bf16.mxu0 %v10574_v39  ;;  %v486_v39 = vrot.slane %v12424_v34, %v12430_v35 }
 0x1e1   :  { %3603 = vmatpush1.bf16.msra.mxu1 %v10623_v46  ;;  %v2016_v46 = vadd.f32 %v12416_v43, %v486_v39 }
 0x1e2   :  { %2336 = vmatpush1.bf16.msra.mxu0 %v10572_v45  ;;  %3604 = vmatprep.subr.bf16.mxu1 %v10631_v51  ;;  %v2014_v45 = vadd.f32 %v12414_v42, %v482_v38  ;;  %v12164_v51 = vmov 839922192   ;;  %v2383_v42 = vpop.permute.xlu0 %2382 }
 0x1e3   :  { %2337 = vmatprep.subr.bf16.mxu0 %v10577_v48 }
 0x1e5   :  { %3605 = vmatpush1.bf16.msra.mxu1 %v10629_v54 }
 0x1e6   :  { %2338 = vmatpush1.bf16.msra.mxu0 %v10575_v52  ;;  %3606 = vmatprep.subr.bf16.mxu1 %v10637_v55  ;;  %v2386_v52 = vunpack.c.l.s4 %v12164_v51  ;;  %v10715_v51 = vld [vmem:[#allocation11 + $0x24c] ss:$16 sps:$4 sm:$0xff]  }
 0x1e7   :  { %2339 = vmatprep.subr.bf16.mxu0 %v10580_v53  ;;  %v2018_v53 = vadd.f32 %v12418_v44, %v482_v38  ;;  %v10670_v44 = vld [vmem:[#allocation11 + $0x10c] ss:$16 sps:$4 sm:$0xff]   ;;  %v10730_v38 = vld [vmem:[#allocation11 + $0x2a4] ss:$16 sps:$4 sm:$0xff]  }
 0x1e8   :  { %v2387_v43 = vunpack.c.0.s8 %v2386_v52  ;;  %v10742_v52 = vld [vmem:[#allocation11 + $0x2e4] ss:$16 sps:$4 sm:$0xff]  }
 0x1e9   :  { %3607 = vmatpush1.bf16.msra.mxu1 %v10635_v58 }
 0x1ea   :  { %2340 = vmatpush1.bf16.msra.mxu0 %v10578_v56  ;;  %3608 = vmatprep.subr.bf16.mxu1 %v10643_v59  ;;  %v2020_v56 = vadd.f32 %v12420_v47, %v486_v39  ;;  %v10656_v59 = vld [vmem:[#allocation11 + $0xc8] ss:$16 sps:$4 sm:$0xff]   ;;  %v2390_v47 = vsub.s32 %v2387_v43, %v12422_v30 }
 0x1eb   :  { %2341 = vmatprep.subr.bf16.mxu0 %v10583_v57  ;;  %v10701_v39 = vld [vmem:[#allocation11 + $0x208] ss:$16 sps:$4 sm:$0xff]  }
 0x1ec   :  { %v10731_v43 = vld [vmem:[#allocation11 + $0x2a8] ss:$16 sps:$4 sm:$0xff]  }
 0x1ed   :  { %3609 = vmatpush1.bf16.msra.mxu1 %v10641_v62 }
 0x1ee   :  { %2342 = vmatpush1.bf16.msra.mxu0 %v10581_v60  ;;  %3610 = vmatprep.subr.bf16.mxu1 %v10649_v63  ;;  %v10664_v60 = vld [vmem:[#allocation11 + $0xec] ss:$16 sps:$4 sm:$0xff]  }
 0x1ef   :  { %2343 = vmatprep.subr.bf16.mxu0 %v10586_v61 }
 0x1f1   :  { %3611 = vmatpush1.bf16.msra.mxu1 %v10647_v2  ;;  %v10662_v2 = vld [vmem:[#allocation11 + $0xe8] ss:$16 sps:$4 sm:$0xff]  }
 0x1f2   :  { %2344 = vmatpush1.bf16.msra.mxu0 %v10584_v0  ;;  %3612 = vmatprep.subr.bf16.mxu1 %v10655_v3  ;;  %v2395_v3 = vpop.permute.xlu0 %2394 }
 0x1f3   :  { %2345 = vmatprep.subr.bf16.mxu0 %v10592_v1 }
 0x1f5   :  { %3613 = vmatpush1.bf16.msra.mxu1 %v10653_v6  ;;  %v10676_v6 = vld [vmem:[#allocation11 + $0x12c] ss:$16 sps:$4 sm:$0xff]  }
 0x1f6   :  { %2346 = vmatpush1.bf16.msra.mxu0 %v10590_v5  ;;  %3614 = vmatprep.subr.bf16.mxu1 %v10661_v9  ;;  %v10668_v5 = vld [vmem:[#allocation11 + $0x108] ss:$16 sps:$4 sm:$0xff]   ;;  %v2403_v9 = vrot.slane %v2395_v3, %v2390_v47  ;;  %v10772_v3 = vld [vmem:[#allocation11 + $0x384] ss:$16 sps:$4 sm:$0xff]  }
 0x1f7   :  { %2347 = vmatprep.subr.bf16.mxu0 %v10598_v8  ;;  %v2391_v8 = vrot.slane %v2383_v42, %v2390_v47  ;;  %v10733_v42 = vld [vmem:[#allocation11 + $0x2ac] ss:$16 sps:$4 sm:$0xff]   ;;  %v10737_v47 = vld [vmem:[#allocation11 + $0x2c8] ss:$16 sps:$4 sm:$0xff]  }
 0x1f9   :  { %3615 = vmatpush1.bf16.msra.mxu1 %v10659_v11  ;;  %v10682_v11 = vld [vmem:[#allocation11 + $0x14c] ss:$16 sps:$4 sm:$0xff]  }
 0x1fa   :  { %2348 = vmatpush1.bf16.msra.mxu0 %v10596_v10  ;;  %3616 = vmatprep.subr.bf16.mxu1 %v10667_v14  ;;  %v10674_v10 = vld [vmem:[#allocation11 + $0x128] ss:$16 sps:$4 sm:$0xff]  }
 0x1fb   :  { %2349 = vmatprep.subr.bf16.mxu0 %v10604_v13  ;;  %v12441_v13 = vcombine.low %v2391_v8, %v2403_v9  ;;  %v10680_v14 = vld [vmem:[#allocation11 + $0x148] ss:$16 sps:$4 sm:$0xff]   ;;  %v10778_v8 = vld [vmem:[#allocation11 + $0x3a4] ss:$16 sps:$4 sm:$0xff]  }
 0x1fc   :  { %v10743_v9 = vld [vmem:[#allocation11 + $0x2e8] ss:$16 sps:$4 sm:$0xff]  }
 0x1fd   :  { %3617 = vmatpush1.bf16.msra.mxu1 %v10665_v16  ;;  %v10685_v16 = vld [vmem:[#allocation11 + $0x16c] ss:$16 sps:$4 sm:$0xff]  }
 0x1fe   :  { %2350 = vmatpush1.bf16.msra.mxu0 %v10602_v15  ;;  %3618 = vmatprep.subr.bf16.mxu1 %v10673_v18 }
 0x1ff   :  { %2351 = vmatprep.subr.bf16.mxu0 %v10610_v17  ;;  %v10698_v17 = vld [vmem:[#allocation11 + $0x200] ss:$16 sps:$4 sm:$0xff]  }
 0x201   :  { %3619 = vmatpush1.bf16.msra.mxu1 %v10671_v20 }
 0x202   :  { %2352 = vmatpush1.bf16.msra.mxu0 %v10608_v19  ;;  %3620 = vmatprep.subr.bf16.mxu1 %v10679_v22  ;;  %v10683_v22 = vld [vmem:[#allocation11 + $0x168] ss:$16 sps:$4 sm:$0xff]  }
 0x203   :  { %2353 = vmatprep.subr.bf16.mxu0 %v10616_v21  ;;  %v10706_v21 = vld [vmem:[#allocation11 + $0x224] ss:$16 sps:$4 sm:$0xff]  }
 0x205   :  { %3621 = vmatpush1.bf16.msra.mxu1 %v10677_v24  ;;  %v10686_v24 = vld [vmem:[#allocation11 + $0x188] ss:$16 sps:$4 sm:$0xff]  }
 0x206   :  { %2354 = vmatpush1.bf16.msra.mxu0 %v10614_v23  ;;  %3633 = vmatprep.subr.bf16.mxu1 %v10700_v26  ;;  %v10688_v23 = vld [vmem:[#allocation11 + $0x18c] ss:$16 sps:$4 sm:$0xff]  }
 0x207   :  { %3719 = vmatprep.subr.bf16.mxu0 %v10622_v25  ;;  %v10704_v25 = vld [vmem:[#allocation11 + $0x220] ss:$16 sps:$4 sm:$0xff]   ;;  %v10691_v26 = vld [vmem:[#allocation11 + $0x1ac] ss:$16 sps:$4 sm:$0xff]  }
 0x209   :  { %2356 = vmatmul.mubr.bf16.vlgmr.msra.gmra.mrb[4].mxu0 %v11842_v50  ;;  %v10694_v50 = vld [vmem:[#allocation11 + $0x1cc] ss:$16 sps:$4 sm:$0xff]  }
 0x20a   :  { %3720 = vmatpush1.bf16.msra.mxu0 %v10620_v27  ;;  %v10712_v27 = vld [vmem:[#allocation11 + $0x244] ss:$16 sps:$4 sm:$0xff]  }
 0x20b   :  { %3721 = vmatprep.subr.bf16.mxu0 %v10628_v28  ;;  %v10689_v28 = vld [vmem:[#allocation11 + $0x1a8] ss:$16 sps:$4 sm:$0xff]  }
 0x20e   :  { %3722 = vmatpush1.bf16.msra.mxu0 %v10626_v29  ;;  %v10710_v29 = vld [vmem:[#allocation11 + $0x240] ss:$16 sps:$4 sm:$0xff]  }
 0x20f   :  { %3723 = vmatprep.subr.bf16.mxu0 %v10634_v4  ;;  %v10718_v4 = vld [vmem:[#allocation11 + $0x264] ss:$16 sps:$4 sm:$0xff]  }
 0x212   :  { %3724 = vmatpush1.bf16.msra.mxu0 %v10632_v49  ;;  %v10716_v49 = vld [vmem:[#allocation11 + $0x260] ss:$16 sps:$4 sm:$0xff]  }
 0x213   :  { %3725 = vmatprep.subr.bf16.mxu0 %v10640_v12  ;;  %v10697_v12 = vld [vmem:[#allocation11 + $0x1ec] ss:$16 sps:$4 sm:$0xff]  }
 0x216   :  { %3726 = vmatpush1.bf16.msra.mxu0 %v10638_v31  ;;  %v10724_v31 = vld [vmem:[#allocation11 + $0x284] ss:$16 sps:$4 sm:$0xff]  }
 0x217   :  { %3727 = vmatprep.subr.bf16.mxu0 %v10646_v32  ;;  %v10695_v32 = vld [vmem:[#allocation11 + $0x1e8] ss:$16 sps:$4 sm:$0xff]  }
 0x21a   :  { %3728 = vmatpush1.bf16.msra.mxu0 %v10644_v36  ;;  %v10722_v36 = vld [vmem:[#allocation11 + $0x280] ss:$16 sps:$4 sm:$0xff]  }
 0x21b   :  { %3729 = vmatprep.subr.bf16.mxu0 %v10652_v37  ;;  %v10703_v37 = vld [vmem:[#allocation11 + $0x20c] ss:$16 sps:$4 sm:$0xff]  }
 0x21c   :  { %v2099_v48 = vpop.f32.mrb[0].mxu0 }
 0x21d   :  { %v10018_v54 = vadd.f32 %v2099_v48, %v2014_v45  ;;  %v2101_v55 = vpop.f32.mrb[1].mxu0  ;;  %v10736_v45 = vld [vmem:[#allocation11 + $0x2c4] ss:$16 sps:$4 sm:$0xff]   ;;  %v10734_v48 = vld [vmem:[#allocation11 + $0x2c0] ss:$16 sps:$4 sm:$0xff]  }
 0x21e   :  { %v10020_v57 = vadd.f32 %v2101_v55, %v2016_v46  ;;  %v2103_v58 = vpop.f32.mrb[2].mxu0  ;;  %3730 = vmatpush1.bf16.msra.mxu0 %v10650_v40  ;;  %v10728_v40 = vld [vmem:[#allocation11 + $0x2a0] ss:$16 sps:$4 sm:$0xff]   ;;  %v10707_v46 = vld [vmem:[#allocation11 + $0x228] ss:$16 sps:$4 sm:$0xff]  }
 0x21f   :  { %v10022_v61 = vadd.f32 %v2103_v58, %v2018_v53  ;;  %v2105_v62 = vpop.f32.mrb[3].mxu0  ;;  %3731 = vmatprep.subr.bf16.mxu0 %v10658_v41  ;;  %v10709_v41 = vld [vmem:[#allocation11 + $0x22c] ss:$16 sps:$4 sm:$0xff]   ;;  %v10713_v53 = vld [vmem:[#allocation11 + $0x248] ss:$16 sps:$4 sm:$0xff]  }
 0x220   :  { %v10024_v63 = vadd.f32 %v2105_v62, %v2020_v56  ;;  %v10721_v55 = vld [vmem:[#allocation11 + $0x26c] ss:$16 sps:$4 sm:$0xff]   ;;  %v10748_v56 = vld [vmem:[#allocation11 + $0x304] ss:$16 sps:$4 sm:$0xff]   ;;  %v10746_v58 = vld [vmem:[#allocation11 + $0x300] ss:$16 sps:$4 sm:$0xff]  }
 0x221   :  { %v2366_v0 = vpack.c.bf16 %v10022_v61, %v10018_v54  ;;  %v10740_v54 = vld [vmem:[#allocation11 + $0x2e0] ss:$16 sps:$4 sm:$0xff]   ;;  %v10725_v61 = vld [vmem:[#allocation11 + $0x288] ss:$16 sps:$4 sm:$0xff]  }
 0x222   :  { %v2367_v1 = vpack.c.bf16 %v10024_v63, %v10020_v57  ;;  %3732 = vmatpush1.bf16.msra.mxu0 %v10656_v59  ;;  %v10719_v57 = vld [vmem:[#allocation11 + $0x268] ss:$16 sps:$4 sm:$0xff]   ;;  %v10727_v59 = vld [vmem:[#allocation11 + $0x28c] ss:$16 sps:$4 sm:$0xff]   ;;  %v10752_v62 = vld [vmem:[#allocation11 + $0x320] ss:$16 sps:$4 sm:$0xff]  }
 0x223   :  { %11803 = vtanh.bf16 %v2366_v0  ;;  %3733 = vmatprep.subr.bf16.mxu0 %v10664_v60  ;;  %v10754_v60 = vld [vmem:[#allocation11 + $0x324] ss:$16 sps:$4 sm:$0xff]   ;;  %v10758_v0 = vld [vmem:[#allocation11 + $0x340] ss:$16 sps:$4 sm:$0xff]  }
 0x224   :  { %11805 = vtanh.bf16 %v2367_v1  ;;  %v10760_v63 = vld [vmem:[#allocation11 + $0x344] ss:$16 sps:$4 sm:$0xff]   ;;  %v10739_v1 = vld [vmem:[#allocation11 + $0x2cc] ss:$16 sps:$4 sm:$0xff]  }
 0x226   :  { %3734 = vmatpush1.bf16.msra.mxu0 %v10662_v2  ;;  %v10766_v2 = vld [vmem:[#allocation11 + $0x364] ss:$16 sps:$4 sm:$0xff]  }
 0x227   :  { %3735 = vmatprep.subr.bf16.mxu0 %v10670_v44  ;;  %v10764_v44 = vld [vmem:[#allocation11 + $0x360] ss:$16 sps:$4 sm:$0xff]  }
 0x22a   :  { %3736 = vmatpush1.bf16.msra.mxu0 %v10668_v5  ;;  %v10745_v5 = vld [vmem:[#allocation11 + $0x2ec] ss:$16 sps:$4 sm:$0xff]  }
 0x22b   :  { %3737 = vmatprep.subr.bf16.mxu0 %v10676_v6  ;;  %v10770_v6 = vld [vmem:[#allocation11 + $0x380] ss:$16 sps:$4 sm:$0xff]  }
 0x22e   :  { %v11804_v15 = vpop.eup %11803  ;;  %3738 = vmatpush1.bf16.msra.mxu0 %v10674_v10  ;;  %v10751_v10 = vld [vmem:[#allocation11 + $0x30c] ss:$16 sps:$4 sm:$0xff]  }
 0x22f   :  { %v11806_v18 = vpop.eup %11805  ;;  %3739 = vmatprep.subr.bf16.mxu0 %v10682_v11  ;;  %v2410_v20 = vmul.bf16 %v11804_v15, %v12441_v13  ;;  %v10749_v11 = vld [vmem:[#allocation11 + $0x308] ss:$16 sps:$4 sm:$0xff]   ;;  %v10757_v15 = vld [vmem:[#allocation11 + $0x32c] ss:$16 sps:$4 sm:$0xff]  }
 0x230   :  { %v2411_v19 = vmul.bf16 %v11806_v18, %v12441_v13  ;;  %v10782_v18 = vld [vmem:[#allocation11 + $0x3c0] ss:$16 sps:$4 sm:$0xff]  }
 0x232   :  { %3622 = vmatprep.mubr.bf16.mxu1 %v2411_v19  ;;  %3740 = vmatpush1.bf16.msra.mxu0 %v10680_v14  ;;  %v10776_v14 = vld [vmem:[#allocation11 + $0x3a0] ss:$16 sps:$4 sm:$0xff]  }
 0x233   :  { %3751 = vmatprep.mubr.bf16.mxu0 %v2411_v19  ;;  %3623 = vmatmul.mubr.bf16.vlgmr.msra.gmra.mrb[8].mxu1 %v2410_v20  ;;  %v10763_v19 = vld [vmem:[#allocation11 + $0x34c] ss:$16 sps:$4 sm:$0xff]  }
 0x234   :  { %3741 = vmatprep.subr.bf16.mxu0 %v10685_v16  ;;  %3634 = vmatpush1.bf16.msra.mxu1 %v10698_v17  ;;  %v10784_v16 = vld [vmem:[#allocation11 + $0x3c4] ss:$16 sps:$4 sm:$0xff]   ;;  %v10755_v17 = vld [vmem:[#allocation11 + $0x328] ss:$16 sps:$4 sm:$0xff]  }
 0x235   :  { %3635 = vmatprep.subr.bf16.mxu1 %v10706_v21  ;;  %v10761_v21 = vld [vmem:[#allocation11 + $0x348] ss:$16 sps:$4 sm:$0xff]  }
 0x236   :  { %3742 = vmatpush1.bf16.msra.mxu0 %v10683_v22  ;;  %v10788_v22 = vld [vmem:[#allocation11 + $0x3e0] ss:$16 sps:$4 sm:$0xff]  }
 0x237   :  { %3743 = vmatprep.subr.bf16.mxu0 %v10688_v23  ;;  %v10769_v23 = vld [vmem:[#allocation11 + $0x36c] ss:$16 sps:$4 sm:$0xff]  }
 0x238   :  { %3636 = vmatpush1.bf16.msra.mxu1 %v10704_v25  ;;  %v10767_v25 = vld [vmem:[#allocation11 + $0x368] ss:$16 sps:$4 sm:$0xff]  }
 0x239   :  { %3637 = vmatprep.subr.bf16.mxu1 %v10712_v27  ;;  %v10773_v27 = vld [vmem:[#allocation11 + $0x388] ss:$16 sps:$4 sm:$0xff]  }
 0x23a   :  { %3744 = vmatpush1.bf16.msra.mxu0 %v10686_v24  ;;  %v10796_v24 = vld [vmem:[#allocation11 + $0x404] ss:$16 sps:$4 sm:$0xff]  }
 0x23b   :  { %3745 = vmatprep.subr.bf16.mxu0 %v10691_v26  ;;  %v10775_v26 = vld [vmem:[#allocation11 + $0x38c] ss:$16 sps:$4 sm:$0xff]  }
 0x23c   :  { %3638 = vmatpush1.bf16.msra.mxu1 %v10710_v29  ;;  %v10779_v29 = vld [vmem:[#allocation11 + $0x3a8] ss:$16 sps:$4 sm:$0xff]  }
 0x23d   :  { %3639 = vmatprep.subr.bf16.mxu1 %v10718_v4  ;;  %v10785_v4 = vld [vmem:[#allocation11 + $0x3c8] ss:$16 sps:$4 sm:$0xff]  }
 0x23e   :  { %3746 = vmatpush1.bf16.msra.mxu0 %v10689_v28  ;;  %v10781_v28 = vld [vmem:[#allocation11 + $0x3ac] ss:$16 sps:$4 sm:$0xff]  }
 0x23f   :  { %3747 = vmatprep.subr.bf16.mxu0 %v10694_v50  ;;  %v10787_v50 = vld [vmem:[#allocation11 + $0x3cc] ss:$16 sps:$4 sm:$0xff]  }
 0x240   :  { %3640 = vmatpush1.bf16.msra.mxu1 %v10716_v49  ;;  %v10791_v49 = vld [vmem:[#allocation11 + $0x3e8] ss:$16 sps:$4 sm:$0xff]  }
 0x241   :  { %3641 = vmatprep.subr.bf16.mxu1 %v10724_v31  ;;  %v12446_v31 = vsub.s32 2, %v12422_v30 }
 0x242   :  { %3748 = vmatpush1.bf16.msra.mxu0 %v10692_v7  ;;  %v10793_v7 = vld [vmem:[#allocation11 + $0x3ec] ss:$16 sps:$4 sm:$0xff]  }
 0x243   :  { %3749 = vmatprep.subr.bf16.mxu0 %v10697_v12  ;;  %v10799_v12 = vld [vmem:[#allocation11 + $0x40c] ss:$16 sps:$4 sm:$0xff]  }
 0x244   :  { %3642 = vmatpush1.bf16.msra.mxu1 %v10722_v36  ;;  %v490_v36 = vrot.slane %v12424_v34, %v12446_v31 }
 0x245   :  { %3643 = vmatprep.subr.bf16.mxu1 %v10730_v38 }
 0x246   :  { %3750 = vmatpush1.bf16.msra.mxu0 %v10695_v32  ;;  %v12449_v32 = vsub.s32 3, %v12422_v30 }
 0x247   :  { %3762 = vmatprep.subr.bf16.mxu0 %v10703_v37 }
 0x248   :  { %3644 = vmatpush1.bf16.msra.mxu1 %v10728_v40  ;;  %v494_v38 = vrot.slane %v12424_v34, %v12449_v32  ;;  %v10802_v34 = vld [vmem:[#allocation11 + $0x424] ss:$16 sps:$4 sm:$0xff]  }
 0x249   :  { %3752 = vmatmul.mubr.bf16.vlgmr.msra.gmra.mrb[8].mxu0 %v2410_v20  ;;  %3645 = vmatprep.subr.bf16.mxu1 %v10736_v45  ;;  %v10790_v20 = vld [vmem:[#allocation11 + $0x3e4] ss:$16 sps:$4 sm:$0xff]  }
 0x24a   :  { %3763 = vmatpush1.bf16.msra.mxu0 %v10701_v39 }
 0x24b   :  { %3764 = vmatprep.subr.bf16.mxu0 %v10709_v41 }
 0x24c   :  { %3646 = vmatpush1.bf16.msra.mxu1 %v10734_v48 }
 0x24d   :  { %3647 = vmatprep.subr.bf16.mxu1 %v10742_v52 }
 0x24e   :  { %3765 = vmatpush1.bf16.msra.mxu0 %v10707_v46 }
 0x24f   :  { %3766 = vmatprep.subr.bf16.mxu0 %v10715_v51 }
 0x250   :  { %3648 = vmatpush1.bf16.msra.mxu1 %v10740_v54 }
 0x251   :  { %3649 = vmatprep.subr.bf16.mxu1 %v10748_v56 }
 0x252   :  { %3767 = vmatpush1.bf16.msra.mxu0 %v10713_v53 }
 0x253   :  { %3768 = vmatprep.subr.bf16.mxu0 %v10721_v55 }
 0x254   :  { %3650 = vmatpush1.bf16.msra.mxu1 %v10746_v58  ;;  %v10797_v58 = vld [vmem:[#allocation11 + $0x408] ss:$16 sps:$4 sm:$0xff]  }
 0x255   :  { %3651 = vmatprep.subr.bf16.mxu1 %v10754_v60  ;;  %v10805_v60 = vld [vmem:[#allocation11 + $0x42c] ss:$16 sps:$4 sm:$0xff]  }
 0x256   :  { %3769 = vmatpush1.bf16.msra.mxu0 %v10719_v57  ;;  %v10794_v57 = vld [vmem:[#allocation11 + $0x400] ss:$16 sps:$4 sm:$0xff]  }
 0x257   :  { %3770 = vmatprep.subr.bf16.mxu0 %v10727_v59 }
 0x258   :  { %3652 = vmatpush1.bf16.msra.mxu1 %v10752_v62  ;;  %v10803_v62 = vld [vmem:[#allocation11 + $0x428] ss:$16 sps:$4 sm:$0xff]  }
 0x259   :  { %3653 = vmatprep.subr.bf16.mxu1 %v10760_v63  ;;  %v10811_v63 = vld [vmem:[#allocation11 + $0x44c] ss:$16 sps:$4 sm:$0xff]  }
 0x25a   :  { %3771 = vmatpush1.bf16.msra.mxu0 %v10725_v61  ;;  %v10800_v61 = vld [vmem:[#allocation11 + $0x420] ss:$16 sps:$4 sm:$0xff]  }
 0x25b   :  { %3772 = vmatprep.subr.bf16.mxu0 %v10733_v42  ;;  %v10808_v42 = vld [vmem:[#allocation11 + $0x444] ss:$16 sps:$4 sm:$0xff]  }
 0x25c   :  { %3654 = vmatpush1.bf16.msra.mxu1 %v10758_v0  ;;  %v10809_v0 = vld [vmem:[#allocation11 + $0x448] ss:$16 sps:$4 sm:$0xff]  }
 0x25d   :  { %3655 = vmatprep.subr.bf16.mxu1 %v10766_v2  ;;  %v10817_v2 = vld [vmem:[#allocation11 + $0x46c] ss:$16 sps:$4 sm:$0xff]  }
 0x25e   :  { %3773 = vmatpush1.bf16.msra.mxu0 %v10731_v43  ;;  %v10806_v43 = vld [vmem:[#allocation11 + $0x440] ss:$16 sps:$4 sm:$0xff]  }
 0x25f   :  { %3774 = vmatprep.subr.bf16.mxu0 %v10739_v1  ;;  %v10814_v1 = vld [vmem:[#allocation11 + $0x464] ss:$16 sps:$4 sm:$0xff]  }
 0x260   :  { %3656 = vmatpush1.bf16.msra.mxu1 %v10764_v44  ;;  %v10812_v44 = vld [vmem:[#allocation11 + $0x460] ss:$16 sps:$4 sm:$0xff]  }
 0x261   :  { %3657 = vmatprep.subr.bf16.mxu1 %v10772_v3  ;;  %v10820_v3 = vld [vmem:[#allocation11 + $0x484] ss:$16 sps:$4 sm:$0xff]  }
 0x262   :  { %3775 = vmatpush1.bf16.msra.mxu0 %v10737_v47  ;;  %v10815_v47 = vld [vmem:[#allocation11 + $0x468] ss:$16 sps:$4 sm:$0xff]  }
 0x263   :  { %3776 = vmatprep.subr.bf16.mxu0 %v10745_v5  ;;  %v10823_v5 = vld [vmem:[#allocation11 + $0x48c] ss:$16 sps:$4 sm:$0xff]  }
 0x264   :  { %3658 = vmatpush1.bf16.msra.mxu1 %v10770_v6  ;;  %v10818_v6 = vld [vmem:[#allocation11 + $0x480] ss:$16 sps:$4 sm:$0xff]  }
 0x265   :  { %3659 = vmatprep.subr.bf16.mxu1 %v10778_v8  ;;  %v10821_v8 = vld [vmem:[#allocation11 + $0x488] ss:$16 sps:$4 sm:$0xff]  }
 0x266   :  { %3777 = vmatpush1.bf16.msra.mxu0 %v10743_v9  ;;  %v10826_v9 = vld [vmem:[#allocation11 + $0x4a4] ss:$16 sps:$4 sm:$0xff]  }
 0x267   :  { %3778 = vmatprep.subr.bf16.mxu0 %v10751_v10  ;;  %v10829_v10 = vld [vmem:[#allocation11 + $0x4ac] ss:$16 sps:$4 sm:$0xff]  }
 0x268   :  { %3660 = vmatpush1.bf16.msra.mxu1 %v10776_v14  ;;  %v10827_v14 = vld [vmem:[#allocation11 + $0x4a8] ss:$16 sps:$4 sm:$0xff]  }
 0x269   :  { %3661 = vmatprep.subr.bf16.mxu1 %v10784_v16  ;;  %v10835_v16 = vld [vmem:[#allocation11 + $0x4cc] ss:$16 sps:$4 sm:$0xff]  }
 0x26a   :  { %3779 = vmatpush1.bf16.msra.mxu0 %v10749_v11  ;;  %v10824_v11 = vld [vmem:[#allocation11 + $0x4a0] ss:$16 sps:$4 sm:$0xff]  }
 0x26b   :  { %3780 = vmatprep.subr.bf16.mxu0 %v10757_v15  ;;  %v10832_v15 = vld [vmem:[#allocation11 + $0x4c4] ss:$16 sps:$4 sm:$0xff]  }
 0x26c   :  { %3662 = vmatpush1.bf16.msra.mxu1 %v10782_v18  ;;  %v10833_v18 = vld [vmem:[#allocation11 + $0x4c8] ss:$16 sps:$4 sm:$0xff]  }
 0x26d   :  { %3663 = vmatprep.subr.bf16.mxu1 %v10790_v20  ;;  %v10841_v20 = vld [vmem:[#allocation11 + $0x4ec] ss:$16 sps:$4 sm:$0xff]  }
 0x26e   :  { %3781 = vmatpush1.bf16.msra.mxu0 %v10755_v17  ;;  %v10830_v17 = vld [vmem:[#allocation11 + $0x4c0] ss:$16 sps:$4 sm:$0xff]  }
 0x26f   :  { %3782 = vmatprep.subr.bf16.mxu0 %v10763_v19  ;;  %v10838_v19 = vld [vmem:[#allocation11 + $0x4e4] ss:$16 sps:$4 sm:$0xff]  }
 0x270   :  { %3664 = vmatpush1.bf16.msra.mxu1 %v10788_v22  ;;  %v10839_v22 = vld [vmem:[#allocation11 + $0x4e8] ss:$16 sps:$4 sm:$0xff]  }
 0x271   :  { %3676 = vmatprep.subr.bf16.mxu1 %v10796_v24  ;;  %v10847_v24 = vld [vmem:[#allocation11 + $0x50c] ss:$16 sps:$4 sm:$0xff]  }
 0x272   :  { %3783 = vmatpush1.bf16.msra.mxu0 %v10761_v21  ;;  %v10836_v21 = vld [vmem:[#allocation11 + $0x4e0] ss:$16 sps:$4 sm:$0xff]  }
 0x273   :  { %3784 = vmatprep.subr.bf16.mxu0 %v10769_v23  ;;  %v10844_v23 = vld [vmem:[#allocation11 + $0x504] ss:$16 sps:$4 sm:$0xff]  }
 0x276   :  { %3785 = vmatpush1.bf16.msra.mxu0 %v10767_v25  ;;  %v10842_v25 = vld [vmem:[#allocation11 + $0x500] ss:$16 sps:$4 sm:$0xff]  }
 0x277   :  { %3786 = vmatprep.subr.bf16.mxu0 %v10775_v26  ;;  %v10845_v26 = vld [vmem:[#allocation11 + $0x508] ss:$16 sps:$4 sm:$0xff]  }
 0x27a   :  { %3787 = vmatpush1.bf16.msra.mxu0 %v10773_v27  ;;  %v10850_v27 = vld [vmem:[#allocation11 + $0x524] ss:$16 sps:$4 sm:$0xff]  }
 0x27b   :  { %3788 = vmatprep.subr.bf16.mxu0 %v10781_v28  ;;  %v10853_v28 = vld [vmem:[#allocation11 + $0x52c] ss:$16 sps:$4 sm:$0xff]  }
 0x27e   :  { %3789 = vmatpush1.bf16.msra.mxu0 %v10779_v29  ;;  %v10848_v29 = vld [vmem:[#allocation11 + $0x520] ss:$16 sps:$4 sm:$0xff]  }
 0x27f   :  { %3790 = vmatprep.subr.bf16.mxu0 %v10787_v50  ;;  %v10851_v50 = vld [vmem:[#allocation11 + $0x528] ss:$16 sps:$4 sm:$0xff]  }
 0x282   :  { %3791 = vmatpush1.bf16.msra.mxu0 %v10785_v4  ;;  %v10856_v4 = vld [vmem:[#allocation11 + $0x544] ss:$16 sps:$4 sm:$0xff]  }
 0x283   :  { %3792 = vmatprep.subr.bf16.mxu0 %v10793_v7  ;;  %v10859_v7 = vld [vmem:[#allocation11 + $0x54c] ss:$16 sps:$4 sm:$0xff]  }
 0x286   :  { %3793 = vmatpush1.bf16.msra.mxu0 %v10791_v49  ;;  %v12458_v49 = vsub.s32 4, %v12422_v30 }
 0x287   :  { %3805 = vmatprep.subr.bf16.mxu0 %v10799_v12  ;;  %v10854_v12 = vld [vmem:[#allocation11 + $0x540] ss:$16 sps:$4 sm:$0xff]  }
 0x29b   :  { %v2228_v37 = vpop.f32.mrb[4].mxu1 }
 0x29c   :  { %v2230_v39 = vpop.f32.mrb[5].mxu1  ;;  %v10025_v41 = vadd.f32 %v2228_v37, %v490_v36  ;;  %v12461_v37 = vsub.s32 5, %v12422_v30 }
 0x29d   :  { %v2232_v40 = vpop.f32.mrb[6].mxu1  ;;  %v10026_v48 = vadd.f32 %v2230_v39, %v494_v38  ;;  %v10865_v39 = vld [vmem:[#allocation11 + $0x56c] ss:$16 sps:$4 sm:$0xff]  }
 0x29e   :  { %v10027_v45 = vadd.f32 %v2232_v40, %v490_v36  ;;  %v2234_v46 = vpop.f32.mrb[7].mxu1  ;;  %v10857_v36 = vld [vmem:[#allocation11 + $0x548] ss:$16 sps:$4 sm:$0xff]  }
 0x29f   :  { %v10028_v51 = vadd.f32 %v2234_v46, %v494_v38  ;;  %v10862_v38 = vld [vmem:[#allocation11 + $0x564] ss:$16 sps:$4 sm:$0xff]   ;;  %v11843_v40 = vld [vmem:[#allocation10] sm:$0x3f] }
 0x2a0   :  { %v2368_v52 = vpack.c.bf16 %v10027_v45, %v10025_v41  ;;  %v498_v41 = vrot.slane %v11843_v40, %v12458_v49  ;;  %v502_v46 = vrot.slane %v11843_v40, %v12461_v37  ;;  %v10911_v40 = vld [vmem:[#allocation8 + $0x98] ss:$24 sps:$4 sm:$0xff]  }
 0x2a1   :  { %v2369_v53 = vpack.c.bf16 %v10028_v51, %v10026_v48  ;;  %v10860_v48 = vld [vmem:[#allocation11 + $0x560] ss:$16 sps:$4 sm:$0xff]   ;;  %v10863_v51 = vld [vmem:[#allocation11 + $0x568] ss:$16 sps:$4 sm:$0xff]  }
 0x2a2   :  { %11807 = vtanh.bf16 %v2368_v52 }
 0x2a3   :  { %11809 = vtanh.bf16 %v2369_v53  ;;  %v10868_v53 = vld [vmem:[#allocation11 + $0x584] ss:$16 sps:$4 sm:$0xff]  }
 0x2ad   :  { %v11808_v54 = vpop.eup %11807 }
 0x2ae   :  { %v11810_v55 = vpop.eup %11809  ;;  %v2412_v59 = vmul.bf16 %v11808_v54, %v12441_v13  ;;  %v10871_v54 = vld [vmem:[#allocation11 + $0x58c] ss:$16 sps:$4 sm:$0xff]  }
 0x2af   :  { %v2413_v56 = vmul.bf16 %v11810_v55, %v12441_v13  ;;  %v12165_v55 = vmov 1966171168  }
 0x2b1   :  { %3665 = vmatprep.mubr.bf16.mxu1 %v2413_v56  ;;  %3794 = vmatprep.mubr.bf16.mxu0 %v2413_v56  ;;  %v4200_v56 = vunpack.c.l.s4 %v12165_v55  ;;  %v10928_v55 = vld [vmem:[#allocation8 + $0x124] ss:$24 sps:$4 sm:$0xff]  }
 0x2b2   :  { %3666 = vmatmul.mubr.bf16.vlgmr.msra.gmra.mrb[8].mxu1 %v2412_v59  ;;  %3795 = vmatmul.mubr.bf16.vlgmr.msra.gmra.mrb[8].mxu0 %v2412_v59 }
 0x2b3   :  { %3677 = vmatpush1.bf16.msra.mxu1 %v10794_v57  ;;  %3806 = vmatpush1.bf16.msra.mxu0 %v10797_v58 }
 0x2b4   :  { %3678 = vmatprep.subr.bf16.mxu1 %v10802_v34  ;;  %3807 = vmatprep.subr.bf16.mxu0 %v10805_v60 }
 0x2b7   :  { %3679 = vmatpush1.bf16.msra.mxu1 %v10800_v61  ;;  %3808 = vmatpush1.bf16.msra.mxu0 %v10803_v62  ;;  %v10866_v62 = vld [vmem:[#allocation11 + $0x580] ss:$16 sps:$4 sm:$0xff]  }
 0x2b8   :  { %3680 = vmatprep.subr.bf16.mxu1 %v10808_v42  ;;  %3809 = vmatprep.subr.bf16.mxu0 %v10811_v63  ;;  %v10869_v42 = vld [vmem:[#allocation11 + $0x588] ss:$16 sps:$4 sm:$0xff]  }
 0x2bb   :  { %3681 = vmatpush1.bf16.msra.mxu1 %v10806_v43  ;;  %3810 = vmatpush1.bf16.msra.mxu0 %v10809_v0  ;;  %v10874_v43 = vld [vmem:[#allocation11 + $0x5a4] ss:$16 sps:$4 sm:$0xff]   ;;  %v10877_v0 = vld [vmem:[#allocation11 + $0x5ac] ss:$16 sps:$4 sm:$0xff]  }
 0x2bc   :  { %3682 = vmatprep.subr.bf16.mxu1 %v10814_v1  ;;  %3811 = vmatprep.subr.bf16.mxu0 %v10817_v2  ;;  %v4201_v1 = vunpack.c.0.s8 %v4200_v56  ;;  %v10931_v56 = vld [vmem:[#allocation8 + $0x12c] ss:$24 sps:$4 sm:$0xff]  }
 0x2bf   :  { %3683 = vmatpush1.bf16.msra.mxu1 %v10812_v44  ;;  %3812 = vmatpush1.bf16.msra.mxu0 %v10815_v47  ;;  %v10872_v44 = vld [vmem:[#allocation11 + $0x5a0] ss:$16 sps:$4 sm:$0xff]   ;;  %v10875_v47 = vld [vmem:[#allocation11 + $0x5a8] ss:$16 sps:$4 sm:$0xff]  }
 0x2c0   :  { %3684 = vmatprep.subr.bf16.mxu1 %v10820_v3  ;;  %3813 = vmatprep.subr.bf16.mxu0 %v10823_v5  ;;  %v10880_v3 = vld [vmem:[#allocation11 + $0x5c4] ss:$16 sps:$4 sm:$0xff]   ;;  %v10883_v5 = vld [vmem:[#allocation11 + $0x5cc] ss:$16 sps:$4 sm:$0xff]  }
 0x2c3   :  { %3685 = vmatpush1.bf16.msra.mxu1 %v10818_v6  ;;  %3814 = vmatpush1.bf16.msra.mxu0 %v10821_v8  ;;  %v12465_v6 = vld [vmem:[#allocation5] sm:$0x3f]  ;;  %v12468_v8 = vsub.s32 %v4201_v1, %v12422_v30 }
 0x2c4   :  { %3686 = vmatprep.subr.bf16.mxu1 %v10826_v9  ;;  %3815 = vmatprep.subr.bf16.mxu0 %v10829_v10  ;;  %v10878_v9 = vld [vmem:[#allocation11 + $0x5c0] ss:$16 sps:$4 sm:$0xff]   ;;  %v10881_v10 = vld [vmem:[#allocation11 + $0x5c8] ss:$16 sps:$4 sm:$0xff]  }
 0x2c5   :  { %v10892_v30 = vld [vmem:[#allocation8 + $0x4] ss:$24 sps:$4 sm:$0xff]  }
 0x2c6   :  { %v10949_v1 = vld [vmem:[#allocation8 + $0x1bc] ss:$24 sps:$4 sm:$0xff]  }
 0x2c7   :  { %3687 = vmatpush1.bf16.msra.mxu1 %v10824_v11  ;;  %3816 = vmatpush1.bf16.msra.mxu0 %v10827_v14  ;;  %v10886_v11 = vld [vmem:[#allocation11 + $0x5e4] ss:$16 sps:$4 sm:$0xff]   ;;  %v10889_v14 = vld [vmem:[#allocation11 + $0x5ec] ss:$16 sps:$4 sm:$0xff]  }
 0x2c8   :  { %3688 = vmatprep.subr.bf16.mxu1 %v10832_v15  ;;  %3817 = vmatprep.subr.bf16.mxu0 %v10835_v16  ;;  %v12472_v15 = vrot.slane %v12465_v6, %v12468_v8  ;;  %v10884_v16 = vld [vmem:[#allocation11 + $0x5e0] ss:$16 sps:$4 sm:$0xff]  }
 0x2cb   :  { %3689 = vmatpush1.bf16.msra.mxu1 %v10830_v17  ;;  %3818 = vmatpush1.bf16.msra.mxu0 %v10833_v18  ;;  %v10887_v17 = vld [vmem:[#allocation11 + $0x5e8] ss:$16 sps:$4 sm:$0xff]  }
 0x2cc   :  { %3690 = vmatprep.subr.bf16.mxu1 %v10838_v19  ;;  %3819 = vmatprep.subr.bf16.mxu0 %v10841_v20  ;;  %v10895_v18 = vld [vmem:[#allocation8 + $0xc] ss:$24 sps:$4 sm:$0xff]   ;;  %v4213_v20 = vcombine.high %v12472_v15, %v12472_v15 }
 0x2cf   :  { %3691 = vmatpush1.bf16.msra.mxu1 %v10836_v21  ;;  %3820 = vmatpush1.bf16.msra.mxu0 %v10839_v22 }
 0x2d0   :  { %3692 = vmatprep.subr.bf16.mxu1 %v10844_v23  ;;  %3821 = vmatprep.subr.bf16.mxu0 %v10847_v24  ;;  %v10890_v23 = vld [vmem:[#allocation8] ss:$24 sps:$4 sm:$0xff]  }
 0x2d1   :  { %v10893_v24 = vld [vmem:[#allocation8 + $0x8] ss:$24 sps:$4 sm:$0xff]  }
 0x2d3   :  { %3693 = vmatpush1.bf16.msra.mxu1 %v10842_v25  ;;  %3822 = vmatpush1.bf16.msra.mxu0 %v10845_v26  ;;  %v10898_v26 = vld [vmem:[#allocation8 + $0x34] ss:$24 sps:$4 sm:$0xff]  }
 0x2d4   :  { %3694 = vmatprep.subr.bf16.mxu1 %v10850_v27  ;;  %3823 = vmatprep.subr.bf16.mxu0 %v10853_v28  ;;  %v10901_v27 = vld [vmem:[#allocation8 + $0x3c] ss:$24 sps:$4 sm:$0xff]   ;;  %v12479_v28 = vrot.slane %v4213_v20, %v12468_v8 }
 0x2d5   :  { %v10970_v20 = vld [vmem:[#allocation8 + $0x274] ss:$24 sps:$4 sm:$0xff]  }
 0x2d7   :  { %3695 = vmatpush1.bf16.msra.mxu1 %v10848_v29  ;;  %3824 = vmatpush1.bf16.msra.mxu0 %v10851_v50  ;;  %v10896_v29 = vld [vmem:[#allocation8 + $0x30] ss:$24 sps:$4 sm:$0xff]  }
 0x2d8   :  { %3696 = vmatprep.subr.bf16.mxu1 %v10856_v4  ;;  %3825 = vmatprep.subr.bf16.mxu0 %v10859_v7  ;;  %v10899_v50 = vld [vmem:[#allocation8 + $0x38] ss:$24 sps:$4 sm:$0xff]   ;;  %v10904_v4 = vld [vmem:[#allocation8 + $0x64] ss:$24 sps:$4 sm:$0xff]  }
 0x2d9   :  { %v10907_v7 = vld [vmem:[#allocation8 + $0x6c] ss:$24 sps:$4 sm:$0xff]  }
 0x2db   :  { %3697 = vmatpush1.bf16.msra.mxu1 %v10854_v12  ;;  %3826 = vmatpush1.bf16.msra.mxu0 %v10857_v36  ;;  %v10905_v12 = vld [vmem:[#allocation8 + $0x68] ss:$24 sps:$4 sm:$0xff]   ;;  %v10910_v36 = vld [vmem:[#allocation8 + $0x94] ss:$24 sps:$4 sm:$0xff]  }
 0x2dc   :  { %v2357_v45 = vpop.f32.mrb[4].mxu0  ;;  %3698 = vmatprep.subr.bf16.mxu1 %v10862_v38  ;;  %3827 = vmatprep.subr.bf16.mxu0 %v10865_v39  ;;  %v10913_v38 = vld [vmem:[#allocation8 + $0x9c] ss:$24 sps:$4 sm:$0xff]   ;;  %v10908_v39 = vld [vmem:[#allocation8 + $0x90] ss:$24 sps:$4 sm:$0xff]  }
 0x2dd   :  { %v2359_v52 = vpop.f32.mrb[5].mxu0  ;;  %v10029_v58 = vadd.f32 %v2357_v45, %v498_v41  ;;  %v10919_v45 = vld [vmem:[#allocation8 + $0xcc] ss:$24 sps:$4 sm:$0xff]  }
 0x2de   :  { %v2361_v57 = vpop.f32.mrb[6].mxu0  ;;  %v10030_v60 = vadd.f32 %v2359_v52, %v502_v46  ;;  %v10925_v52 = vld [vmem:[#allocation8 + $0xfc] ss:$24 sps:$4 sm:$0xff]  }
 0x2df   :  { %v10031_v59 = vadd.f32 %v2361_v57, %v498_v41  ;;  %v2363_v34 = vpop.f32.mrb[7].mxu0  ;;  %3699 = vmatpush1.bf16.msra.mxu1 %v10860_v48  ;;  %3828 = vmatpush1.bf16.msra.mxu0 %v10863_v51  ;;  %v10916_v41 = vld [vmem:[#allocation8 + $0xc4] ss:$24 sps:$4 sm:$0xff]   ;;  %v10917_v48 = vld [vmem:[#allocation8 + $0xc8] ss:$24 sps:$4 sm:$0xff]  }
 0x2e0   :  { %v10032_v61 = vadd.f32 %v2363_v34, %v502_v46  ;;  %3700 = vmatprep.subr.bf16.mxu1 %v10868_v53  ;;  %3829 = vmatprep.subr.bf16.mxu0 %v10871_v54  ;;  %v10914_v46 = vld [vmem:[#allocation8 + $0xc0] ss:$24 sps:$4 sm:$0xff]   ;;  %v10922_v51 = vld [vmem:[#allocation8 + $0xf4] ss:$24 sps:$4 sm:$0xff]   ;;  %v10920_v53 = vld [vmem:[#allocation8 + $0xf0] ss:$24 sps:$4 sm:$0xff]  }
 0x2e1   :  { %v2370_v63 = vpack.c.bf16 %v10031_v59, %v10029_v58  ;;  %v10923_v54 = vld [vmem:[#allocation8 + $0xf8] ss:$24 sps:$4 sm:$0xff]   ;;  %v10929_v58 = vld [vmem:[#allocation8 + $0x128] ss:$24 sps:$4 sm:$0xff]   ;;  %v10934_v59 = vld [vmem:[#allocation8 + $0x154] ss:$24 sps:$4 sm:$0xff]  }
 0x2e2   :  { %v2371_v2 = vpack.c.bf16 %v10032_v61, %v10030_v60  ;;  %v10926_v57 = vld [vmem:[#allocation8 + $0x120] ss:$24 sps:$4 sm:$0xff]   ;;  %v10937_v34 = vld [vmem:[#allocation8 + $0x15c] ss:$24 sps:$4 sm:$0xff]   ;;  %v10932_v60 = vld [vmem:[#allocation8 + $0x150] ss:$24 sps:$4 sm:$0xff]  }
 0x2e3   :  { %11811 = vtanh.bf16 %v2370_v63  ;;  %3701 = vmatpush1.bf16.msra.mxu1 %v10866_v62  ;;  %3830 = vmatpush1.bf16.msra.mxu0 %v10869_v42  ;;  %v10935_v61 = vld [vmem:[#allocation8 + $0x158] ss:$24 sps:$4 sm:$0xff]   ;;  %v10940_v62 = vld [vmem:[#allocation8 + $0x184] ss:$24 sps:$4 sm:$0xff]  }
 0x2e4   :  { %11813 = vtanh.bf16 %v2371_v2  ;;  %3702 = vmatprep.subr.bf16.mxu1 %v10874_v43  ;;  %3831 = vmatprep.subr.bf16.mxu0 %v10877_v0  ;;  %v10943_v42 = vld [vmem:[#allocation8 + $0x18c] ss:$24 sps:$4 sm:$0xff]   ;;  %v10938_v63 = vld [vmem:[#allocation8 + $0x180] ss:$24 sps:$4 sm:$0xff]   ;;  %v10944_v2 = vld [vmem:[#allocation8 + $0x1b0] ss:$24 sps:$4 sm:$0xff]  }
 0x2e5   :  { %v10941_v43 = vld [vmem:[#allocation8 + $0x188] ss:$24 sps:$4 sm:$0xff]   ;;  %v10946_v0 = vld [vmem:[#allocation8 + $0x1b4] ss:$24 sps:$4 sm:$0xff]  }
 0x2e7   :  { %3703 = vmatpush1.bf16.msra.mxu1 %v10872_v44  ;;  %3832 = vmatpush1.bf16.msra.mxu0 %v10875_v47  ;;  %v10947_v44 = vld [vmem:[#allocation8 + $0x1b8] ss:$24 sps:$4 sm:$0xff]   ;;  %v10952_v47 = vld [vmem:[#allocation8 + $0x1e4] ss:$24 sps:$4 sm:$0xff]  }
 0x2e8   :  { %3704 = vmatprep.subr.bf16.mxu1 %v10880_v3  ;;  %3833 = vmatprep.subr.bf16.mxu0 %v10883_v5  ;;  %v10955_v3 = vld [vmem:[#allocation8 + $0x1ec] ss:$24 sps:$4 sm:$0xff]   ;;  %v10950_v5 = vld [vmem:[#allocation8 + $0x1e0] ss:$24 sps:$4 sm:$0xff]  }
 0x2eb   :  { %3705 = vmatpush1.bf16.msra.mxu1 %v10878_v9  ;;  %3834 = vmatpush1.bf16.msra.mxu0 %v10881_v10  ;;  %v10953_v9 = vld [vmem:[#allocation8 + $0x1e8] ss:$24 sps:$4 sm:$0xff]   ;;  %v10958_v10 = vld [vmem:[#allocation8 + $0x214] ss:$24 sps:$4 sm:$0xff]  }
 0x2ec   :  { %3706 = vmatprep.subr.bf16.mxu1 %v10886_v11  ;;  %3835 = vmatprep.subr.bf16.mxu0 %v10889_v14  ;;  %v10961_v11 = vld [vmem:[#allocation8 + $0x21c] ss:$24 sps:$4 sm:$0xff]   ;;  %v10956_v14 = vld [vmem:[#allocation8 + $0x210] ss:$24 sps:$4 sm:$0xff]  }
 0x2ee   :  { %v11812_v19 = vpop.eup %11811 }
 0x2ef   :  { %v11814_v21 = vpop.eup %11813  ;;  %3707 = vmatpush1.bf16.msra.mxu1 %v10884_v16  ;;  %3836 = vmatpush1.bf16.msra.mxu0 %v10887_v17  ;;  %v2414_v25 = vmul.bf16 %v11812_v19, %v12441_v13  ;;  %v10959_v16 = vld [vmem:[#allocation8 + $0x218] ss:$24 sps:$4 sm:$0xff]   ;;  %v10964_v17 = vld [vmem:[#allocation8 + $0x244] ss:$24 sps:$4 sm:$0xff]   ;;  %v10965_v19 = vld [vmem:[#allocation8 + $0x248] ss:$24 sps:$4 sm:$0xff]  }
 0x2f0   :  { %v2415_v22 = vmul.bf16 %v11814_v21, %v12441_v13  ;;  %5691 = vmatprep.subr.bf16.mxu1 %v10892_v30  ;;  %5814 = vmatprep.subr.bf16.mxu0 %v10895_v18  ;;  %v10902_v13 = vld [vmem:[#allocation8 + $0x60] ss:$24 sps:$4 sm:$0xff]   ;;  %v10967_v30 = vld [vmem:[#allocation8 + $0x24c] ss:$24 sps:$4 sm:$0xff]   ;;  %v10973_v21 = vld [vmem:[#allocation8 + $0x27c] ss:$24 sps:$4 sm:$0xff]  }
 0x2f1   :  { %v10962_v18 = vld [vmem:[#allocation8 + $0x240] ss:$24 sps:$4 sm:$0xff]  }
 0x2f2   :  { %3708 = vmatprep.mubr.bf16.mxu1 %v2415_v22  ;;  %3837 = vmatprep.mubr.bf16.mxu0 %v2415_v22  ;;  %v10968_v22 = vld [vmem:[#allocation8 + $0x270] ss:$24 sps:$4 sm:$0xff]  }
 0x2f3   :  { %3709 = vmatmul.mubr.bf16.vlgmr.msra.gmra.mrb[8].mxu1 %v2414_v25  ;;  %3838 = vmatmul.mubr.bf16.vlgmr.msra.gmra.mrb[8].mxu0 %v2414_v25  ;;  %v10979_v25 = vld [vmem:[#allocation8 + $0x2ac] ss:$24 sps:$4 sm:$0xff]  }
 0x2f4   :  { %5692 = vmatpush1.bf16.msra.mxu1 %v10890_v23  ;;  %5815 = vmatpush1.bf16.msra.mxu0 %v10893_v24  ;;  %v10971_v23 = vld [vmem:[#allocation8 + $0x278] ss:$24 sps:$4 sm:$0xff]   ;;  %v10976_v24 = vld [vmem:[#allocation8 + $0x2a4] ss:$24 sps:$4 sm:$0xff]  }
 0x2f5   :  { %5693 = vmatprep.subr.bf16.mxu1 %v10898_v26  ;;  %5816 = vmatprep.subr.bf16.mxu0 %v10901_v27  ;;  %v10974_v26 = vld [vmem:[#allocation8 + $0x2a0] ss:$24 sps:$4 sm:$0xff]  }
 0x2f6   :  { %5723 = vmatprep.mubr.bf16.mxu1 %v12479_v28  ;;  %5846 = vmatprep.mubr.bf16.mxu0 %v12479_v28  ;;  %v10977_v27 = vld [vmem:[#allocation8 + $0x2a8] ss:$24 sps:$4 sm:$0xff]  }
 0x2f8   :  { %5694 = vmatpush1.bf16.msra.mxu1 %v10896_v29  ;;  %5817 = vmatpush1.bf16.msra.mxu0 %v10899_v50  ;;  %v10982_v29 = vld [vmem:[#allocation8 + $0x2d4] ss:$24 sps:$4 sm:$0xff]  }
 0x2f9   :  { %5695 = vmatprep.subr.bf16.mxu1 %v10904_v4  ;;  %5818 = vmatprep.subr.bf16.mxu0 %v10907_v7  ;;  %v10985_v50 = vld [vmem:[#allocation8 + $0x2dc] ss:$24 sps:$4 sm:$0xff]   ;;  %v10980_v4 = vld [vmem:[#allocation8 + $0x2d0] ss:$24 sps:$4 sm:$0xff]  }
 0x2fa   :  { %v10983_v7 = vld [vmem:[#allocation8 + $0x2d8] ss:$24 sps:$4 sm:$0xff]  }
 0x2fc   :  { %5696 = vmatpush1.bf16.msra.mxu1 %v10902_v13  ;;  %5819 = vmatpush1.bf16.msra.mxu0 %v10905_v12  ;;  %v10988_v13 = vld [vmem:[#allocation8 + $0x304] ss:$24 sps:$4 sm:$0xff]  }
 0x2fd   :  { %5697 = vmatprep.subr.bf16.mxu1 %v10910_v36  ;;  %5820 = vmatprep.subr.bf16.mxu0 %v10913_v38  ;;  %v10991_v12 = vld [vmem:[#allocation8 + $0x30c] ss:$24 sps:$4 sm:$0xff]   ;;  %v12485_v36 = vrot.slane %v12472_v15, %v12468_v8  ;;  %v10986_v38 = vld [vmem:[#allocation8 + $0x300] ss:$24 sps:$4 sm:$0xff]   ;;  %v10992_v15 = vld [vmem:[#allocation8 + $0x330] ss:$24 sps:$4 sm:$0xff]  }
 0x300   :  { %5698 = vmatpush1.bf16.msra.mxu1 %v10908_v39  ;;  %5821 = vmatpush1.bf16.msra.mxu0 %v10911_v40  ;;  %v10989_v39 = vld [vmem:[#allocation8 + $0x308] ss:$24 sps:$4 sm:$0xff]   ;;  %v10994_v40 = vld [vmem:[#allocation8 + $0x334] ss:$24 sps:$4 sm:$0xff]  }
 0x301   :  { %5699 = vmatprep.subr.bf16.mxu1 %v10916_v41  ;;  %5822 = vmatprep.subr.bf16.mxu0 %v10919_v45  ;;  %v10997_v41 = vld [vmem:[#allocation8 + $0x33c] ss:$24 sps:$4 sm:$0xff]   ;;  %v12489_v45 = vcombine.high %v12479_v28, %v12479_v28 }
 0x304   :  { %5700 = vmatpush1.bf16.msra.mxu1 %v10914_v46  ;;  %5823 = vmatpush1.bf16.msra.mxu0 %v10917_v48  ;;  %v10995_v46 = vld [vmem:[#allocation8 + $0x338] ss:$24 sps:$4 sm:$0xff]   ;;  %v11000_v48 = vld [vmem:[#allocation8 + $0x364] ss:$24 sps:$4 sm:$0xff]  }
 0x305   :  { %5701 = vmatprep.subr.bf16.mxu1 %v10922_v51  ;;  %5824 = vmatprep.subr.bf16.mxu0 %v10925_v52  ;;  %v11003_v51 = vld [vmem:[#allocation8 + $0x36c] ss:$24 sps:$4 sm:$0xff]   ;;  %v10998_v52 = vld [vmem:[#allocation8 + $0x360] ss:$24 sps:$4 sm:$0xff]  }
 0x308   :  { %5702 = vmatpush1.bf16.msra.mxu1 %v10920_v53  ;;  %5825 = vmatpush1.bf16.msra.mxu0 %v10923_v54  ;;  %v11001_v53 = vld [vmem:[#allocation8 + $0x368] ss:$24 sps:$4 sm:$0xff]   ;;  %v11006_v54 = vld [vmem:[#allocation8 + $0x394] ss:$24 sps:$4 sm:$0xff]  }
 0x309   :  { %5703 = vmatprep.subr.bf16.mxu1 %v10928_v55  ;;  %5826 = vmatprep.subr.bf16.mxu0 %v10931_v56  ;;  %v11009_v55 = vld [vmem:[#allocation8 + $0x39c] ss:$24 sps:$4 sm:$0xff]   ;;  %v11004_v56 = vld [vmem:[#allocation8 + $0x390] ss:$24 sps:$4 sm:$0xff]  }
 0x30c   :  { %5704 = vmatpush1.bf16.msra.mxu1 %v10926_v57  ;;  %5827 = vmatpush1.bf16.msra.mxu0 %v10929_v58  ;;  %v11007_v57 = vld [vmem:[#allocation8 + $0x398] ss:$24 sps:$4 sm:$0xff]   ;;  %v11012_v58 = vld [vmem:[#allocation8 + $0x3c4] ss:$24 sps:$4 sm:$0xff]  }
 0x30d   :  { %5705 = vmatprep.subr.bf16.mxu1 %v10934_v59  ;;  %5828 = vmatprep.subr.bf16.mxu0 %v10937_v34  ;;  %v11015_v59 = vld [vmem:[#allocation8 + $0x3cc] ss:$24 sps:$4 sm:$0xff]   ;;  %v11010_v34 = vld [vmem:[#allocation8 + $0x3c0] ss:$24 sps:$4 sm:$0xff]  }
 0x310   :  { %5706 = vmatpush1.bf16.msra.mxu1 %v10932_v60  ;;  %5829 = vmatpush1.bf16.msra.mxu0 %v10935_v61  ;;  %v11013_v60 = vld [vmem:[#allocation8 + $0x3c8] ss:$24 sps:$4 sm:$0xff]   ;;  %v11018_v61 = vld [vmem:[#allocation8 + $0x3f4] ss:$24 sps:$4 sm:$0xff]  }
 0x311   :  { %5707 = vmatprep.subr.bf16.mxu1 %v10940_v62  ;;  %5830 = vmatprep.subr.bf16.mxu0 %v10943_v42  ;;  %v11021_v62 = vld [vmem:[#allocation8 + $0x3fc] ss:$24 sps:$4 sm:$0xff]   ;;  %v11016_v42 = vld [vmem:[#allocation8 + $0x3f0] ss:$24 sps:$4 sm:$0xff]  }
 0x314   :  { %5708 = vmatpush1.bf16.msra.mxu1 %v10938_v63  ;;  %5831 = vmatpush1.bf16.msra.mxu0 %v10941_v43  ;;  %v11019_v63 = vld [vmem:[#allocation8 + $0x3f8] ss:$24 sps:$4 sm:$0xff]   ;;  %v11024_v43 = vld [vmem:[#allocation8 + $0x424] ss:$24 sps:$4 sm:$0xff]  }
 0x315   :  { %5709 = vmatprep.subr.bf16.mxu1 %v10946_v0  ;;  %5832 = vmatprep.subr.bf16.mxu0 %v10949_v1  ;;  %v11027_v0 = vld [vmem:[#allocation8 + $0x42c] ss:$24 sps:$4 sm:$0xff]   ;;  %v11022_v1 = vld [vmem:[#allocation8 + $0x420] ss:$24 sps:$4 sm:$0xff]  }
 0x318   :  { %5710 = vmatpush1.bf16.msra.mxu1 %v10944_v2  ;;  %5833 = vmatpush1.bf16.msra.mxu0 %v10947_v44  ;;  %v11025_v2 = vld [vmem:[#allocation8 + $0x428] ss:$24 sps:$4 sm:$0xff]   ;;  %v11030_v44 = vld [vmem:[#allocation8 + $0x454] ss:$24 sps:$4 sm:$0xff]  }
 0x319   :  { %5711 = vmatprep.subr.bf16.mxu1 %v10952_v47  ;;  %5834 = vmatprep.subr.bf16.mxu0 %v10955_v3  ;;  %v11033_v47 = vld [vmem:[#allocation8 + $0x45c] ss:$24 sps:$4 sm:$0xff]   ;;  %v11028_v3 = vld [vmem:[#allocation8 + $0x450] ss:$24 sps:$4 sm:$0xff]  }
 0x31c   :  { %5712 = vmatpush1.bf16.msra.mxu1 %v10950_v5  ;;  %5835 = vmatpush1.bf16.msra.mxu0 %v10953_v9  ;;  %v11031_v5 = vld [vmem:[#allocation8 + $0x458] ss:$24 sps:$4 sm:$0xff]   ;;  %v11036_v9 = vld [vmem:[#allocation8 + $0x484] ss:$24 sps:$4 sm:$0xff]  }
 0x31d   :  { %5713 = vmatprep.subr.bf16.mxu1 %v10958_v10  ;;  %5836 = vmatprep.subr.bf16.mxu0 %v10961_v11  ;;  %v11039_v10 = vld [vmem:[#allocation8 + $0x48c] ss:$24 sps:$4 sm:$0xff]   ;;  %v11034_v11 = vld [vmem:[#allocation8 + $0x480] ss:$24 sps:$4 sm:$0xff]  }
 0x320   :  { %5714 = vmatpush1.bf16.msra.mxu1 %v10956_v14  ;;  %5837 = vmatpush1.bf16.msra.mxu0 %v10959_v16  ;;  %v11037_v14 = vld [vmem:[#allocation8 + $0x488] ss:$24 sps:$4 sm:$0xff]   ;;  %v11042_v16 = vld [vmem:[#allocation8 + $0x4b4] ss:$24 sps:$4 sm:$0xff]  }
 0x321   :  { %5715 = vmatprep.subr.bf16.mxu1 %v10964_v17  ;;  %5838 = vmatprep.subr.bf16.mxu0 %v10967_v30  ;;  %v11045_v17 = vld [vmem:[#allocation8 + $0x4bc] ss:$24 sps:$4 sm:$0xff]   ;;  %v11040_v30 = vld [vmem:[#allocation8 + $0x4b0] ss:$24 sps:$4 sm:$0xff]  }
 0x324   :  { %5716 = vmatpush1.bf16.msra.mxu1 %v10962_v18  ;;  %5839 = vmatpush1.bf16.msra.mxu0 %v10965_v19  ;;  %v11043_v18 = vld [vmem:[#allocation8 + $0x4b8] ss:$24 sps:$4 sm:$0xff]   ;;  %v11048_v19 = vld [vmem:[#allocation8 + $0x4e4] ss:$24 sps:$4 sm:$0xff]  }
 0x325   :  { %5717 = vmatprep.subr.bf16.mxu1 %v10970_v20  ;;  %5840 = vmatprep.subr.bf16.mxu0 %v10973_v21  ;;  %v11051_v20 = vld [vmem:[#allocation8 + $0x4ec] ss:$24 sps:$4 sm:$0xff]   ;;  %v11046_v21 = vld [vmem:[#allocation8 + $0x4e0] ss:$24 sps:$4 sm:$0xff]  }
 0x328   :  { %5718 = vmatpush1.bf16.msra.mxu1 %v10968_v22  ;;  %5841 = vmatpush1.bf16.msra.mxu0 %v10971_v23  ;;  %v11049_v22 = vld [vmem:[#allocation8 + $0x4e8] ss:$24 sps:$4 sm:$0xff]   ;;  %v11054_v23 = vld [vmem:[#allocation8 + $0x514] ss:$24 sps:$4 sm:$0xff]  }
 0x329   :  { %5719 = vmatprep.subr.bf16.mxu1 %v10976_v24  ;;  %5842 = vmatprep.subr.bf16.mxu0 %v10979_v25  ;;  %v11057_v24 = vld [vmem:[#allocation8 + $0x51c] ss:$24 sps:$4 sm:$0xff]   ;;  %v11052_v25 = vld [vmem:[#allocation8 + $0x510] ss:$24 sps:$4 sm:$0xff]  }
 0x32c   :  { %5720 = vmatpush1.bf16.msra.mxu1 %v10974_v26  ;;  %5843 = vmatpush1.bf16.msra.mxu0 %v10977_v27  ;;  %v11055_v26 = vld [vmem:[#allocation8 + $0x518] ss:$24 sps:$4 sm:$0xff]   ;;  %v11060_v27 = vld [vmem:[#allocation8 + $0x544] ss:$24 sps:$4 sm:$0xff]  }
 0x32d   :  { %5721 = vmatprep.subr.bf16.mxu1 %v10982_v29  ;;  %5844 = vmatprep.subr.bf16.mxu0 %v10985_v50  ;;  %v11063_v29 = vld [vmem:[#allocation8 + $0x54c] ss:$24 sps:$4 sm:$0xff]   ;;  %v11058_v50 = vld [vmem:[#allocation8 + $0x540] ss:$24 sps:$4 sm:$0xff]  }
 0x330   :  { %5722 = vmatpush1.bf16.msra.mxu1 %v10980_v4  ;;  %5845 = vmatpush1.bf16.msra.mxu0 %v10983_v7  ;;  %v11061_v4 = vld [vmem:[#allocation8 + $0x548] ss:$24 sps:$4 sm:$0xff]   ;;  %v11066_v7 = vld [vmem:[#allocation8 + $0x574] ss:$24 sps:$4 sm:$0xff]  }
 0x331   :  { %5732 = vmatprep.subr.bf16.mxu1 %v10988_v13  ;;  %5855 = vmatprep.subr.bf16.mxu0 %v10991_v12  ;;  %v11069_v13 = vld [vmem:[#allocation8 + $0x57c] ss:$24 sps:$4 sm:$0xff]   ;;  %v11064_v12 = vld [vmem:[#allocation8 + $0x570] ss:$24 sps:$4 sm:$0xff]  }
 0x333   :  { %5724 = vmatmul.mubr.bf16.vlgmr.msra.gmra.mrb[12].mxu1 %v12485_v36  ;;  %5847 = vmatmul.mubr.bf16.vlgmr.msra.gmra.mrb[12].mxu0 %v12485_v36 }
 0x334   :  { %5733 = vmatpush1.bf16.msra.mxu1 %v10986_v38  ;;  %5856 = vmatpush1.bf16.msra.mxu0 %v10989_v39  ;;  %v11067_v38 = vld [vmem:[#allocation8 + $0x578] ss:$24 sps:$4 sm:$0xff]   ;;  %v11072_v39 = vld [vmem:[#allocation8 + $0x5a4] ss:$24 sps:$4 sm:$0xff]  }
 0x335   :  { %5734 = vmatprep.subr.bf16.mxu1 %v10994_v40  ;;  %5857 = vmatprep.subr.bf16.mxu0 %v10997_v41  ;;  %v11075_v40 = vld [vmem:[#allocation8 + $0x5ac] ss:$24 sps:$4 sm:$0xff]   ;;  %v4198_v41 = vcombine.high %v12465_v6, %v12465_v6 }
 0x336   :  { %5764 = vmatprep.mubr.bf16.mxu1 %v12489_v45  ;;  %5887 = vmatprep.mubr.bf16.mxu0 %v12489_v45 }
 0x338   :  { %5735 = vmatpush1.bf16.msra.mxu1 %v10992_v15  ;;  %5858 = vmatpush1.bf16.msra.mxu0 %v10995_v46  ;;  %v11070_v15 = vld [vmem:[#allocation8 + $0x5a0] ss:$24 sps:$4 sm:$0xff]  }
 0x339   :  { %5736 = vmatprep.subr.bf16.mxu1 %v11000_v48  ;;  %5859 = vmatprep.subr.bf16.mxu0 %v11003_v51  ;;  %v11073_v46 = vld [vmem:[#allocation8 + $0x5a8] ss:$24 sps:$4 sm:$0xff]   ;;  %v11078_v48 = vld [vmem:[#allocation8 + $0x5d4] ss:$24 sps:$4 sm:$0xff]  }
 0x33a   :  { %v11081_v51 = vld [vmem:[#allocation8 + $0x5dc] ss:$24 sps:$4 sm:$0xff]  }
 0x33c   :  { %5737 = vmatpush1.bf16.msra.mxu1 %v10998_v52  ;;  %5860 = vmatpush1.bf16.msra.mxu0 %v11001_v53  ;;  %v12498_v52 = vrot.slane %v4198_v41, %v12468_v8  ;;  %v11076_v53 = vld [vmem:[#allocation8 + $0x5d0] ss:$24 sps:$4 sm:$0xff]   ;;  %v11142_v41 = vld [vmem:[#allocation8 + $0x7e0] ss:$24 sps:$4 sm:$0xff]  }
 0x33d   :  { %5738 = vmatprep.subr.bf16.mxu1 %v11006_v54  ;;  %5861 = vmatprep.subr.bf16.mxu0 %v11009_v55  ;;  %v11079_v54 = vld [vmem:[#allocation8 + $0x5d8] ss:$24 sps:$4 sm:$0xff]   ;;  %v11084_v55 = vld [vmem:[#allocation8 + $0x604] ss:$24 sps:$4 sm:$0xff]  }
 0x33e   :  { %v4214_v6 = vcombine.high %v12498_v52, %v12498_v52 }
 0x340   :  { %5739 = vmatpush1.bf16.msra.mxu1 %v11004_v56  ;;  %5862 = vmatpush1.bf16.msra.mxu0 %v11007_v57  ;;  %v11087_v56 = vld [vmem:[#allocation8 + $0x60c] ss:$24 sps:$4 sm:$0xff]   ;;  %v12504_v57 = vcombine.high %v12485_v36, %v12485_v36 }
 0x341   :  { %5740 = vmatprep.subr.bf16.mxu1 %v11012_v58  ;;  %5863 = vmatprep.subr.bf16.mxu0 %v11015_v59  ;;  %v11082_v58 = vld [vmem:[#allocation8 + $0x600] ss:$24 sps:$4 sm:$0xff]  }
 0x342   :  { %v11085_v59 = vld [vmem:[#allocation8 + $0x608] ss:$24 sps:$4 sm:$0xff]  }
 0x344   :  { %5741 = vmatpush1.bf16.msra.mxu1 %v11010_v34  ;;  %5864 = vmatpush1.bf16.msra.mxu0 %v11013_v60  ;;  %v11090_v34 = vld [vmem:[#allocation8 + $0x634] ss:$24 sps:$4 sm:$0xff]  }
 0x345   :  { %5742 = vmatprep.subr.bf16.mxu1 %v11018_v61  ;;  %5865 = vmatprep.subr.bf16.mxu0 %v11021_v62  ;;  %v11093_v60 = vld [vmem:[#allocation8 + $0x63c] ss:$24 sps:$4 sm:$0xff]   ;;  %v12507_v61 = vrot.slane %v4214_v6, %v12468_v8  ;;  %v11088_v62 = vld [vmem:[#allocation8 + $0x630] ss:$24 sps:$4 sm:$0xff]  }
 0x346   :  { %v11157_v6 = vld [vmem:[#allocation8 + $0x848] ss:$24 sps:$4 sm:$0xff]  }
 0x348   :  { %5743 = vmatpush1.bf16.msra.mxu1 %v11016_v42  ;;  %5866 = vmatpush1.bf16.msra.mxu0 %v11019_v63  ;;  %v11091_v42 = vld [vmem:[#allocation8 + $0x638] ss:$24 sps:$4 sm:$0xff]   ;;  %v11096_v63 = vld [vmem:[#allocation8 + $0x664] ss:$24 sps:$4 sm:$0xff]  }
 0x349   :  { %5744 = vmatprep.subr.bf16.mxu1 %v11024_v43  ;;  %5867 = vmatprep.subr.bf16.mxu0 %v11027_v0  ;;  %v11099_v43 = vld [vmem:[#allocation8 + $0x66c] ss:$24 sps:$4 sm:$0xff]   ;;  %v11094_v0 = vld [vmem:[#allocation8 + $0x660] ss:$24 sps:$4 sm:$0xff]  }
 0x34c   :  { %5745 = vmatpush1.bf16.msra.mxu1 %v11022_v1  ;;  %5868 = vmatpush1.bf16.msra.mxu0 %v11025_v2  ;;  %v11097_v1 = vld [vmem:[#allocation8 + $0x668] ss:$24 sps:$4 sm:$0xff]   ;;  %v11102_v2 = vld [vmem:[#allocation8 + $0x694] ss:$24 sps:$4 sm:$0xff]  }
 0x34d   :  { %5746 = vmatprep.subr.bf16.mxu1 %v11030_v44  ;;  %5869 = vmatprep.subr.bf16.mxu0 %v11033_v47  ;;  %v11105_v44 = vld [vmem:[#allocation8 + $0x69c] ss:$24 sps:$4 sm:$0xff]   ;;  %v11100_v47 = vld [vmem:[#allocation8 + $0x690] ss:$24 sps:$4 sm:$0xff]  }
 0x350   :  { %5747 = vmatpush1.bf16.msra.mxu1 %v11028_v3  ;;  %5870 = vmatpush1.bf16.msra.mxu0 %v11031_v5  ;;  %v11103_v3 = vld [vmem:[#allocation8 + $0x698] ss:$24 sps:$4 sm:$0xff]   ;;  %v11108_v5 = vld [vmem:[#allocation8 + $0x6c4] ss:$24 sps:$4 sm:$0xff]  }
 0x351   :  { %5748 = vmatprep.subr.bf16.mxu1 %v11036_v9  ;;  %5871 = vmatprep.subr.bf16.mxu0 %v11039_v10  ;;  %v11111_v9 = vld [vmem:[#allocation8 + $0x6cc] ss:$24 sps:$4 sm:$0xff]   ;;  %v11106_v10 = vld [vmem:[#allocation8 + $0x6c0] ss:$24 sps:$4 sm:$0xff]  }
 0x354   :  { %5749 = vmatpush1.bf16.msra.mxu1 %v11034_v11  ;;  %5872 = vmatpush1.bf16.msra.mxu0 %v11037_v14  ;;  %v11109_v11 = vld [vmem:[#allocation8 + $0x6c8] ss:$24 sps:$4 sm:$0xff]   ;;  %v11114_v14 = vld [vmem:[#allocation8 + $0x6f4] ss:$24 sps:$4 sm:$0xff]  }
 0x355   :  { %5750 = vmatprep.subr.bf16.mxu1 %v11042_v16  ;;  %5873 = vmatprep.subr.bf16.mxu0 %v11045_v17  ;;  %v11117_v16 = vld [vmem:[#allocation8 + $0x6fc] ss:$24 sps:$4 sm:$0xff]   ;;  %v11112_v17 = vld [vmem:[#allocation8 + $0x6f0] ss:$24 sps:$4 sm:$0xff]  }
 0x358   :  { %5751 = vmatpush1.bf16.msra.mxu1 %v11040_v30  ;;  %5874 = vmatpush1.bf16.msra.mxu0 %v11043_v18  ;;  %v11115_v30 = vld [vmem:[#allocation8 + $0x6f8] ss:$24 sps:$4 sm:$0xff]   ;;  %v11120_v18 = vld [vmem:[#allocation8 + $0x724] ss:$24 sps:$4 sm:$0xff]  }
 0x359   :  { %5752 = vmatprep.subr.bf16.mxu1 %v11048_v19  ;;  %5875 = vmatprep.subr.bf16.mxu0 %v11051_v20  ;;  %v11123_v19 = vld [vmem:[#allocation8 + $0x72c] ss:$24 sps:$4 sm:$0xff]   ;;  %v11118_v20 = vld [vmem:[#allocation8 + $0x720] ss:$24 sps:$4 sm:$0xff]  }
 0x35c   :  { %5753 = vmatpush1.bf16.msra.mxu1 %v11046_v21  ;;  %5876 = vmatpush1.bf16.msra.mxu0 %v11049_v22  ;;  %v11121_v21 = vld [vmem:[#allocation8 + $0x728] ss:$24 sps:$4 sm:$0xff]   ;;  %v11126_v22 = vld [vmem:[#allocation8 + $0x754] ss:$24 sps:$4 sm:$0xff]  }
 0x35d   :  { %5754 = vmatprep.subr.bf16.mxu1 %v11054_v23  ;;  %5877 = vmatprep.subr.bf16.mxu0 %v11057_v24  ;;  %v11129_v23 = vld [vmem:[#allocation8 + $0x75c] ss:$24 sps:$4 sm:$0xff]   ;;  %v11124_v24 = vld [vmem:[#allocation8 + $0x750] ss:$24 sps:$4 sm:$0xff]  }
 0x360   :  { %5755 = vmatpush1.bf16.msra.mxu1 %v11052_v25  ;;  %5878 = vmatpush1.bf16.msra.mxu0 %v11055_v26  ;;  %v11127_v25 = vld [vmem:[#allocation8 + $0x758] ss:$24 sps:$4 sm:$0xff]   ;;  %v6072_v26 = vld [vmem:[#allocation7] sm:$0x1] }
 0x361   :  { %5756 = vmatprep.subr.bf16.mxu1 %v11060_v27  ;;  %5879 = vmatprep.subr.bf16.mxu0 %v11063_v29  ;;  %v11132_v27 = vld [vmem:[#allocation8 + $0x784] ss:$24 sps:$4 sm:$0xff]  }
 0x362   :  { %v11135_v29 = vld [vmem:[#allocation8 + $0x78c] ss:$24 sps:$4 sm:$0xff]   ;;  %6075 = vperm.xlu1 %10160, %v6072_v26  }
 0x364   :  { %5757 = vmatpush1.bf16.msra.mxu1 %v11058_v50  ;;  %5880 = vmatpush1.bf16.msra.mxu0 %v11061_v4  ;;  %v11130_v50 = vld [vmem:[#allocation8 + $0x780] ss:$24 sps:$4 sm:$0xff]  }
 0x365   :  { %5758 = vmatprep.subr.bf16.mxu1 %v11066_v7  ;;  %5881 = vmatprep.subr.bf16.mxu0 %v11069_v13  ;;  %v11133_v4 = vld [vmem:[#allocation8 + $0x788] ss:$24 sps:$4 sm:$0xff]   ;;  %v11138_v7 = vld [vmem:[#allocation8 + $0x7b4] ss:$24 sps:$4 sm:$0xff]  }
 0x366   :  { %v11141_v13 = vld [vmem:[#allocation8 + $0x7bc] ss:$24 sps:$4 sm:$0xff]  }
 0x368   :  { %5759 = vmatpush1.bf16.msra.mxu1 %v11064_v12  ;;  %5882 = vmatpush1.bf16.msra.mxu0 %v11067_v38  ;;  %v11136_v12 = vld [vmem:[#allocation8 + $0x7b0] ss:$24 sps:$4 sm:$0xff]  }
 0x369   :  { %5760 = vmatprep.subr.bf16.mxu1 %v11072_v39  ;;  %5883 = vmatprep.subr.bf16.mxu0 %v11075_v40  ;;  %v11139_v38 = vld [vmem:[#allocation8 + $0x7b8] ss:$24 sps:$4 sm:$0xff]   ;;  %v11144_v39 = vld [vmem:[#allocation8 + $0x7e4] ss:$24 sps:$4 sm:$0xff]  }
 0x36a   :  { %v11147_v40 = vld [vmem:[#allocation8 + $0x7ec] ss:$24 sps:$4 sm:$0xff]  }
 0x36c   :  { %5761 = vmatpush1.bf16.msra.mxu1 %v11070_v15  ;;  %5884 = vmatpush1.bf16.msra.mxu0 %v11073_v46  ;;  %v11145_v15 = vld [vmem:[#allocation8 + $0x7e8] ss:$24 sps:$4 sm:$0xff]   ;;  %v11150_v46 = vld [vmem:[#allocation8 + $0x814] ss:$24 sps:$4 sm:$0xff]  }
 0x36d   :  { %5762 = vmatprep.subr.bf16.mxu1 %v11078_v48  ;;  %5885 = vmatprep.subr.bf16.mxu0 %v11081_v51  ;;  %v11153_v48 = vld [vmem:[#allocation8 + $0x81c] ss:$24 sps:$4 sm:$0xff]   ;;  %v11148_v51 = vld [vmem:[#allocation8 + $0x810] ss:$24 sps:$4 sm:$0xff]  }
 0x370   :  { %5763 = vmatpush1.bf16.msra.mxu1 %v11076_v53  ;;  %5886 = vmatpush1.bf16.msra.mxu0 %v11079_v54  ;;  %v11151_v53 = vld [vmem:[#allocation8 + $0x818] ss:$24 sps:$4 sm:$0xff]   ;;  %v11156_v54 = vld [vmem:[#allocation8 + $0x844] ss:$24 sps:$4 sm:$0xff]  }
 0x371   :  { %5773 = vmatprep.subr.bf16.mxu1 %v11084_v55  ;;  %5896 = vmatprep.subr.bf16.mxu0 %v11087_v56  ;;  %v11159_v55 = vld [vmem:[#allocation8 + $0x84c] ss:$24 sps:$4 sm:$0xff]   ;;  %v11154_v56 = vld [vmem:[#allocation8 + $0x840] ss:$24 sps:$4 sm:$0xff]  }
 0x373   :  { %5765 = vmatmul.mubr.bf16.vlgmr.msra.gmra.mrb[12].mxu1 %v12504_v57  ;;  %5888 = vmatmul.mubr.bf16.vlgmr.msra.gmra.mrb[12].mxu0 %v12504_v57 }
 0x374   :  { %5774 = vmatpush1.bf16.msra.mxu1 %v11082_v58  ;;  %5897 = vmatpush1.bf16.msra.mxu0 %v11085_v59  ;;  %v11162_v58 = vld [vmem:[#allocation8 + $0x874] ss:$24 sps:$4 sm:$0xff]  }
 0x375   :  { %5775 = vmatprep.subr.bf16.mxu1 %v11090_v34  ;;  %5898 = vmatprep.subr.bf16.mxu0 %v11093_v60  ;;  %v11165_v59 = vld [vmem:[#allocation8 + $0x87c] ss:$24 sps:$4 sm:$0xff]   ;;  %v11160_v34 = vld [vmem:[#allocation8 + $0x870] ss:$24 sps:$4 sm:$0xff]  }
 0x376   :  { %5805 = vmatprep.mubr.bf16.mxu1 %v12507_v61  ;;  %5928 = vmatprep.mubr.bf16.mxu0 %v12507_v61  ;;  %v11163_v60 = vld [vmem:[#allocation8 + $0x878] ss:$24 sps:$4 sm:$0xff]  }
 0x378   :  { %5776 = vmatpush1.bf16.msra.mxu1 %v11088_v62  ;;  %5899 = vmatpush1.bf16.msra.mxu0 %v11091_v42  ;;  %v11168_v62 = vld [vmem:[#allocation8 + $0x8a4] ss:$24 sps:$4 sm:$0xff]  }
 0x379   :  { %5777 = vmatprep.subr.bf16.mxu1 %v11096_v63  ;;  %5900 = vmatprep.subr.bf16.mxu0 %v11099_v43  ;;  %v11171_v42 = vld [vmem:[#allocation8 + $0x8ac] ss:$24 sps:$4 sm:$0xff]   ;;  %v11166_v63 = vld [vmem:[#allocation8 + $0x8a0] ss:$24 sps:$4 sm:$0xff]  }
 0x37a   :  { %v11169_v43 = vld [vmem:[#allocation8 + $0x8a8] ss:$24 sps:$4 sm:$0xff]  }
 0x37c   :  { %5778 = vmatpush1.bf16.msra.mxu1 %v11094_v0  ;;  %5901 = vmatpush1.bf16.msra.mxu0 %v11097_v1  ;;  %v11174_v0 = vld [vmem:[#allocation8 + $0x8d4] ss:$24 sps:$4 sm:$0xff]  }
 0x37d   :  { %5779 = vmatprep.subr.bf16.mxu1 %v11102_v2  ;;  %5902 = vmatprep.subr.bf16.mxu0 %v11105_v44  ;;  %v11177_v1 = vld [vmem:[#allocation8 + $0x8dc] ss:$24 sps:$4 sm:$0xff]   ;;  %v11172_v2 = vld [vmem:[#allocation8 + $0x8d0] ss:$24 sps:$4 sm:$0xff]  }
 0x37e   :  { %v11175_v44 = vld [vmem:[#allocation8 + $0x8d8] ss:$24 sps:$4 sm:$0xff]  }
 0x380   :  { %5780 = vmatpush1.bf16.msra.mxu1 %v11100_v47  ;;  %5903 = vmatpush1.bf16.msra.mxu0 %v11103_v3  ;;  %v11181_v47 = vld [vmem:[#allocation8 + $0x14] ss:$24 sps:$4 sm:$0xff]   ;;  %v12515_v3 = vrot.slane %v12498_v52, %v12468_v8  ;;  %v11190_v52 = vld [vmem:[#allocation8 + $0xa4] ss:$24 sps:$4 sm:$0xff]  }
 0x381   :  { %5781 = vmatprep.subr.bf16.mxu1 %v11108_v5  ;;  %5904 = vmatprep.subr.bf16.mxu0 %v11111_v9  ;;  %v11179_v5 = vld [vmem:[#allocation8 + $0x10] ss:$24 sps:$4 sm:$0xff]   ;;  %v11184_v9 = vld [vmem:[#allocation8 + $0x44] ss:$24 sps:$4 sm:$0xff]  }
 0x384   :  { %5782 = vmatpush1.bf16.msra.mxu1 %v11106_v10  ;;  %5905 = vmatpush1.bf16.msra.mxu0 %v11109_v11  ;;  %v11182_v10 = vld [vmem:[#allocation8 + $0x40] ss:$24 sps:$4 sm:$0xff]   ;;  %v11187_v11 = vld [vmem:[#allocation8 + $0x74] ss:$24 sps:$4 sm:$0xff]  }
 0x385   :  { %5783 = vmatprep.subr.bf16.mxu1 %v11114_v14  ;;  %5906 = vmatprep.subr.bf16.mxu0 %v11117_v16  ;;  %v11185_v14 = vld [vmem:[#allocation8 + $0x70] ss:$24 sps:$4 sm:$0xff]   ;;  %v11188_v16 = vld [vmem:[#allocation8 + $0xa0] ss:$24 sps:$4 sm:$0xff]  }
 0x388   :  { %5784 = vmatpush1.bf16.msra.mxu1 %v11112_v17  ;;  %5907 = vmatpush1.bf16.msra.mxu0 %v11115_v30  ;;  %v11193_v17 = vld [vmem:[#allocation8 + $0xd4] ss:$24 sps:$4 sm:$0xff]   ;;  %v11191_v30 = vld [vmem:[#allocation8 + $0xd0] ss:$24 sps:$4 sm:$0xff]  }
 0x389   :  { %5785 = vmatprep.subr.bf16.mxu1 %v11120_v18  ;;  %5908 = vmatprep.subr.bf16.mxu0 %v11123_v19  ;;  %v2608_v18 = vld [vmem:[#allocation13] sm:$0xf] }
 0x38a   :  { %v11196_v19 = vld [vmem:[#allocation8 + $0x104] ss:$24 sps:$4 sm:$0xff]  }
 0x38c   :  { %5786 = vmatpush1.bf16.msra.mxu1 %v11118_v20  ;;  %5909 = vmatpush1.bf16.msra.mxu0 %v11121_v21  ;;  %v2613_v20 = vrot.slane %v2608_v18, %v12427_v33  ;;  %v2621_v21 = vrot.slane %v2608_v18, %v12446_v31 }
 0x38d   :  { %5787 = vmatprep.subr.bf16.mxu1 %v11126_v22  ;;  %5910 = vmatprep.subr.bf16.mxu0 %v11129_v23  ;;  %v2617_v22 = vrot.slane %v2608_v18, %v12430_v35  ;;  %v2625_v23 = vrot.slane %v2608_v18, %v12449_v32  ;;  %v11221_v18 = vld [vmem:[#allocation8 + $0x2b0] ss:$24 sps:$4 sm:$0xff]  }
 0x390   :  { %5788 = vmatpush1.bf16.msra.mxu1 %v11124_v24  ;;  %5911 = vmatpush1.bf16.msra.mxu0 %v11127_v25  ;;  %v11199_v24 = vld [vmem:[#allocation8 + $0x134] ss:$24 sps:$4 sm:$0xff]  }
 0x391   :  { %5789 = vmatprep.subr.bf16.mxu1 %v11132_v27  ;;  %5912 = vmatprep.subr.bf16.mxu0 %v11135_v29 }
 0x394   :  { %5790 = vmatpush1.bf16.msra.mxu1 %v11130_v50  ;;  %5913 = vmatpush1.bf16.msra.mxu0 %v11133_v4 }
 0x395   :  { %5791 = vmatprep.subr.bf16.mxu1 %v11138_v7  ;;  %5914 = vmatprep.subr.bf16.mxu0 %v11141_v13 }
 0x398   :  { %5792 = vmatpush1.bf16.msra.mxu1 %v11136_v12  ;;  %5915 = vmatpush1.bf16.msra.mxu0 %v11139_v38 }
 0x399   :  { %5793 = vmatprep.subr.bf16.mxu1 %v11144_v39  ;;  %5916 = vmatprep.subr.bf16.mxu0 %v11147_v40  ;;  %v11197_v39 = vld [vmem:[#allocation8 + $0x130] ss:$24 sps:$4 sm:$0xff]  }
 0x39c   :  { %5794 = vmatpush1.bf16.msra.mxu1 %v11142_v41  ;;  %5917 = vmatpush1.bf16.msra.mxu0 %v11145_v15 }
 0x39d   :  { %5795 = vmatprep.subr.bf16.mxu1 %v11150_v46  ;;  %5918 = vmatprep.subr.bf16.mxu0 %v11153_v48  ;;  %v11202_v48 = vld [vmem:[#allocation8 + $0x164] ss:$24 sps:$4 sm:$0xff]  }
 0x3a0   :  { %5796 = vmatpush1.bf16.msra.mxu1 %v11148_v51  ;;  %5919 = vmatpush1.bf16.msra.mxu0 %v11151_v53 }
 0x3a1   :  { %5797 = vmatprep.subr.bf16.mxu1 %v11156_v54  ;;  %5920 = vmatprep.subr.bf16.mxu0 %v11159_v55 }
 0x3a4   :  { %5798 = vmatpush1.bf16.msra.mxu1 %v11154_v56  ;;  %5921 = vmatpush1.bf16.msra.mxu0 %v11157_v6 }
 0x3a5   :  { %5799 = vmatprep.subr.bf16.mxu1 %v11162_v58  ;;  %5922 = vmatprep.subr.bf16.mxu0 %v11165_v59  ;;  %v11200_v58 = vld [vmem:[#allocation8 + $0x160] ss:$24 sps:$4 sm:$0xff]   ;;  %v11205_v59 = vld [vmem:[#allocation8 + $0x194] ss:$24 sps:$4 sm:$0xff]  }
 0x3a8   :  { %5800 = vmatpush1.bf16.msra.mxu1 %v11160_v34  ;;  %5923 = vmatpush1.bf16.msra.mxu0 %v11163_v60  ;;  %v11203_v34 = vld [vmem:[#allocation8 + $0x190] ss:$24 sps:$4 sm:$0xff]   ;;  %v11208_v60 = vld [vmem:[#allocation8 + $0x1c4] ss:$24 sps:$4 sm:$0xff]  }
 0x3a9   :  { %5801 = vmatprep.subr.bf16.mxu1 %v11168_v62  ;;  %5924 = vmatprep.subr.bf16.mxu0 %v11171_v42  ;;  %v11206_v62 = vld [vmem:[#allocation8 + $0x1c0] ss:$24 sps:$4 sm:$0xff]   ;;  %v11211_v42 = vld [vmem:[#allocation8 + $0x1f4] ss:$24 sps:$4 sm:$0xff]  }
 0x3ac   :  { %5802 = vmatpush1.bf16.msra.mxu1 %v11166_v63  ;;  %5925 = vmatpush1.bf16.msra.mxu0 %v11169_v43  ;;  %v11209_v63 = vld [vmem:[#allocation8 + $0x1f0] ss:$24 sps:$4 sm:$0xff]  }
 0x3ad   :  { %5803 = vmatprep.subr.bf16.mxu1 %v11174_v0  ;;  %5926 = vmatprep.subr.bf16.mxu0 %v11177_v1  ;;  %v11305_v43 = vld [vmem:[#allocation14] ss:$24 sps:$4 sm:$0xff]   ;;  %v11307_v0 = vld [vmem:[#allocation14 + $0x4] ss:$24 sps:$4 sm:$0xff]  }
 0x3ae   :  { %v11214_v1 = vld [vmem:[#allocation8 + $0x224] ss:$24 sps:$4 sm:$0xff]  }
 0x3b0   :  { %5804 = vmatpush1.bf16.msra.mxu1 %v11172_v2  ;;  %5927 = vmatpush1.bf16.msra.mxu0 %v11175_v44  ;;  %v11212_v2 = vld [vmem:[#allocation8 + $0x220] ss:$24 sps:$4 sm:$0xff]  }
 0x3b1   :  { %5937 = vmatprep.subr.bf16.mxu1 %v11181_v47  ;;  %7902 = vmatprep.subr.bf16.mxu0 %v11307_v0  ;;  %v11311_v44 = vld [vmem:[#allocation14 + $0x30] ss:$24 sps:$4 sm:$0xff]   ;;  %v11313_v47 = vld [vmem:[#allocation14 + $0x34] ss:$24 sps:$4 sm:$0xff]  }
 0x3b2   :  { %v11251_v0 = vld [vmem:[#allocation8 + $0x490] ss:$24 sps:$4 sm:$0xff]  }
 0x3b3   :  { %5806 = vmatmul.mubr.bf16.vlgmr.msra.gmra.mrb[12].mxu1 %v12515_v3  ;;  %5929 = vmatmul.mubr.bf16.vlgmr.msra.gmra.mrb[12].mxu0 %v12515_v3 }
 0x3b4   :  { %5938 = vmatpush1.bf16.msra.mxu1 %v11179_v5  ;;  %5969 = vmatprep.mubr.bf16.mxu1 %v12479_v28  ;;  %v11194_v28 = vld [vmem:[#allocation8 + $0x100] ss:$24 sps:$4 sm:$0xff]   ;;  %v11217_v5 = vld [vmem:[#allocation8 + $0x254] ss:$24 sps:$4 sm:$0xff]  }
 0x3b5   :  { %5939 = vmatprep.subr.bf16.mxu1 %v11184_v9  ;;  %7903 = vmatpush1.bf16.msra.mxu0 %v11305_v43  ;;  %v11215_v9 = vld [vmem:[#allocation8 + $0x250] ss:$24 sps:$4 sm:$0xff]  }
 0x3b6   :  { %7904 = vmatprep.subr.bf16.mxu0 %v11313_v47  ;;  %v11383_v43 = vld [vmem:[#allocation14 + $0x270] ss:$24 sps:$4 sm:$0xff]  }
 0x3b7   :  { %v11254_v47 = vld [vmem:[#allocation8 + $0x4c0] ss:$24 sps:$4 sm:$0xff]  }
 0x3b8   :  { %5940 = vmatpush1.bf16.msra.mxu1 %v11182_v10  ;;  %v11317_v10 = vld [vmem:[#allocation14 + $0x60] ss:$24 sps:$4 sm:$0xff]  }
 0x3b9   :  { %5941 = vmatprep.subr.bf16.mxu1 %v11187_v11  ;;  %7905 = vmatpush1.bf16.msra.mxu0 %v11311_v44  ;;  %v11319_v11 = vld [vmem:[#allocation14 + $0x64] ss:$24 sps:$4 sm:$0xff]   ;;  %v11389_v44 = vld [vmem:[#allocation14 + $0x2a0] ss:$24 sps:$4 sm:$0xff]  }
 0x3ba   :  { %7906 = vmatprep.subr.bf16.mxu0 %v11319_v11  ;;  %v11257_v11 = vld [vmem:[#allocation8 + $0x4f0] ss:$24 sps:$4 sm:$0xff]  }
 0x3bc   :  { %5942 = vmatpush1.bf16.msra.mxu1 %v11185_v14  ;;  %v11220_v14 = vld [vmem:[#allocation8 + $0x284] ss:$24 sps:$4 sm:$0xff]  }
 0x3bd   :  { %5943 = vmatprep.subr.bf16.mxu1 %v11190_v52  ;;  %7907 = vmatpush1.bf16.msra.mxu0 %v11317_v10  ;;  %v11218_v52 = vld [vmem:[#allocation8 + $0x280] ss:$24 sps:$4 sm:$0xff]  }
 0x3be   :  { %v11395_v10 = vld [vmem:[#allocation14 + $0x2d0] ss:$24 sps:$4 sm:$0xff]  }
 0x3c0   :  { %5944 = vmatpush1.bf16.msra.mxu1 %v11188_v16  ;;  %v11323_v16 = vld [vmem:[#allocation14 + $0x90] ss:$24 sps:$4 sm:$0xff]  }
 0x3c1   :  { %5945 = vmatprep.subr.bf16.mxu1 %v11193_v17  ;;  %v11325_v17 = vld [vmem:[#allocation14 + $0x94] ss:$24 sps:$4 sm:$0xff]  }
 0x3c2   :  { %7908 = vmatprep.subr.bf16.mxu0 %v11325_v17  ;;  %v11265_v17 = vld [vmem:[#allocation8 + $0x554] ss:$24 sps:$4 sm:$0xff]  }
 0x3c3   :  { %7909 = vmatpush1.bf16.msra.mxu0 %v11323_v16  ;;  %v11260_v16 = vld [vmem:[#allocation8 + $0x520] ss:$24 sps:$4 sm:$0xff]  }
 0x3c4   :  { %5946 = vmatpush1.bf16.msra.mxu1 %v11191_v30  ;;  %v11223_v30 = vld [vmem:[#allocation8 + $0x2b4] ss:$24 sps:$4 sm:$0xff]  }
 0x3c5   :  { %5947 = vmatprep.subr.bf16.mxu1 %v11196_v19  ;;  %v11329_v19 = vld [vmem:[#allocation14 + $0xc0] ss:$24 sps:$4 sm:$0xff]  }
 0x3c6   :  { %v3710_v25 = vpop.f32.mrb[8].mxu1  ;;  %v3839_v26 = vpop.f32.mrb[8].mxu0 }
 0x3c7   :  { %v10033_v27 = vadd.f32 %v3710_v25, %v2613_v20  ;;  %v10037_v29 = vadd.f32 %v3839_v26, %v2621_v21  ;;  %v3712_v50 = vpop.f32.mrb[9].mxu1  ;;  %v3841_v4 = vpop.f32.mrb[9].mxu0  ;;  %v11227_v25 = vld [vmem:[#allocation8 + $0x310] ss:$24 sps:$4 sm:$0xff]  }
 0x3c8   :  { %v10034_v7 = vadd.f32 %v3712_v50, %v2617_v22  ;;  %v10038_v13 = vadd.f32 %v3841_v4, %v2625_v23  ;;  %5948 = vmatpush1.bf16.msra.mxu1 %v11194_v28  ;;  %v3714_v12 = vpop.f32.mrb[10].mxu1  ;;  %v3843_v38 = vpop.f32.mrb[10].mxu0  ;;  %v11224_v28 = vld [vmem:[#allocation8 + $0x2e0] ss:$24 sps:$4 sm:$0xff]  }
 0x3c9   :  { %v10035_v40 = vadd.f32 %v3714_v12, %v2613_v20  ;;  %v10039_v41 = vadd.f32 %v3843_v38, %v2621_v21  ;;  %v3716_v15 = vpop.f32.mrb[11].mxu1  ;;  %v3845_v46 = vpop.f32.mrb[11].mxu0  ;;  %5949 = vmatprep.subr.bf16.mxu1 %v11199_v24  ;;  %v11331_v20 = vld [vmem:[#allocation14 + $0xc4] ss:$24 sps:$4 sm:$0xff]   ;;  %v11341_v26 = vld [vmem:[#allocation14 + $0x120] ss:$24 sps:$4 sm:$0xff]  }
 0x3ca   :  { %v9947_v51 = vpack.c.bf16 %v10034_v7, %v10033_v27  ;;  %v9948_v53 = vpack.c.bf16 %v10038_v13, %v10037_v29  ;;  %v10036_v54 = vadd.f32 %v3716_v15, %v2617_v22  ;;  %v10040_v55 = vadd.f32 %v3845_v46, %v2625_v23  ;;  %v11226_v21 = vld [vmem:[#allocation8 + $0x2e4] ss:$24 sps:$4 sm:$0xff]   ;;  %7910 = vmatprep.subr.bf16.mxu0 %v11331_v20  ;;  %v11229_v24 = vld [vmem:[#allocation8 + $0x314] ss:$24 sps:$4 sm:$0xff]   ;;  %v11230_v50 = vld [vmem:[#allocation8 + $0x340] ss:$24 sps:$4 sm:$0xff]  }
 0x3cb   :  { %7911 = vmatpush1.bf16.msra.mxu0 %v11329_v19  ;;  %v11335_v22 = vld [vmem:[#allocation14 + $0xf0] ss:$24 sps:$4 sm:$0xff]   ;;  %v11337_v23 = vld [vmem:[#allocation14 + $0xf4] ss:$24 sps:$4 sm:$0xff]   ;;  %v11343_v27 = vld [vmem:[#allocation14 + $0x124] ss:$24 sps:$4 sm:$0xff]  }
 0x3cc   :  { %3872 = vst [vmem:[#allocation20] sm:$0xff] %v9947_v51  ;;  %3873 = vst [vmem:[#allocation20 + $0x8] sm:$0xff] %v9948_v53  ;;  %v9949_v56 = vpack.c.bf16 %v10036_v54, %v10035_v40  ;;  %v9950_v6 = vpack.c.bf16 %v10040_v55, %v10039_v41  ;;  %5950 = vmatpush1.bf16.msra.mxu1 %v11197_v39  ;;  %7912 = vmatprep.subr.bf16.mxu0 %v11337_v23  ;;  %v11232_v29 = vld [vmem:[#allocation8 + $0x344] ss:$24 sps:$4 sm:$0xff]   ;;  %v11235_v13 = vld [vmem:[#allocation8 + $0x374] ss:$24 sps:$4 sm:$0xff]  }
 0x3cd   :  { %5951 = vmatprep.subr.bf16.mxu1 %v11202_v48  ;;  %v11347_v4 = vld [vmem:[#allocation14 + $0x150] ss:$24 sps:$4 sm:$0xff]   ;;  %v11349_v7 = vld [vmem:[#allocation14 + $0x154] ss:$24 sps:$4 sm:$0xff]   ;;  %v11353_v38 = vld [vmem:[#allocation14 + $0x180] ss:$24 sps:$4 sm:$0xff]  }
 0x3ce   :  { %3874 = vst [vmem:[#allocation20 + $0x10] sm:$0xff] %v9949_v56  ;;  %3875 = vst [vmem:[#allocation20 + $0x18] sm:$0xff] %v9950_v6  ;;  %v11233_v12 = vld [vmem:[#allocation8 + $0x370] ss:$24 sps:$4 sm:$0xff]   ;;  %v11238_v40 = vld [vmem:[#allocation8 + $0x3a4] ss:$24 sps:$4 sm:$0xff]  }
 0x3cf   :  { %7913 = vmatpush1.bf16.msra.mxu0 %v11335_v22  ;;  %v11355_v39 = vld [vmem:[#allocation14 + $0x184] ss:$24 sps:$4 sm:$0xff]   ;;  %v11359_v41 = vld [vmem:[#allocation14 + $0x1b0] ss:$24 sps:$4 sm:$0xff]   ;;  %v11361_v15 = vld [vmem:[#allocation14 + $0x1b4] ss:$24 sps:$4 sm:$0xff]  }
 0x3d0   :  { %5952 = vmatpush1.bf16.msra.mxu1 %v11200_v58  ;;  %7914 = vmatprep.subr.bf16.mxu0 %v11343_v27  ;;  %v11239_v46 = vld [vmem:[#allocation8 + $0x3d0] ss:$24 sps:$4 sm:$0xff]   ;;  %v11244_v53 = vld [vmem:[#allocation8 + $0x404] ss:$24 sps:$4 sm:$0xff]   ;;  %v11242_v54 = vld [vmem:[#allocation8 + $0x400] ss:$24 sps:$4 sm:$0xff]  }
 0x3d1   :  { %5953 = vmatprep.subr.bf16.mxu1 %v11205_v59  ;;  %v11365_v48 = vld [vmem:[#allocation14 + $0x1e0] ss:$24 sps:$4 sm:$0xff]   ;;  %v11367_v51 = vld [vmem:[#allocation14 + $0x1e4] ss:$24 sps:$4 sm:$0xff]   ;;  %v11373_v55 = vld [vmem:[#allocation14 + $0x214] ss:$24 sps:$4 sm:$0xff]  }
 0x3d2   :  { %v11247_v56 = vld [vmem:[#allocation8 + $0x434] ss:$24 sps:$4 sm:$0xff]   ;;  %v11245_v58 = vld [vmem:[#allocation8 + $0x430] ss:$24 sps:$4 sm:$0xff]   ;;  %v11250_v59 = vld [vmem:[#allocation8 + $0x464] ss:$24 sps:$4 sm:$0xff]  }
 0x3d3   :  { %7915 = vmatpush1.bf16.msra.mxu0 %v11341_v26  ;;  %v11371_v6 = vld [vmem:[#allocation14 + $0x210] ss:$24 sps:$4 sm:$0xff]  }
 0x3d4   :  { %5954 = vmatpush1.bf16.msra.mxu1 %v11203_v34  ;;  %7916 = vmatprep.subr.bf16.mxu0 %v11349_v7  ;;  %v11379_v34 = vld [vmem:[#allocation14 + $0x244] ss:$24 sps:$4 sm:$0xff]   ;;  %v11266_v19 = vld [vmem:[#allocation8 + $0x580] ss:$24 sps:$4 sm:$0xff]  }
 0x3d5   :  { %5955 = vmatprep.subr.bf16.mxu1 %v11208_v60  ;;  %v11377_v60 = vld [vmem:[#allocation14 + $0x240] ss:$24 sps:$4 sm:$0xff]  }
 0x3d6   :  { %v11271_v20 = vld [vmem:[#allocation8 + $0x5b4] ss:$24 sps:$4 sm:$0xff]   ;;  %v11272_v22 = vld [vmem:[#allocation8 + $0x5e0] ss:$24 sps:$4 sm:$0xff]  }
 0x3d7   :  { %7917 = vmatpush1.bf16.msra.mxu0 %v11347_v4  ;;  %v11277_v23 = vld [vmem:[#allocation8 + $0x614] ss:$24 sps:$4 sm:$0xff]   ;;  %v11278_v26 = vld [vmem:[#allocation8 + $0x640] ss:$24 sps:$4 sm:$0xff]  }
 0x3d8   :  { %5956 = vmatpush1.bf16.msra.mxu1 %v11206_v62  ;;  %7918 = vmatprep.subr.bf16.mxu0 %v11355_v39  ;;  %v11248_v62 = vld [vmem:[#allocation8 + $0x460] ss:$24 sps:$4 sm:$0xff]   ;;  %v11283_v27 = vld [vmem:[#allocation8 + $0x674] ss:$24 sps:$4 sm:$0xff]   ;;  %v11298_v39 = vld [vmem:[#allocation8 + $0x764] ss:$24 sps:$4 sm:$0xff]  }
 0x3d9   :  { %5957 = vmatprep.subr.bf16.mxu1 %v11211_v42  ;;  %v11253_v42 = vld [vmem:[#allocation8 + $0x494] ss:$24 sps:$4 sm:$0xff]   ;;  %v11284_v4 = vld [vmem:[#allocation8 + $0x6a0] ss:$24 sps:$4 sm:$0xff]  }
 0x3da   :  { %v11289_v7 = vld [vmem:[#allocation8 + $0x6d4] ss:$24 sps:$4 sm:$0xff]  }
 0x3db   :  { %7919 = vmatpush1.bf16.msra.mxu0 %v11353_v38  ;;  %v11295_v38 = vld [vmem:[#allocation8 + $0x734] ss:$24 sps:$4 sm:$0xff]  }
 0x3dc   :  { %5958 = vmatpush1.bf16.msra.mxu1 %v11209_v63  ;;  %7920 = vmatprep.subr.bf16.mxu0 %v11361_v15  ;;  %v11385_v63 = vld [vmem:[#allocation14 + $0x274] ss:$24 sps:$4 sm:$0xff]  }
 0x3dd   :  { %5959 = vmatprep.subr.bf16.mxu1 %v11214_v1  ;;  %v11256_v1 = vld [vmem:[#allocation8 + $0x4c4] ss:$24 sps:$4 sm:$0xff]  }
 0x3de   :  { %v11304_v15 = vld [vmem:[#allocation8 + $0x7c4] ss:$24 sps:$4 sm:$0xff]  }
 0x3df   :  { %7921 = vmatpush1.bf16.msra.mxu0 %v11359_v41  ;;  %v11299_v41 = vld [vmem:[#allocation8 + $0x790] ss:$24 sps:$4 sm:$0xff]  }
 0x3e0   :  { %5960 = vmatpush1.bf16.msra.mxu1 %v11212_v2  ;;  %7922 = vmatprep.subr.bf16.mxu0 %v11367_v51  ;;  %v11391_v2 = vld [vmem:[#allocation14 + $0x2a4] ss:$24 sps:$4 sm:$0xff]  }
 0x3e1   :  { %5961 = vmatprep.subr.bf16.mxu1 %v11217_v5  ;;  %v11259_v5 = vld [vmem:[#allocation8 + $0x4f4] ss:$24 sps:$4 sm:$0xff]   ;;  %v11316_v51 = vld [vmem:[#allocation8 + $0x824] ss:$24 sps:$4 sm:$0xff]  }
 0x3e3   :  { %7923 = vmatpush1.bf16.msra.mxu0 %v11365_v48  ;;  %v11308_v48 = vld [vmem:[#allocation8 + $0x7f0] ss:$24 sps:$4 sm:$0xff]  }
 0x3e4   :  { %5962 = vmatpush1.bf16.msra.mxu1 %v11215_v9  ;;  %7924 = vmatprep.subr.bf16.mxu0 %v11373_v55  ;;  %v11397_v9 = vld [vmem:[#allocation14 + $0x2d4] ss:$24 sps:$4 sm:$0xff]   ;;  %v11320_v55 = vld [vmem:[#allocation8 + $0x850] ss:$24 sps:$4 sm:$0xff]  }
 0x3e5   :  { %5963 = vmatprep.subr.bf16.mxu1 %v11220_v14  ;;  %v11262_v14 = vld [vmem:[#allocation8 + $0x524] ss:$24 sps:$4 sm:$0xff]  }
 0x3e7   :  { %7925 = vmatpush1.bf16.msra.mxu0 %v11371_v6  ;;  %v11326_v6 = vld [vmem:[#allocation8 + $0x880] ss:$24 sps:$4 sm:$0xff]  }
 0x3e8   :  { %5964 = vmatpush1.bf16.msra.mxu1 %v11218_v52  ;;  %7926 = vmatprep.subr.bf16.mxu0 %v11379_v34  ;;  %v11403_v52 = vld [vmem:[#allocation14 + $0x304] ss:$24 sps:$4 sm:$0xff]  }
 0x3e9   :  { %5965 = vmatprep.subr.bf16.mxu1 %v11223_v30  ;;  %v11263_v30 = vld [vmem:[#allocation8 + $0x550] ss:$24 sps:$4 sm:$0xff]   ;;  %v11340_v34 = vld [vmem:[#allocation8 + $0x8e4] ss:$24 sps:$4 sm:$0xff]  }
 0x3eb   :  { %7927 = vmatpush1.bf16.msra.mxu0 %v11377_v60  ;;  %v11338_v60 = vld [vmem:[#allocation8 + $0x8e0] ss:$24 sps:$4 sm:$0xff]  }
 0x3ec   :  { %5966 = vmatpush1.bf16.msra.mxu1 %v11221_v18  ;;  %7928 = vmatprep.subr.bf16.mxu0 %v11385_v63  ;;  %v11268_v18 = vld [vmem:[#allocation8 + $0x584] ss:$24 sps:$4 sm:$0xff]  }
 0x3ed   :  { %5967 = vmatprep.subr.bf16.mxu1 %v11226_v21  ;;  %v11269_v21 = vld [vmem:[#allocation8 + $0x5b0] ss:$24 sps:$4 sm:$0xff]  }
 0x3ee   :  { %v11352_v63 = vld [vmem:[#allocation14 + $0x3c] ss:$24 sps:$4 sm:$0xff]  }
 0x3ef   :  { %7929 = vmatpush1.bf16.msra.mxu0 %v11383_v43  ;;  %v11350_v43 = vld [vmem:[#allocation14 + $0x38] ss:$24 sps:$4 sm:$0xff]  }
 0x3f0   :  { %5968 = vmatpush1.bf16.msra.mxu1 %v11224_v28  ;;  %7930 = vmatprep.subr.bf16.mxu0 %v11391_v2  ;;  %v11274_v28 = vld [vmem:[#allocation8 + $0x5e4] ss:$24 sps:$4 sm:$0xff]  }
 0x3f1   :  { %5978 = vmatprep.subr.bf16.mxu1 %v11229_v24  ;;  %v11275_v24 = vld [vmem:[#allocation8 + $0x610] ss:$24 sps:$4 sm:$0xff]  }
 0x3f2   :  { %v11364_v2 = vld [vmem:[#allocation14 + $0x9c] ss:$24 sps:$4 sm:$0xff]  }
 0x3f3   :  { %5970 = vmatmul.mubr.bf16.vlgmr.msra.gmra.mrb[16].mxu1 %v12485_v36  ;;  %v11236_v36 = vld [vmem:[#allocation8 + $0x3a0] ss:$24 sps:$4 sm:$0xff]   ;;  %7931 = vmatpush1.bf16.msra.mxu0 %v11389_v44 }
 0x3f4   :  { %5979 = vmatpush1.bf16.msra.mxu1 %v11227_v25  ;;  %6010 = vmatprep.mubr.bf16.mxu1 %v12489_v45  ;;  %v11241_v45 = vld [vmem:[#allocation8 + $0x3d4] ss:$24 sps:$4 sm:$0xff]   ;;  %v11280_v25 = vld [vmem:[#allocation8 + $0x644] ss:$24 sps:$4 sm:$0xff]  }
 0x3f5   :  { %5980 = vmatprep.subr.bf16.mxu1 %v11232_v29  ;;  %7932 = vmatprep.subr.bf16.mxu0 %v11397_v9  ;;  %v11281_v29 = vld [vmem:[#allocation8 + $0x670] ss:$24 sps:$4 sm:$0xff]   ;;  %v11362_v44 = vld [vmem:[#allocation14 + $0x98] ss:$24 sps:$4 sm:$0xff]  }
 0x3f6   :  { %v12529_v9 = vld [vmem:[#allocation10] sm:$0x3f] }
 0x3f7   :  { %7933 = vmatpush1.bf16.msra.mxu0 %v11395_v10  ;;  %v11376_v10 = vld [vmem:[#allocation14 + $0xfc] ss:$24 sps:$4 sm:$0xff]  }
 0x3f8   :  { %5981 = vmatpush1.bf16.msra.mxu1 %v11230_v50  ;;  %7943 = vmatprep.subr.bf16.mxu0 %v11403_v52  ;;  %v11286_v50 = vld [vmem:[#allocation8 + $0x6a4] ss:$24 sps:$4 sm:$0xff]  }
 0x3f9   :  { %5982 = vmatprep.subr.bf16.mxu1 %v11235_v13  ;;  %v11287_v13 = vld [vmem:[#allocation8 + $0x6d0] ss:$24 sps:$4 sm:$0xff]   ;;  %v11374_v52 = vld [vmem:[#allocation14 + $0xf8] ss:$24 sps:$4 sm:$0xff]  }
 0x3fc   :  { %5983 = vmatpush1.bf16.msra.mxu1 %v11233_v12  ;;  %v11292_v12 = vld [vmem:[#allocation8 + $0x704] ss:$24 sps:$4 sm:$0xff]  }
 0x3fd   :  { %5984 = vmatprep.subr.bf16.mxu1 %v11238_v40  ;;  %v11296_v40 = vld [vmem:[#allocation8 + $0x760] ss:$24 sps:$4 sm:$0xff]  }
 0x400   :  { %5985 = vmatpush1.bf16.msra.mxu1 %v11236_v36  ;;  %v11301_v36 = vld [vmem:[#allocation8 + $0x794] ss:$24 sps:$4 sm:$0xff]  }
 0x401   :  { %5986 = vmatprep.subr.bf16.mxu1 %v11241_v45  ;;  %v11302_v45 = vld [vmem:[#allocation8 + $0x7c0] ss:$24 sps:$4 sm:$0xff]  }
 0x404   :  { %5987 = vmatpush1.bf16.msra.mxu1 %v11239_v46  ;;  %v11310_v46 = vld [vmem:[#allocation8 + $0x7f4] ss:$24 sps:$4 sm:$0xff]  }
 0x405   :  { %5988 = vmatprep.subr.bf16.mxu1 %v11244_v53  ;;  %v11314_v53 = vld [vmem:[#allocation8 + $0x820] ss:$24 sps:$4 sm:$0xff]  }
 0x408   :  { %5989 = vmatpush1.bf16.msra.mxu1 %v11242_v54  ;;  %v11322_v54 = vld [vmem:[#allocation8 + $0x854] ss:$24 sps:$4 sm:$0xff]  }
 0x409   :  { %5990 = vmatprep.subr.bf16.mxu1 %v11247_v56  ;;  %v11328_v56 = vld [vmem:[#allocation8 + $0x884] ss:$24 sps:$4 sm:$0xff]  }
 0x40c   :  { %5991 = vmatpush1.bf16.msra.mxu1 %v11245_v58  ;;  %v11334_v58 = vld [vmem:[#allocation8 + $0x8b4] ss:$24 sps:$4 sm:$0xff]  }
 0x40d   :  { %5992 = vmatprep.subr.bf16.mxu1 %v11250_v59  ;;  %v11332_v59 = vld [vmem:[#allocation8 + $0x8b0] ss:$24 sps:$4 sm:$0xff]  }
 0x410   :  { %5993 = vmatpush1.bf16.msra.mxu1 %v11248_v62  ;;  %v11346_v62 = vld [vmem:[#allocation14 + $0xc] ss:$24 sps:$4 sm:$0xff]  }
 0x411   :  { %5994 = vmatprep.subr.bf16.mxu1 %v11253_v42  ;;  %v11344_v42 = vld [vmem:[#allocation14 + $0x8] ss:$24 sps:$4 sm:$0xff]  }
 0x414   :  { %5995 = vmatpush1.bf16.msra.mxu1 %v11251_v0  ;;  %v11358_v0 = vld [vmem:[#allocation14 + $0x6c] ss:$24 sps:$4 sm:$0xff]  }
 0x415   :  { %5996 = vmatprep.subr.bf16.mxu1 %v11256_v1  ;;  %v11356_v1 = vld [vmem:[#allocation14 + $0x68] ss:$24 sps:$4 sm:$0xff]  }
 0x418   :  { %5997 = vmatpush1.bf16.msra.mxu1 %v11254_v47  ;;  %v11370_v47 = vld [vmem:[#allocation14 + $0xcc] ss:$24 sps:$4 sm:$0xff]  }
 0x419   :  { %5998 = vmatprep.subr.bf16.mxu1 %v11259_v5  ;;  %v11368_v5 = vld [vmem:[#allocation14 + $0xc8] ss:$24 sps:$4 sm:$0xff]  }
 0x41c   :  { %5999 = vmatpush1.bf16.msra.mxu1 %v11257_v11  ;;  %v4174_v11 = vrot.slane %v12529_v9, %v12430_v35 }
 0x41d   :  { %6000 = vmatprep.subr.bf16.mxu1 %v11262_v14  ;;  %v4182_v14 = vrot.slane %v12529_v9, %v12449_v32 }
 0x420   :  { %6001 = vmatpush1.bf16.msra.mxu1 %v11260_v16  ;;  %v6076_v16 = vpop.permute.xlu1 %6075 }
 0x421   :  { %6002 = vmatprep.subr.bf16.mxu1 %v11265_v17  ;;  %v11382_v17 = vld [vmem:[#allocation14 + $0x12c] ss:$24 sps:$4 sm:$0xff]  }
 0x424   :  { %6003 = vmatpush1.bf16.msra.mxu1 %v11263_v30 }
 0x425   :  { %6004 = vmatprep.subr.bf16.mxu1 %v11268_v18 }
 0x428   :  { %6005 = vmatpush1.bf16.msra.mxu1 %v11266_v19 }
 0x429   :  { %6006 = vmatprep.subr.bf16.mxu1 %v11271_v20 }
 0x42c   :  { %6007 = vmatpush1.bf16.msra.mxu1 %v11269_v21 }
 0x42d   :  { %6008 = vmatprep.subr.bf16.mxu1 %v11274_v28  ;;  %v12540_v28 = vrot.slane %v6076_v16, %v12427_v33  ;;  %v11434_v16 = vld [vmem:[#allocation14 + $0x2d8] ss:$24 sps:$4 sm:$0xff]  }
 0x430   :  { %6009 = vmatpush1.bf16.msra.mxu1 %v11272_v22 }
 0x431   :  { %6019 = vmatprep.subr.bf16.mxu1 %v11277_v23 }
 0x433   :  { %6011 = vmatmul.mubr.bf16.vlgmr.msra.gmra.mrb[16].mxu1 %v12504_v57  ;;  %v11290_v57 = vld [vmem:[#allocation8 + $0x700] ss:$24 sps:$4 sm:$0xff]  }
 0x434   :  { %6020 = vmatpush1.bf16.msra.mxu1 %v11275_v24  ;;  %6051 = vmatprep.mubr.bf16.mxu1 %v12507_v61  ;;  %v11293_v61 = vld [vmem:[#allocation8 + $0x730] ss:$24 sps:$4 sm:$0xff]  }
 0x435   :  { %6021 = vmatprep.subr.bf16.mxu1 %v11280_v25 }
 0x438   :  { %6022 = vmatpush1.bf16.msra.mxu1 %v11278_v26  ;;  %v11380_v26 = vld [vmem:[#allocation14 + $0x128] ss:$24 sps:$4 sm:$0xff]  }
 0x439   :  { %6023 = vmatprep.subr.bf16.mxu1 %v11283_v27 }
 0x43c   :  { %6024 = vmatpush1.bf16.msra.mxu1 %v11281_v29 }
 0x43d   :  { %6025 = vmatprep.subr.bf16.mxu1 %v11286_v50 }
 0x440   :  { %6026 = vmatpush1.bf16.msra.mxu1 %v11284_v4  ;;  %v11388_v4 = vld [vmem:[#allocation14 + $0x15c] ss:$24 sps:$4 sm:$0xff]  }
 0x441   :  { %6027 = vmatprep.subr.bf16.mxu1 %v11289_v7 }
 0x444   :  { %6028 = vmatpush1.bf16.msra.mxu1 %v11287_v13 }
 0x445   :  { %6029 = vmatprep.subr.bf16.mxu1 %v11292_v12  ;;  %v6090_v12 = vrot.slane %v12540_v28, %v12468_v8 }
 0x448   :  { %6030 = vmatpush1.bf16.msra.mxu1 %v11290_v57  ;;  %v11386_v57 = vld [vmem:[#allocation14 + $0x158] ss:$24 sps:$4 sm:$0xff]  }
 0x449   :  { %6031 = vmatprep.subr.bf16.mxu1 %v11295_v38  ;;  %v11394_v38 = vld [vmem:[#allocation14 + $0x18c] ss:$24 sps:$4 sm:$0xff]  }
 0x44c   :  { %6032 = vmatpush1.bf16.msra.mxu1 %v11293_v61  ;;  %v6098_v61 = vcombine.high %v6090_v12, %v6090_v12 }
 0x44d   :  { %6033 = vmatprep.subr.bf16.mxu1 %v11298_v39  ;;  %v11392_v39 = vld [vmem:[#allocation14 + $0x188] ss:$24 sps:$4 sm:$0xff]  }
 0x450   :  { %6034 = vmatpush1.bf16.msra.mxu1 %v11296_v40  ;;  %v11400_v40 = vld [vmem:[#allocation14 + $0x1bc] ss:$24 sps:$4 sm:$0xff]  }
 0x451   :  { %6035 = vmatprep.subr.bf16.mxu1 %v11301_v36  ;;  %v6120_v36 = vrot.slane %v6098_v61, %v12468_v8  ;;  %v4178_v61 = vrot.slane %v12529_v9, %v12446_v31 }
 0x454   :  { %6036 = vmatpush1.bf16.msra.mxu1 %v11299_v41  ;;  %v11398_v41 = vld [vmem:[#allocation14 + $0x1b8] ss:$24 sps:$4 sm:$0xff]  }
 0x455   :  { %6037 = vmatprep.subr.bf16.mxu1 %v11304_v15  ;;  %v11406_v15 = vld [vmem:[#allocation14 + $0x1ec] ss:$24 sps:$4 sm:$0xff]  }
 0x458   :  { %6038 = vmatpush1.bf16.msra.mxu1 %v11302_v45  ;;  %v12546_v45 = vrot.slane %v6090_v12, %v12468_v8  ;;  %v11455_v12 = vld [vmem:[#allocation14 + $0x4b0] ss:$24 sps:$4 sm:$0xff]  }
 0x459   :  { %6039 = vmatprep.subr.bf16.mxu1 %v11310_v46 }
 0x45c   :  { %6040 = vmatpush1.bf16.msra.mxu1 %v11308_v48  ;;  %v6129_v48 = vcombine.high %v6120_v36, %v6120_v36 }
 0x45d   :  { %6041 = vmatprep.subr.bf16.mxu1 %v11316_v51 }
 0x460   :  { %6042 = vmatpush1.bf16.msra.mxu1 %v11314_v53  ;;  %v11404_v53 = vld [vmem:[#allocation14 + $0x1e8] ss:$24 sps:$4 sm:$0xff]  }
 0x461   :  { %6043 = vmatprep.subr.bf16.mxu1 %v11322_v54 }
 0x464   :  { %6044 = vmatpush1.bf16.msra.mxu1 %v11320_v55 }
 0x465   :  { %6045 = vmatprep.subr.bf16.mxu1 %v11328_v56  ;;  %v11401_v56 = vld [vmem:[#allocation14 + $0x300] ss:$24 sps:$4 sm:$0xff]  }
 0x468   :  { %6046 = vmatpush1.bf16.msra.mxu1 %v11326_v6 }
 0x469   :  { %6047 = vmatprep.subr.bf16.mxu1 %v11334_v58  ;;  %v11409_v58 = vld [vmem:[#allocation14 + $0x334] ss:$24 sps:$4 sm:$0xff]  }
 0x46c   :  { %6048 = vmatpush1.bf16.msra.mxu1 %v11332_v59  ;;  %v11412_v59 = vld [vmem:[#allocation14 + $0x21c] ss:$24 sps:$4 sm:$0xff]  }
 0x46d   :  { %6049 = vmatprep.subr.bf16.mxu1 %v11340_v34 }
 0x470   :  { %6050 = vmatpush1.bf16.msra.mxu1 %v11338_v60  ;;  %v11410_v60 = vld [vmem:[#allocation14 + $0x218] ss:$24 sps:$4 sm:$0xff]  }
 0x471   :  { %8025 = vmatprep.subr.bf16.mxu1 %v11346_v62  ;;  %v11407_v62 = vld [vmem:[#allocation14 + $0x330] ss:$24 sps:$4 sm:$0xff]  }
 0x473   :  { %6052 = vmatmul.mubr.bf16.vlgmr.msra.gmra.mrb[16].mxu1 %v12515_v3  ;;  %v4170_v3 = vrot.slane %v12529_v9, %v12427_v33 }
 0x474   :  { %8026 = vmatpush1.bf16.msra.mxu1 %v11344_v42  ;;  %v11418_v42 = vld [vmem:[#allocation14 + $0x24c] ss:$24 sps:$4 sm:$0xff]  }
 0x475   :  { %8027 = vmatprep.subr.bf16.mxu1 %v11352_v63  ;;  %v11415_v63 = vld [vmem:[#allocation14 + $0x364] ss:$24 sps:$4 sm:$0xff]  }
 0x478   :  { %8028 = vmatpush1.bf16.msra.mxu1 %v11350_v43  ;;  %v11416_v43 = vld [vmem:[#allocation14 + $0x248] ss:$24 sps:$4 sm:$0xff]  }
 0x479   :  { %8029 = vmatprep.subr.bf16.mxu1 %v11358_v0  ;;  %v11413_v0 = vld [vmem:[#allocation14 + $0x360] ss:$24 sps:$4 sm:$0xff]  }
 0x47c   :  { %8030 = vmatpush1.bf16.msra.mxu1 %v11356_v1  ;;  %v11424_v1 = vld [vmem:[#allocation14 + $0x27c] ss:$24 sps:$4 sm:$0xff]  }
 0x47d   :  { %8031 = vmatprep.subr.bf16.mxu1 %v11364_v2  ;;  %v11421_v2 = vld [vmem:[#allocation14 + $0x394] ss:$24 sps:$4 sm:$0xff]  }
 0x480   :  { %8032 = vmatpush1.bf16.msra.mxu1 %v11362_v44  ;;  %v11422_v44 = vld [vmem:[#allocation14 + $0x278] ss:$24 sps:$4 sm:$0xff]  }
 0x481   :  { %8033 = vmatprep.subr.bf16.mxu1 %v11370_v47  ;;  %v11419_v47 = vld [vmem:[#allocation14 + $0x390] ss:$24 sps:$4 sm:$0xff]  }
 0x484   :  { %8034 = vmatpush1.bf16.msra.mxu1 %v11368_v5  ;;  %v11430_v5 = vld [vmem:[#allocation14 + $0x2ac] ss:$24 sps:$4 sm:$0xff]  }
 0x485   :  { %8035 = vmatprep.subr.bf16.mxu1 %v11376_v10  ;;  %v11427_v10 = vld [vmem:[#allocation14 + $0x3c4] ss:$24 sps:$4 sm:$0xff]  }
 0x486   :  { %v5807_v30 = vpop.f32.mrb[12].mxu1  ;;  %v12537_v18 = vpop.f32.mrb[12].mxu0 }
 0x487   :  { %v10041_v19 = vadd.f32 %v5807_v30, %v4170_v3  ;;  %v5809_v20 = vpop.f32.mrb[13].mxu1  ;;  %v5932_v21 = vpop.f32.mrb[13].mxu0  ;;  %v11428_v3 = vld [vmem:[#allocation14 + $0x2a8] ss:$24 sps:$4 sm:$0xff]   ;;  %v11442_v30 = vld [vmem:[#allocation14 + $0x30c] ss:$24 sps:$4 sm:$0xff]  }
 0x488   :  { %v10042_v22 = vadd.f32 %v5809_v20, %v4174_v11  ;;  %v10044_v23 = vadd.f32 %v5932_v21, %v4182_v14  ;;  %v5811_v24 = vpop.f32.mrb[14].mxu1  ;;  %v5934_v25 = vpop.f32.mrb[14].mxu0  ;;  %8036 = vmatpush1.bf16.msra.mxu1 %v11374_v52  ;;  %v11425_v11 = vld [vmem:[#allocation14 + $0x3c0] ss:$24 sps:$4 sm:$0xff]   ;;  %v11436_v14 = vld [vmem:[#allocation14 + $0x2dc] ss:$24 sps:$4 sm:$0xff]  }
 0x489   :  { %v6060_v27 = vpack.c.bf16 %v10041_v19, %v10041_v19  ;;  %v5812_v29 = vpop.f32.mrb[15].mxu1  ;;  %v5935_v50 = vpop.f32.mrb[15].mxu0  ;;  %8037 = vmatprep.subr.bf16.mxu1 %v11382_v17  ;;  %v11433_v52 = vld [vmem:[#allocation14 + $0x3f4] ss:$24 sps:$4 sm:$0xff]   ;;  %v11431_v17 = vld [vmem:[#allocation14 + $0x3f0] ss:$24 sps:$4 sm:$0xff]  }
 0x48a   :  { %v6061_v7 = vpack.c.bf16 %v10042_v22, %v10042_v22  ;;  %v6063_v13 = vpack.c.bf16 %v10044_v23, %v10044_v23  ;;  %v11439_v19 = vld [vmem:[#allocation14 + $0x424] ss:$24 sps:$4 sm:$0xff]   ;;  %v11440_v20 = vld [vmem:[#allocation14 + $0x308] ss:$24 sps:$4 sm:$0xff]   ;;  %v11445_v23 = vld [vmem:[#allocation14 + $0x454] ss:$24 sps:$4 sm:$0xff]  }
 0x48b   :  { %11815 = vtanh.bf16 %v6060_v27  ;;  %v11437_v21 = vld [vmem:[#allocation14 + $0x420] ss:$24 sps:$4 sm:$0xff]   ;;  %v11448_v22 = vld [vmem:[#allocation14 + $0x33c] ss:$24 sps:$4 sm:$0xff]   ;;  %v11443_v25 = vld [vmem:[#allocation14 + $0x450] ss:$24 sps:$4 sm:$0xff]  }
 0x48c   :  { %8038 = vmatpush1.bf16.msra.mxu1 %v11380_v26  ;;  %11817 = vtanh.bf16 %v6061_v7  ;;  %v11446_v24 = vld [vmem:[#allocation14 + $0x338] ss:$24 sps:$4 sm:$0xff]   ;;  %v11454_v26 = vld [vmem:[#allocation14 + $0x36c] ss:$24 sps:$4 sm:$0xff]   ;;  %v11452_v29 = vld [vmem:[#allocation14 + $0x368] ss:$24 sps:$4 sm:$0xff]  }
 0x48d   :  { %8039 = vmatprep.subr.bf16.mxu1 %v11388_v4  ;;  %11819 = vtanh.bf16 %v6063_v13  ;;  %v11451_v27 = vld [vmem:[#allocation14 + $0x484] ss:$24 sps:$4 sm:$0xff]   ;;  %v11449_v50 = vld [vmem:[#allocation14 + $0x480] ss:$24 sps:$4 sm:$0xff]   ;;  %v11457_v7 = vld [vmem:[#allocation14 + $0x4b4] ss:$24 sps:$4 sm:$0xff]  }
 0x48e   :  { %v11460_v4 = vld [vmem:[#allocation14 + $0x39c] ss:$24 sps:$4 sm:$0xff]   ;;  %v11458_v13 = vld [vmem:[#allocation14 + $0x398] ss:$24 sps:$4 sm:$0xff]  }
 0x490   :  { %8040 = vmatpush1.bf16.msra.mxu1 %v11386_v57  ;;  %v11466_v57 = vld [vmem:[#allocation14 + $0x3cc] ss:$24 sps:$4 sm:$0xff]  }
 0x491   :  { %8041 = vmatprep.subr.bf16.mxu1 %v11394_v38  ;;  %v11463_v38 = vld [vmem:[#allocation14 + $0x4e4] ss:$24 sps:$4 sm:$0xff]  }
 0x494   :  { %8042 = vmatpush1.bf16.msra.mxu1 %v11392_v39  ;;  %v11464_v39 = vld [vmem:[#allocation14 + $0x3c8] ss:$24 sps:$4 sm:$0xff]  }
 0x495   :  { %8043 = vmatprep.subr.bf16.mxu1 %v11400_v40  ;;  %v11461_v40 = vld [vmem:[#allocation14 + $0x4e0] ss:$24 sps:$4 sm:$0xff]  }
 0x496   :  { %v11816_v46 = vpop.eup %11815 }
 0x497   :  { %v11818_v51 = vpop.eup %11817  ;;  %v12551_v6 = vmul.bf16 %v11816_v46, %v12546_v45  ;;  %v11470_v46 = vld [vmem:[#allocation14 + $0x3f8] ss:$24 sps:$4 sm:$0xff]  }
 0x498   :  { %8044 = vmatpush1.bf16.msra.mxu1 %v11398_v41  ;;  %v11820_v54 = vpop.eup %11819  ;;  %v12548_v55 = vmul.bf16 %v11818_v51, %v6120_v36  ;;  %v11472_v36 = vld [vmem:[#allocation14 + $0x3fc] ss:$24 sps:$4 sm:$0xff]   ;;  %v11478_v51 = vld [vmem:[#allocation14 + $0x42c] ss:$24 sps:$4 sm:$0xff]  }
 0x499   :  { %8045 = vmatprep.subr.bf16.mxu1 %v11406_v15  ;;  %v12555_v34 = vmul.bf16 %v11820_v54, %v6129_v48  ;;  %v11469_v41 = vld [vmem:[#allocation14 + $0x514] ss:$24 sps:$4 sm:$0xff]   ;;  %v10043_v15 = vadd.f32 %v12537_v18, %v4178_v61  ;;  %v11467_v48 = vld [vmem:[#allocation14 + $0x510] ss:$24 sps:$4 sm:$0xff]  }
 0x49a   :  { %7934 = vmatprep.mubr.bf16.mxu0 %v12548_v55  ;;  %8057 = vmatprep.mubr.bf16.mxu1 %v12548_v55  ;;  %v11482_v18 = vld [vmem:[#allocation14 + $0x458] ss:$24 sps:$4 sm:$0xff]  }
 0x49b   :  { %7935 = vmatmul.mubr.bf16.vlgmr.msra.gmra.mrb[16].mxu0 %v12551_v6  ;;  %v6062_v54 = vpack.c.bf16 %v10043_v15, %v10043_v15  ;;  %v11545_v61 = vld [vmem:[#allocation14 + $0x6f0] ss:$24 sps:$4 sm:$0xff]   ;;  %v11559_v15 = vld [vmem:[#allocation14 + $0x754] ss:$24 sps:$4 sm:$0xff]  }
 0x49c   :  { %8046 = vmatpush1.bf16.msra.mxu1 %v11404_v53  ;;  %7944 = vmatpush1.bf16.msra.mxu0 %v11401_v56  ;;  %v11475_v53 = vld [vmem:[#allocation14 + $0x544] ss:$24 sps:$4 sm:$0xff]   ;;  %v11476_v56 = vld [vmem:[#allocation14 + $0x428] ss:$24 sps:$4 sm:$0xff]  }
 0x49d   :  { %7975 = vmatprep.mubr.bf16.mxu0 %v12555_v34  ;;  %7945 = vmatprep.subr.bf16.mxu0 %v11409_v58  ;;  %v11473_v58 = vld [vmem:[#allocation14 + $0x540] ss:$24 sps:$4 sm:$0xff]   ;;  %11821 = vtanh.bf16 %v6062_v54 }
 0x49e   :  { %8047 = vmatprep.subr.bf16.mxu1 %v11412_v59  ;;  %v11484_v59 = vld [vmem:[#allocation14 + $0x45c] ss:$24 sps:$4 sm:$0xff]   ;;  %v11530_v54 = vld [vmem:[#allocation14 + $0x668] ss:$24 sps:$4 sm:$0xff]  }
 0x4a0   :  { %8048 = vmatpush1.bf16.msra.mxu1 %v11410_v60  ;;  %7946 = vmatpush1.bf16.msra.mxu0 %v11407_v62  ;;  %v11481_v60 = vld [vmem:[#allocation14 + $0x574] ss:$24 sps:$4 sm:$0xff]   ;;  %v11479_v62 = vld [vmem:[#allocation14 + $0x570] ss:$24 sps:$4 sm:$0xff]  }
 0x4a1   :  { %8049 = vmatprep.subr.bf16.mxu1 %v11418_v42  ;;  %7947 = vmatprep.subr.bf16.mxu0 %v11415_v63  ;;  %v11490_v42 = vld [vmem:[#allocation14 + $0x48c] ss:$24 sps:$4 sm:$0xff]  }
 0x4a2   :  { %v11487_v63 = vld [vmem:[#allocation14 + $0x5a4] ss:$24 sps:$4 sm:$0xff]  }
 0x4a4   :  { %8050 = vmatpush1.bf16.msra.mxu1 %v11416_v43  ;;  %7948 = vmatpush1.bf16.msra.mxu0 %v11413_v0  ;;  %v11488_v43 = vld [vmem:[#allocation14 + $0x488] ss:$24 sps:$4 sm:$0xff]  }
 0x4a5   :  { %8051 = vmatprep.subr.bf16.mxu1 %v11424_v1  ;;  %7949 = vmatprep.subr.bf16.mxu0 %v11421_v2  ;;  %v11485_v0 = vld [vmem:[#allocation14 + $0x5a0] ss:$24 sps:$4 sm:$0xff]   ;;  %v11496_v1 = vld [vmem:[#allocation14 + $0x4bc] ss:$24 sps:$4 sm:$0xff]  }
 0x4a6   :  { %v11493_v2 = vld [vmem:[#allocation14 + $0x5d4] ss:$24 sps:$4 sm:$0xff]  }
 0x4a8   :  { %8052 = vmatpush1.bf16.msra.mxu1 %v11422_v44  ;;  %7950 = vmatpush1.bf16.msra.mxu0 %v11419_v47  ;;  %v11494_v44 = vld [vmem:[#allocation14 + $0x4b8] ss:$24 sps:$4 sm:$0xff]  }
 0x4a9   :  { %8053 = vmatprep.subr.bf16.mxu1 %v11430_v5  ;;  %7951 = vmatprep.subr.bf16.mxu0 %v11427_v10  ;;  %v11491_v47 = vld [vmem:[#allocation14 + $0x5d0] ss:$24 sps:$4 sm:$0xff]   ;;  %v11499_v5 = vld [vmem:[#allocation14 + $0x4ec] ss:$24 sps:$4 sm:$0xff]   ;;  %v6128_v10 = vcombine.high %v12546_v45, %v12546_v45 }
 0x4aa   :  { %v11521_v45 = vld [vmem:[#allocation14 + $0x630] ss:$24 sps:$4 sm:$0xff]  }
 0x4ac   :  { %8054 = vmatpush1.bf16.msra.mxu1 %v11428_v3  ;;  %7952 = vmatpush1.bf16.msra.mxu0 %v11425_v11  ;;  %v11517_v3 = vld [vmem:[#allocation14 + $0x604] ss:$24 sps:$4 sm:$0xff]   ;;  %v11822_v11 = vpop.eup %11821 }
 0x4ad   :  { %8055 = vmatprep.subr.bf16.mxu1 %v11436_v14  ;;  %7953 = vmatprep.subr.bf16.mxu0 %v11433_v52  ;;  %v11497_v14 = vld [vmem:[#allocation14 + $0x4e8] ss:$24 sps:$4 sm:$0xff]   ;;  %v11502_v52 = vld [vmem:[#allocation14 + $0x51c] ss:$24 sps:$4 sm:$0xff]  }
 0x4b0   :  { %8056 = vmatpush1.bf16.msra.mxu1 %v11434_v16  ;;  %7954 = vmatpush1.bf16.msra.mxu0 %v11431_v17  ;;  %v11515_v16 = vld [vmem:[#allocation14 + $0x600] ss:$24 sps:$4 sm:$0xff]   ;;  %v12566_v17 = vmul.bf16 %v11822_v11, %v6128_v10 }
 0x4b1   :  { %8066 = vmatprep.subr.bf16.mxu1 %v11442_v30  ;;  %7955 = vmatprep.subr.bf16.mxu0 %v11439_v19  ;;  %v11523_v30 = vld [vmem:[#allocation14 + $0x634] ss:$24 sps:$4 sm:$0xff]   ;;  %v11500_v19 = vld [vmem:[#allocation14 + $0x518] ss:$24 sps:$4 sm:$0xff]   ;;  %v11554_v10 = vld [vmem:[#allocation14 + $0x728] ss:$24 sps:$4 sm:$0xff]  }
 0x4b2   :  { %v11587_v11 = vld [vmem:[#allocation14 + $0x840] ss:$24 sps:$4 sm:$0xff]  }
 0x4b3   :  { %8058 = vmatmul.mubr.bf16.vlgmr.msra.gmra.mrb[20].mxu1 %v12551_v6 }
 0x4b4   :  { %8067 = vmatpush1.bf16.msra.mxu1 %v11440_v20  ;;  %8098 = vmatprep.mubr.bf16.mxu1 %v12555_v34  ;;  %v11505_v20 = vld [vmem:[#allocation14 + $0x54c] ss:$24 sps:$4 sm:$0xff]  }
 0x4b5   :  { %7956 = vmatpush1.bf16.msra.mxu0 %v11437_v21  ;;  %8068 = vmatprep.subr.bf16.mxu1 %v11448_v22  ;;  %v11529_v21 = vld [vmem:[#allocation14 + $0x664] ss:$24 sps:$4 sm:$0xff]   ;;  %v11503_v22 = vld [vmem:[#allocation14 + $0x548] ss:$24 sps:$4 sm:$0xff]  }
 0x4b6   :  { %7957 = vmatprep.subr.bf16.mxu0 %v11445_v23  ;;  %v11508_v23 = vld [vmem:[#allocation14 + $0x57c] ss:$24 sps:$4 sm:$0xff]  }
 0x4b8   :  { %8069 = vmatpush1.bf16.msra.mxu1 %v11446_v24  ;;  %v11527_v24 = vld [vmem:[#allocation14 + $0x660] ss:$24 sps:$4 sm:$0xff]  }
 0x4b9   :  { %7958 = vmatpush1.bf16.msra.mxu0 %v11443_v25  ;;  %8070 = vmatprep.subr.bf16.mxu1 %v11454_v26  ;;  %v11535_v25 = vld [vmem:[#allocation14 + $0x694] ss:$24 sps:$4 sm:$0xff]   ;;  %v11506_v26 = vld [vmem:[#allocation14 + $0x578] ss:$24 sps:$4 sm:$0xff]  }
 0x4ba   :  { %7959 = vmatprep.subr.bf16.mxu0 %v11451_v27  ;;  %v11511_v27 = vld [vmem:[#allocation14 + $0x5ac] ss:$24 sps:$4 sm:$0xff]  }
 0x4bc   :  { %8071 = vmatpush1.bf16.msra.mxu1 %v11452_v29  ;;  %v11533_v29 = vld [vmem:[#allocation14 + $0x690] ss:$24 sps:$4 sm:$0xff]  }
 0x4bd   :  { %7960 = vmatpush1.bf16.msra.mxu0 %v11449_v50  ;;  %8072 = vmatprep.subr.bf16.mxu1 %v11460_v4  ;;  %v11541_v50 = vld [vmem:[#allocation14 + $0x6c4] ss:$24 sps:$4 sm:$0xff]   ;;  %v11509_v4 = vld [vmem:[#allocation14 + $0x5a8] ss:$24 sps:$4 sm:$0xff]  }
 0x4be   :  { %7961 = vmatprep.subr.bf16.mxu0 %v11457_v7  ;;  %v11514_v7 = vld [vmem:[#allocation14 + $0x5dc] ss:$24 sps:$4 sm:$0xff]  }
 0x4c0   :  { %8073 = vmatpush1.bf16.msra.mxu1 %v11458_v13  ;;  %v11539_v13 = vld [vmem:[#allocation14 + $0x6c0] ss:$24 sps:$4 sm:$0xff]  }
 0x4c1   :  { %7962 = vmatpush1.bf16.msra.mxu0 %v11455_v12  ;;  %8074 = vmatprep.subr.bf16.mxu1 %v11466_v57  ;;  %v11547_v12 = vld [vmem:[#allocation14 + $0x6f4] ss:$24 sps:$4 sm:$0xff]   ;;  %v11512_v57 = vld [vmem:[#allocation14 + $0x5d8] ss:$24 sps:$4 sm:$0xff]  }
 0x4c2   :  { %7963 = vmatprep.subr.bf16.mxu0 %v11463_v38  ;;  %v11520_v38 = vld [vmem:[#allocation14 + $0x60c] ss:$24 sps:$4 sm:$0xff]  }
 0x4c4   :  { %8075 = vmatpush1.bf16.msra.mxu1 %v11464_v39  ;;  %v11553_v39 = vld [vmem:[#allocation14 + $0x724] ss:$24 sps:$4 sm:$0xff]  }
 0x4c5   :  { %7964 = vmatpush1.bf16.msra.mxu0 %v11461_v40  ;;  %8076 = vmatprep.subr.bf16.mxu1 %v11472_v36  ;;  %v11518_v40 = vld [vmem:[#allocation14 + $0x608] ss:$24 sps:$4 sm:$0xff]   ;;  %v11526_v36 = vld [vmem:[#allocation14 + $0x63c] ss:$24 sps:$4 sm:$0xff]  }
 0x4c6   :  { %7965 = vmatprep.subr.bf16.mxu0 %v11469_v41  ;;  %v11551_v41 = vld [vmem:[#allocation14 + $0x720] ss:$24 sps:$4 sm:$0xff]  }
 0x4c8   :  { %8077 = vmatpush1.bf16.msra.mxu1 %v11470_v46  ;;  %v11524_v46 = vld [vmem:[#allocation14 + $0x638] ss:$24 sps:$4 sm:$0xff]  }
 0x4c9   :  { %7966 = vmatpush1.bf16.msra.mxu0 %v11467_v48  ;;  %8078 = vmatprep.subr.bf16.mxu1 %v11478_v51  ;;  %v11532_v48 = vld [vmem:[#allocation14 + $0x66c] ss:$24 sps:$4 sm:$0xff]   ;;  %v11557_v51 = vld [vmem:[#allocation14 + $0x750] ss:$24 sps:$4 sm:$0xff]  }
 0x4ca   :  { %7967 = vmatprep.subr.bf16.mxu0 %v11475_v53  ;;  %v11565_v53 = vld [vmem:[#allocation14 + $0x784] ss:$24 sps:$4 sm:$0xff]  }
 0x4cc   :  { %8079 = vmatpush1.bf16.msra.mxu1 %v11476_v56  ;;  %v11538_v56 = vld [vmem:[#allocation14 + $0x69c] ss:$24 sps:$4 sm:$0xff]  }
 0x4cd   :  { %7968 = vmatpush1.bf16.msra.mxu0 %v11473_v58  ;;  %8080 = vmatprep.subr.bf16.mxu1 %v11484_v59  ;;  %v11563_v58 = vld [vmem:[#allocation14 + $0x780] ss:$24 sps:$4 sm:$0xff]   ;;  %v11571_v59 = vld [vmem:[#allocation14 + $0x7b4] ss:$24 sps:$4 sm:$0xff]  }
 0x4ce   :  { %7969 = vmatprep.subr.bf16.mxu0 %v11481_v60  ;;  %v11536_v60 = vld [vmem:[#allocation14 + $0x698] ss:$24 sps:$4 sm:$0xff]  }
 0x4d0   :  { %8081 = vmatpush1.bf16.msra.mxu1 %v11482_v18  ;;  %v11544_v18 = vld [vmem:[#allocation14 + $0x6cc] ss:$24 sps:$4 sm:$0xff]  }
 0x4d1   :  { %7970 = vmatpush1.bf16.msra.mxu0 %v11479_v62  ;;  %8082 = vmatprep.subr.bf16.mxu1 %v11490_v42  ;;  %v11569_v62 = vld [vmem:[#allocation14 + $0x7b0] ss:$24 sps:$4 sm:$0xff]   ;;  %v11577_v42 = vld [vmem:[#allocation14 + $0x7e4] ss:$24 sps:$4 sm:$0xff]  }
 0x4d2   :  { %7971 = vmatprep.subr.bf16.mxu0 %v11487_v63  ;;  %v11542_v63 = vld [vmem:[#allocation14 + $0x6c8] ss:$24 sps:$4 sm:$0xff]  }
 0x4d4   :  { %8083 = vmatpush1.bf16.msra.mxu1 %v11488_v43  ;;  %v11550_v43 = vld [vmem:[#allocation14 + $0x6fc] ss:$24 sps:$4 sm:$0xff]  }
 0x4d5   :  { %7972 = vmatpush1.bf16.msra.mxu0 %v11485_v0  ;;  %8084 = vmatprep.subr.bf16.mxu1 %v11496_v1  ;;  %v11575_v0 = vld [vmem:[#allocation14 + $0x7e0] ss:$24 sps:$4 sm:$0xff]   ;;  %v11583_v1 = vld [vmem:[#allocation14 + $0x814] ss:$24 sps:$4 sm:$0xff]  }
 0x4d6   :  { %7973 = vmatprep.subr.bf16.mxu0 %v11493_v2  ;;  %v11548_v2 = vld [vmem:[#allocation14 + $0x6f8] ss:$24 sps:$4 sm:$0xff]  }
 0x4d8   :  { %8085 = vmatpush1.bf16.msra.mxu1 %v11494_v44  ;;  %v11556_v44 = vld [vmem:[#allocation14 + $0x72c] ss:$24 sps:$4 sm:$0xff]  }
 0x4d9   :  { %7974 = vmatpush1.bf16.msra.mxu0 %v11491_v47  ;;  %8086 = vmatprep.subr.bf16.mxu1 %v11499_v5  ;;  %v11581_v47 = vld [vmem:[#allocation14 + $0x810] ss:$24 sps:$4 sm:$0xff]   ;;  %v11589_v5 = vld [vmem:[#allocation14 + $0x844] ss:$24 sps:$4 sm:$0xff]  }
 0x4da   :  { %7984 = vmatprep.subr.bf16.mxu0 %v11517_v3  ;;  %v11562_v3 = vld [vmem:[#allocation14 + $0x75c] ss:$24 sps:$4 sm:$0xff]  }
 0x4dc   :  { %7976 = vmatmul.mubr.bf16.vlgmr.msra.gmra.mrb[16].mxu0 %v12566_v17  ;;  %8087 = vmatpush1.bf16.msra.mxu1 %v11497_v14  ;;  %v11595_v14 = vld [vmem:[#allocation14 + $0x874] ss:$24 sps:$4 sm:$0xff]  }
 0x4dd   :  { %8088 = vmatprep.subr.bf16.mxu1 %v11502_v52  ;;  %7985 = vmatpush1.bf16.msra.mxu0 %v11515_v16  ;;  %v11560_v52 = vld [vmem:[#allocation14 + $0x758] ss:$24 sps:$4 sm:$0xff]   ;;  %v11568_v16 = vld [vmem:[#allocation14 + $0x78c] ss:$24 sps:$4 sm:$0xff]  }
 0x4de   :  { %7986 = vmatprep.subr.bf16.mxu0 %v11523_v30  ;;  %v11593_v30 = vld [vmem:[#allocation14 + $0x870] ss:$24 sps:$4 sm:$0xff]  }
 0x4e0   :  { %8089 = vmatpush1.bf16.msra.mxu1 %v11500_v19  ;;  %v11601_v19 = vld [vmem:[#allocation14 + $0x8a4] ss:$24 sps:$4 sm:$0xff]  }
 0x4e1   :  { %8090 = vmatprep.subr.bf16.mxu1 %v11505_v20  ;;  %7987 = vmatpush1.bf16.msra.mxu0 %v11521_v45  ;;  %v11566_v20 = vld [vmem:[#allocation14 + $0x788] ss:$24 sps:$4 sm:$0xff]   ;;  %v11574_v45 = vld [vmem:[#allocation14 + $0x7bc] ss:$24 sps:$4 sm:$0xff]  }
 0x4e2   :  { %7988 = vmatprep.subr.bf16.mxu0 %v11529_v21  ;;  %v11599_v21 = vld [vmem:[#allocation14 + $0x8a0] ss:$24 sps:$4 sm:$0xff]  }
 0x4e4   :  { %8091 = vmatpush1.bf16.msra.mxu1 %v11503_v22  ;;  %v11607_v22 = vld [vmem:[#allocation14 + $0x8d4] ss:$24 sps:$4 sm:$0xff]  }
 0x4e5   :  { %8092 = vmatprep.subr.bf16.mxu1 %v11508_v23  ;;  %7989 = vmatpush1.bf16.msra.mxu0 %v11527_v24  ;;  %v11572_v23 = vld [vmem:[#allocation14 + $0x7b8] ss:$24 sps:$4 sm:$0xff]   ;;  %v11580_v24 = vld [vmem:[#allocation14 + $0x7ec] ss:$24 sps:$4 sm:$0xff]  }
 0x4e6   :  { %7990 = vmatprep.subr.bf16.mxu0 %v11535_v25  ;;  %v11605_v25 = vld [vmem:[#allocation14 + $0x8d0] ss:$24 sps:$4 sm:$0xff]  }
 0x4e8   :  { %8093 = vmatpush1.bf16.msra.mxu1 %v11506_v26  ;;  %v11613_v26 = vld [vmem:[#allocation14 + $0x14] ss:$24 sps:$4 sm:$0xff]  }
 0x4e9   :  { %8094 = vmatprep.subr.bf16.mxu1 %v11511_v27  ;;  %7991 = vmatpush1.bf16.msra.mxu0 %v11533_v29  ;;  %v11578_v27 = vld [vmem:[#allocation14 + $0x7e8] ss:$24 sps:$4 sm:$0xff]   ;;  %v11586_v29 = vld [vmem:[#allocation14 + $0x81c] ss:$24 sps:$4 sm:$0xff]  }
 0x4ea   :  { %7992 = vmatprep.subr.bf16.mxu0 %v11541_v50  ;;  %v11584_v50 = vld [vmem:[#allocation14 + $0x818] ss:$24 sps:$4 sm:$0xff]  }
 0x4ec   :  { %8095 = vmatpush1.bf16.msra.mxu1 %v11509_v4  ;;  %v11592_v4 = vld [vmem:[#allocation14 + $0x84c] ss:$24 sps:$4 sm:$0xff]  }
 0x4ed   :  { %8096 = vmatprep.subr.bf16.mxu1 %v11514_v7  ;;  %7993 = vmatpush1.bf16.msra.mxu0 %v11539_v13  ;;  %v11590_v7 = vld [vmem:[#allocation14 + $0x848] ss:$24 sps:$4 sm:$0xff]   ;;  %v11598_v13 = vld [vmem:[#allocation14 + $0x87c] ss:$24 sps:$4 sm:$0xff]  }
 0x4ee   :  { %7994 = vmatprep.subr.bf16.mxu0 %v11547_v12  ;;  %v11596_v12 = vld [vmem:[#allocation14 + $0x878] ss:$24 sps:$4 sm:$0xff]  }
 0x4f0   :  { %8097 = vmatpush1.bf16.msra.mxu1 %v11512_v57  ;;  %v11604_v57 = vld [vmem:[#allocation14 + $0x8ac] ss:$24 sps:$4 sm:$0xff]  }
 0x4f1   :  { %8107 = vmatprep.subr.bf16.mxu1 %v11520_v38  ;;  %7995 = vmatpush1.bf16.msra.mxu0 %v11545_v61  ;;  %v11602_v38 = vld [vmem:[#allocation14 + $0x8a8] ss:$24 sps:$4 sm:$0xff]   ;;  %v11610_v61 = vld [vmem:[#allocation14 + $0x8dc] ss:$24 sps:$4 sm:$0xff]  }
 0x4f2   :  { %7996 = vmatprep.subr.bf16.mxu0 %v11553_v39  ;;  %v11608_v39 = vld [vmem:[#allocation14 + $0x8d8] ss:$24 sps:$4 sm:$0xff]  }
 0x4f3   :  { %8099 = vmatmul.mubr.bf16.vlgmr.msra.gmra.mrb[20].mxu1 %v12566_v17 }
 0x4f4   :  { %8108 = vmatpush1.bf16.msra.mxu1 %v11518_v40  ;;  %v4186_v40 = vrot.slane %v12529_v9, %v12458_v49 }
 0x4f5   :  { %8109 = vmatprep.subr.bf16.mxu1 %v11526_v36  ;;  %7997 = vmatpush1.bf16.msra.mxu0 %v11551_v41  ;;  %v4190_v36 = vrot.slane %v12529_v9, %v12461_v37 }
 0x4f6   :  { %7998 = vmatprep.subr.bf16.mxu0 %v11559_v15 }
 0x4f8   :  { %8110 = vmatpush1.bf16.msra.mxu1 %v11524_v46 }
 0x4f9   :  { %8111 = vmatprep.subr.bf16.mxu1 %v11532_v48  ;;  %7999 = vmatpush1.bf16.msra.mxu0 %v11557_v51 }
 0x4fa   :  { %8000 = vmatprep.subr.bf16.mxu0 %v11565_v53 }
 0x4fc   :  { %8112 = vmatpush1.bf16.msra.mxu1 %v11530_v54 }
 0x4fd   :  { %8113 = vmatprep.subr.bf16.mxu1 %v11538_v56  ;;  %8001 = vmatpush1.bf16.msra.mxu0 %v11563_v58  ;;  %v6083_v56 = vcombine.high %v12540_v28, %v12540_v28  ;;  %v11614_v28 = vld [vmem:[#allocation14 + $0x40] ss:$24 sps:$4 sm:$0xff]  }
 0x4fe   :  { %8002 = vmatprep.subr.bf16.mxu0 %v11571_v59 }
 0x4ff   :  { %v6097_v59 = vrot.slane %v6083_v56, %v12468_v8  ;;  %v11762_v56 = vld [vmem:[#allocation17 + $0x18] sm:$0xff]  }
 0x500   :  { %8114 = vmatpush1.bf16.msra.mxu1 %v11536_v60 }
 0x501   :  { %8115 = vmatprep.subr.bf16.mxu1 %v11544_v18  ;;  %8003 = vmatpush1.bf16.msra.mxu0 %v11569_v62  ;;  %v6099_v60 = vcombine.high %v6097_v59, %v6097_v59  ;;  %v6113_v18 = vrot.slane %v6097_v59, %v12468_v8  ;;  %v11676_v59 = vld [vmem:[#allocation14 + $0x404] ss:$24 sps:$4 sm:$0xff]  }
 0x502   :  { %8004 = vmatprep.subr.bf16.mxu0 %v11577_v42 }
 0x503   :  { %v6127_v9 = vrot.slane %v6099_v60, %v12468_v8  ;;  %v11619_v8 = vld [vmem:[#allocation14 + $0x74] ss:$24 sps:$4 sm:$0xff]   ;;  %v11674_v60 = vld [vmem:[#allocation14 + $0x400] ss:$24 sps:$4 sm:$0xff]  }
 0x504   :  { %8116 = vmatpush1.bf16.msra.mxu1 %v11542_v63 }
 0x505   :  { %8117 = vmatprep.subr.bf16.mxu1 %v11550_v43  ;;  %8005 = vmatpush1.bf16.msra.mxu0 %v11575_v0  ;;  %v11611_v0 = vld [vmem:[#allocation14 + $0x10] ss:$24 sps:$4 sm:$0xff]  }
 0x506   :  { %8006 = vmatprep.subr.bf16.mxu0 %v11583_v1  ;;  %v11616_v1 = vld [vmem:[#allocation14 + $0x44] ss:$24 sps:$4 sm:$0xff]  }
 0x508   :  { %8118 = vmatpush1.bf16.msra.mxu1 %v11548_v2  ;;  %v11617_v2 = vld [vmem:[#allocation14 + $0x70] ss:$24 sps:$4 sm:$0xff]  }
 0x509   :  { %8119 = vmatprep.subr.bf16.mxu1 %v11556_v44  ;;  %8007 = vmatpush1.bf16.msra.mxu0 %v11581_v47  ;;  %v11622_v44 = vld [vmem:[#allocation14 + $0xa4] ss:$24 sps:$4 sm:$0xff]   ;;  %v11620_v47 = vld [vmem:[#allocation14 + $0xa0] ss:$24 sps:$4 sm:$0xff]  }
 0x50a   :  { %8008 = vmatprep.subr.bf16.mxu0 %v11589_v5  ;;  %v11625_v5 = vld [vmem:[#allocation14 + $0xd4] ss:$24 sps:$4 sm:$0xff]  }
 0x50c   :  { %8120 = vmatpush1.bf16.msra.mxu1 %v11554_v10  ;;  %v11623_v10 = vld [vmem:[#allocation14 + $0xd0] ss:$24 sps:$4 sm:$0xff]  }
 0x50d   :  { %8121 = vmatprep.subr.bf16.mxu1 %v11562_v3  ;;  %8009 = vmatpush1.bf16.msra.mxu0 %v11587_v11  ;;  %v11628_v3 = vld [vmem:[#allocation14 + $0x104] ss:$24 sps:$4 sm:$0xff]   ;;  %v11626_v11 = vld [vmem:[#allocation14 + $0x100] ss:$24 sps:$4 sm:$0xff]  }
 0x50e   :  { %8010 = vmatprep.subr.bf16.mxu0 %v11595_v14  ;;  %v11631_v14 = vld [vmem:[#allocation14 + $0x134] ss:$24 sps:$4 sm:$0xff]  }
 0x510   :  { %8122 = vmatpush1.bf16.msra.mxu1 %v11560_v52  ;;  %v11634_v52 = vld [vmem:[#allocation14 + $0x164] ss:$24 sps:$4 sm:$0xff]  }
 0x511   :  { %8123 = vmatprep.subr.bf16.mxu1 %v11568_v16  ;;  %8011 = vmatpush1.bf16.msra.mxu0 %v11593_v30  ;;  %v11632_v16 = vld [vmem:[#allocation14 + $0x160] ss:$24 sps:$4 sm:$0xff]   ;;  %v11637_v30 = vld [vmem:[#allocation14 + $0x194] ss:$24 sps:$4 sm:$0xff]  }
 0x512   :  { %8012 = vmatprep.subr.bf16.mxu0 %v11601_v19  ;;  %v11635_v19 = vld [vmem:[#allocation14 + $0x190] ss:$24 sps:$4 sm:$0xff]  }
 0x514   :  { %8124 = vmatpush1.bf16.msra.mxu1 %v11566_v20  ;;  %v11640_v20 = vld [vmem:[#allocation14 + $0x1c4] ss:$24 sps:$4 sm:$0xff]  }
 0x515   :  { %8125 = vmatprep.subr.bf16.mxu1 %v11574_v45  ;;  %8013 = vmatpush1.bf16.msra.mxu0 %v11599_v21  ;;  %v11638_v45 = vld [vmem:[#allocation14 + $0x1c0] ss:$24 sps:$4 sm:$0xff]   ;;  %v11643_v21 = vld [vmem:[#allocation14 + $0x1f4] ss:$24 sps:$4 sm:$0xff]  }
 0x516   :  { %8014 = vmatprep.subr.bf16.mxu0 %v11607_v22  ;;  %v11641_v22 = vld [vmem:[#allocation14 + $0x1f0] ss:$24 sps:$4 sm:$0xff]  }
 0x518   :  { %8126 = vmatpush1.bf16.msra.mxu1 %v11572_v23  ;;  %v11646_v23 = vld [vmem:[#allocation14 + $0x224] ss:$24 sps:$4 sm:$0xff]  }
 0x519   :  { %8127 = vmatprep.subr.bf16.mxu1 %v11580_v24  ;;  %8015 = vmatpush1.bf16.msra.mxu0 %v11605_v25  ;;  %v11644_v24 = vld [vmem:[#allocation14 + $0x220] ss:$24 sps:$4 sm:$0xff]   ;;  %v11649_v25 = vld [vmem:[#allocation14 + $0x254] ss:$24 sps:$4 sm:$0xff]  }
 0x51a   :  { %8148 = vmatprep.subr.bf16.mxu0 %v11613_v26  ;;  %v11647_v26 = vld [vmem:[#allocation14 + $0x250] ss:$24 sps:$4 sm:$0xff]  }
 0x51c   :  { %8128 = vmatpush1.bf16.msra.mxu1 %v11578_v27  ;;  %v11652_v27 = vld [vmem:[#allocation14 + $0x284] ss:$24 sps:$4 sm:$0xff]  }
 0x51d   :  { %8129 = vmatprep.subr.bf16.mxu1 %v11586_v29  ;;  %v11650_v29 = vld [vmem:[#allocation14 + $0x280] ss:$24 sps:$4 sm:$0xff]  }
 0x520   :  { %8130 = vmatpush1.bf16.msra.mxu1 %v11584_v50  ;;  %v11655_v50 = vld [vmem:[#allocation14 + $0x2b4] ss:$24 sps:$4 sm:$0xff]  }
 0x521   :  { %8131 = vmatprep.subr.bf16.mxu1 %v11592_v4  ;;  %v11653_v4 = vld [vmem:[#allocation14 + $0x2b0] ss:$24 sps:$4 sm:$0xff]  }
 0x524   :  { %8132 = vmatpush1.bf16.msra.mxu1 %v11590_v7  ;;  %v11658_v7 = vld [vmem:[#allocation14 + $0x2e4] ss:$24 sps:$4 sm:$0xff]  }
 0x525   :  { %8133 = vmatprep.subr.bf16.mxu1 %v11598_v13  ;;  %v11656_v13 = vld [vmem:[#allocation14 + $0x2e0] ss:$24 sps:$4 sm:$0xff]  }
 0x528   :  { %8134 = vmatpush1.bf16.msra.mxu1 %v11596_v12  ;;  %v11661_v12 = vld [vmem:[#allocation14 + $0x314] ss:$24 sps:$4 sm:$0xff]  }
 0x529   :  { %8135 = vmatprep.subr.bf16.mxu1 %v11604_v57  ;;  %v11659_v57 = vld [vmem:[#allocation14 + $0x310] ss:$24 sps:$4 sm:$0xff]  }
 0x52c   :  { %8136 = vmatpush1.bf16.msra.mxu1 %v11602_v38  ;;  %v11664_v38 = vld [vmem:[#allocation14 + $0x344] ss:$24 sps:$4 sm:$0xff]  }
 0x52d   :  { %8137 = vmatprep.subr.bf16.mxu1 %v11610_v61  ;;  %v11755_v61 = vld [vmem:[#allocation17 + $0x40] sm:$0xff]  }
 0x530   :  { %8138 = vmatpush1.bf16.msra.mxu1 %v11608_v39  ;;  %v11756_v39 = vld [vmem:[#allocation17] sm:$0xff]  }
 0x531   :  { %9951 = vmatprep.subr.bf16.mxu1 %v11755_v61  ;;  %v11719_v61 = vld [vmem:[#allocation14 + $0x6d0] ss:$24 sps:$4 sm:$0xff]  }
 0x546   :  { %v6053_v41 = vpop.f32.mrb[16].mxu1 }
 0x547   :  { %v10045_v15 = vadd.f32 %v6053_v41, %v4186_v40  ;;  %v6055_v46 = vpop.f32.mrb[17].mxu1  ;;  %v11757_v40 = vld [vmem:[#allocation17 + $0x48] sm:$0xff]  }
 0x548   :  { %v10046_v48 = vadd.f32 %v6055_v46, %v4190_v36  ;;  %v6057_v51 = vpop.f32.mrb[18].mxu1  ;;  %v11662_v36 = vld [vmem:[#allocation14 + $0x340] ss:$24 sps:$4 sm:$0xff]   ;;  %v11667_v41 = vld [vmem:[#allocation14 + $0x374] ss:$24 sps:$4 sm:$0xff]  }
 0x549   :  { %v6064_v53 = vpack.c.bf16 %v10045_v15, %v10045_v15  ;;  %v6058_v54 = vpop.f32.mrb[19].mxu1  ;;  %v11758_v15 = vld [vmem:[#allocation17 + $0x8] sm:$0xff]   ;;  %v11759_v46 = vld [vmem:[#allocation17 + $0x50] sm:$0xff]  }
 0x54a   :  { %v6065_v58 = vpack.c.bf16 %v10046_v48, %v10046_v48  ;;  %v11665_v48 = vld [vmem:[#allocation14 + $0x370] ss:$24 sps:$4 sm:$0xff]   ;;  %v11670_v51 = vld [vmem:[#allocation14 + $0x3a4] ss:$24 sps:$4 sm:$0xff]   ;;  %v11668_v54 = vld [vmem:[#allocation14 + $0x3a0] ss:$24 sps:$4 sm:$0xff]  }
 0x54b   :  { %11823 = vtanh.bf16 %v6064_v53  ;;  %v11761_v53 = vld [vmem:[#allocation17 + $0x58] sm:$0xff]  }
 0x54c   :  { %11825 = vtanh.bf16 %v6065_v58  ;;  %v11671_v58 = vld [vmem:[#allocation14 + $0x3d0] ss:$24 sps:$4 sm:$0xff]  }
 0x556   :  { %v11824_v62 = vpop.eup %11823 }
 0x557   :  { %v11826_v42 = vpop.eup %11825  ;;  %v12579_v63 = vmul.bf16 %v11824_v62, %v6113_v18  ;;  %v11679_v18 = vld [vmem:[#allocation14 + $0x434] ss:$24 sps:$4 sm:$0xff]   ;;  %v11677_v62 = vld [vmem:[#allocation14 + $0x430] ss:$24 sps:$4 sm:$0xff]  }
 0x558   :  { %v12581_v43 = vmul.bf16 %v11826_v42, %v6127_v9  ;;  %v11763_v9 = vld [vmem:[#allocation17 + $0x60] sm:$0xff]  }
 0x559   :  { %v11682_v42 = vld [vmem:[#allocation14 + $0x464] ss:$24 sps:$4 sm:$0xff]  }
 0x55a   :  { %8016 = vmatprep.mubr.bf16.mxu0 %v12581_v43  ;;  %8139 = vmatprep.mubr.bf16.mxu1 %v12581_v43 }
 0x55b   :  { %8017 = vmatmul.mubr.bf16.vlgmr.msra.gmra.mrb[16].mxu0 %v12579_v63  ;;  %8140 = vmatmul.mubr.bf16.vlgmr.msra.gmra.mrb[20].mxu1 %v12579_v63 }
 0x55c   :  { %8149 = vmatpush1.bf16.msra.mxu0 %v11611_v0  ;;  %8180 = vmatprep.mubr.bf16.mxu0 %v12548_v55  ;;  %v11629_v55 = vld [vmem:[#allocation14 + $0x130] ss:$24 sps:$4 sm:$0xff]  }
 0x55d   :  { %8150 = vmatprep.subr.bf16.mxu0 %v11616_v1  ;;  %9952 = vmatpush3.bf16.msra.mxu1 %v11756_v39  ;;  %v11764_v0 = vld [vmem:[#allocation17 + $0x20] sm:$0xff]   ;;  %v11680_v1 = vld [vmem:[#allocation14 + $0x460] ss:$24 sps:$4 sm:$0xff]  }
 0x55e   :  { %9953 = vmatprep.subr.bf16.mxu1 %v11757_v40  ;;  %v11724_v39 = vld [vmem:[#allocation14 + $0x704] ss:$24 sps:$4 sm:$0xff]   ;;  %v11727_v40 = vld [vmem:[#allocation14 + $0x734] ss:$24 sps:$4 sm:$0xff]  }
 0x560   :  { %8151 = vmatpush1.bf16.msra.mxu0 %v11614_v28  ;;  %v11765_v28 = vld [vmem:[#allocation17 + $0x68] sm:$0xff]  }
 0x561   :  { %8152 = vmatprep.subr.bf16.mxu0 %v11619_v8  ;;  %9954 = vmatpush3.bf16.msra.mxu1 %v11758_v15  ;;  %v11685_v8 = vld [vmem:[#allocation14 + $0x494] ss:$24 sps:$4 sm:$0xff]  }
 0x562   :  { %9955 = vmatprep.subr.bf16.mxu1 %v11759_v46  ;;  %v11733_v15 = vld [vmem:[#allocation14 + $0x794] ss:$24 sps:$4 sm:$0xff]   ;;  %v11731_v46 = vld [vmem:[#allocation14 + $0x790] ss:$24 sps:$4 sm:$0xff]  }
 0x564   :  { %8153 = vmatpush1.bf16.msra.mxu0 %v11617_v2  ;;  %v11766_v2 = vld [vmem:[#allocation17 + $0x28] sm:$0xff]  }
 0x565   :  { %8154 = vmatprep.subr.bf16.mxu0 %v11622_v44  ;;  %v11767_v44 = vld [vmem:[#allocation17 + $0x70] sm:$0xff]  }
 0x568   :  { %8155 = vmatpush1.bf16.msra.mxu0 %v11620_v47  ;;  %v11768_v47 = vld [vmem:[#allocation17 + $0x30] sm:$0xff]  }
 0x569   :  { %8156 = vmatprep.subr.bf16.mxu0 %v11625_v5  ;;  %v11683_v5 = vld [vmem:[#allocation14 + $0x490] ss:$24 sps:$4 sm:$0xff]  }
 0x56c   :  { %8157 = vmatpush1.bf16.msra.mxu0 %v11623_v10  ;;  %v11769_v10 = vld [vmem:[#allocation17 + $0x78] sm:$0xff]  }
 0x56d   :  { %8158 = vmatprep.subr.bf16.mxu0 %v11628_v3  ;;  %v11688_v3 = vld [vmem:[#allocation14 + $0x4c4] ss:$24 sps:$4 sm:$0xff]  }
 0x570   :  { %8159 = vmatpush1.bf16.msra.mxu0 %v11626_v11  ;;  %v11770_v11 = vld [vmem:[#allocation17 + $0x38] sm:$0xff]  }
 0x571   :  { %8160 = vmatprep.subr.bf16.mxu0 %v11631_v14  ;;  %v11686_v14 = vld [vmem:[#allocation14 + $0x4c0] ss:$24 sps:$4 sm:$0xff]  }
 0x574   :  { %8161 = vmatpush1.bf16.msra.mxu0 %v11629_v55  ;;  %v11691_v55 = vld [vmem:[#allocation14 + $0x4f4] ss:$24 sps:$4 sm:$0xff]  }
 0x575   :  { %8162 = vmatprep.subr.bf16.mxu0 %v11634_v52  ;;  %v11689_v52 = vld [vmem:[#allocation14 + $0x4f0] ss:$24 sps:$4 sm:$0xff]  }
 0x578   :  { %8163 = vmatpush1.bf16.msra.mxu0 %v11632_v16  ;;  %v11771_v16 = vld [vmem:[#allocation17 + $0xc0] sm:$0xff]  }
 0x579   :  { %8164 = vmatprep.subr.bf16.mxu0 %v11637_v30  ;;  %v11694_v30 = vld [vmem:[#allocation14 + $0x524] ss:$24 sps:$4 sm:$0xff]  }
 0x57c   :  { %8165 = vmatpush1.bf16.msra.mxu0 %v11635_v19  ;;  %v11692_v19 = vld [vmem:[#allocation14 + $0x520] ss:$24 sps:$4 sm:$0xff]  }
 0x57d   :  { %8166 = vmatprep.subr.bf16.mxu0 %v11640_v20  ;;  %v11697_v20 = vld [vmem:[#allocation14 + $0x554] ss:$24 sps:$4 sm:$0xff]  }
 0x580   :  { %8167 = vmatpush1.bf16.msra.mxu0 %v11638_v45  ;;  %v11695_v45 = vld [vmem:[#allocation14 + $0x550] ss:$24 sps:$4 sm:$0xff]  }
 0x581   :  { %8168 = vmatprep.subr.bf16.mxu0 %v11643_v21  ;;  %v11700_v21 = vld [vmem:[#allocation14 + $0x584] ss:$24 sps:$4 sm:$0xff]  }
 0x584   :  { %8169 = vmatpush1.bf16.msra.mxu0 %v11641_v22  ;;  %v11698_v22 = vld [vmem:[#allocation14 + $0x580] ss:$24 sps:$4 sm:$0xff]  }
 0x585   :  { %8170 = vmatprep.subr.bf16.mxu0 %v11646_v23  ;;  %v11703_v23 = vld [vmem:[#allocation14 + $0x5b4] ss:$24 sps:$4 sm:$0xff]  }
 0x588   :  { %8171 = vmatpush1.bf16.msra.mxu0 %v11644_v24  ;;  %v11701_v24 = vld [vmem:[#allocation14 + $0x5b0] ss:$24 sps:$4 sm:$0xff]  }
 0x589   :  { %8172 = vmatprep.subr.bf16.mxu0 %v11649_v25  ;;  %v11706_v25 = vld [vmem:[#allocation14 + $0x5e4] ss:$24 sps:$4 sm:$0xff]  }
 0x58c   :  { %8173 = vmatpush1.bf16.msra.mxu0 %v11647_v26  ;;  %v11704_v26 = vld [vmem:[#allocation14 + $0x5e0] ss:$24 sps:$4 sm:$0xff]  }
 0x58d   :  { %8174 = vmatprep.subr.bf16.mxu0 %v11652_v27  ;;  %v11709_v27 = vld [vmem:[#allocation14 + $0x614] ss:$24 sps:$4 sm:$0xff]  }
 0x590   :  { %8175 = vmatpush1.bf16.msra.mxu0 %v11650_v29  ;;  %v11707_v29 = vld [vmem:[#allocation14 + $0x610] ss:$24 sps:$4 sm:$0xff]  }
 0x591   :  { %8176 = vmatprep.subr.bf16.mxu0 %v11655_v50  ;;  %v11712_v50 = vld [vmem:[#allocation14 + $0x644] ss:$24 sps:$4 sm:$0xff]  }
 0x594   :  { %8177 = vmatpush1.bf16.msra.mxu0 %v11653_v4  ;;  %v11710_v4 = vld [vmem:[#allocation14 + $0x640] ss:$24 sps:$4 sm:$0xff]  }
 0x595   :  { %8178 = vmatprep.subr.bf16.mxu0 %v11658_v7  ;;  %v11715_v7 = vld [vmem:[#allocation14 + $0x674] ss:$24 sps:$4 sm:$0xff]  }
 0x598   :  { %8179 = vmatpush1.bf16.msra.mxu0 %v11656_v13  ;;  %v11713_v13 = vld [vmem:[#allocation14 + $0x670] ss:$24 sps:$4 sm:$0xff]  }
 0x599   :  { %8189 = vmatprep.subr.bf16.mxu0 %v11661_v12  ;;  %v11718_v12 = vld [vmem:[#allocation14 + $0x6a4] ss:$24 sps:$4 sm:$0xff]  }
 0x59b   :  { %8181 = vmatmul.mubr.bf16.vlgmr.msra.gmra.mrb[20].mxu0 %v12551_v6  ;;  %v11760_v6 = vld [vmem:[#allocation17 + $0x10] sm:$0xff]  }
 0x59c   :  { %8190 = vmatpush1.bf16.msra.mxu0 %v11659_v57  ;;  %8221 = vmatprep.mubr.bf16.mxu0 %v12555_v34  ;;  %v11673_v34 = vld [vmem:[#allocation14 + $0x3d4] ss:$24 sps:$4 sm:$0xff]   ;;  %v11716_v57 = vld [vmem:[#allocation14 + $0x6a0] ss:$24 sps:$4 sm:$0xff]  }
 0x59d   :  { %8191 = vmatprep.subr.bf16.mxu0 %v11664_v38  ;;  %9956 = vmatpush3.bf16.msra.mxu1 %v11760_v6  ;;  %v11721_v38 = vld [vmem:[#allocation14 + $0x6d4] ss:$24 sps:$4 sm:$0xff]  }
 0x59e   :  { %9957 = vmatprep.subr.bf16.mxu1 %v11761_v53  ;;  %v11739_v6 = vld [vmem:[#allocation14 + $0x7f4] ss:$24 sps:$4 sm:$0xff]   ;;  %v11737_v53 = vld [vmem:[#allocation14 + $0x7f0] ss:$24 sps:$4 sm:$0xff]  }
 0x5a0   :  { %8192 = vmatpush1.bf16.msra.mxu0 %v11662_v36  ;;  %v11730_v36 = vld [vmem:[#allocation14 + $0x764] ss:$24 sps:$4 sm:$0xff]  }
 0x5a1   :  { %8193 = vmatprep.subr.bf16.mxu0 %v11667_v41  ;;  %9958 = vmatpush3.bf16.msra.mxu1 %v11762_v56  ;;  %v11728_v41 = vld [vmem:[#allocation14 + $0x760] ss:$24 sps:$4 sm:$0xff]   ;;  %v11745_v56 = vld [vmem:[#allocation14 + $0x854] ss:$24 sps:$4 sm:$0xff]  }
 0x5a2   :  { %9959 = vmatprep.subr.bf16.mxu1 %v11763_v9  ;;  %v11754_v9 = vld [vmem:[#allocation14 + $0x8e4] ss:$24 sps:$4 sm:$0xff]  }
 0x5a4   :  { %8194 = vmatpush1.bf16.msra.mxu0 %v11665_v48  ;;  %v11736_v48 = vld [vmem:[#allocation14 + $0x7c4] ss:$24 sps:$4 sm:$0xff]  }
 0x5a5   :  { %8195 = vmatprep.subr.bf16.mxu0 %v11670_v51  ;;  %9960 = vmatpush3.bf16.msra.mxu1 %v11764_v0  ;;  %v11734_v51 = vld [vmem:[#allocation14 + $0x7c0] ss:$24 sps:$4 sm:$0xff]  }
 0x5a6   :  { %9961 = vmatprep.subr.bf16.mxu1 %v11765_v28  ;;  %v12593_v0 = vld [vmem:[#allocation16] sm:$0x3f] }
 0x5a7   :  { %v6439_v28 = vrot.slane %v12593_v0, %v12430_v35  ;;  %v11772_v35 = vld [vmem:[#allocation17 + $0x80] sm:$0xff]  }
 0x5a8   :  { %8196 = vmatpush1.bf16.msra.mxu0 %v11668_v54  ;;  %v11742_v54 = vld [vmem:[#allocation14 + $0x824] ss:$24 sps:$4 sm:$0xff]  }
 0x5a9   :  { %8197 = vmatprep.subr.bf16.mxu0 %v11673_v34  ;;  %9962 = vmatpush3.bf16.msra.mxu1 %v11766_v2  ;;  %v11740_v34 = vld [vmem:[#allocation14 + $0x820] ss:$24 sps:$4 sm:$0xff]  }
 0x5aa   :  { %9963 = vmatprep.subr.bf16.mxu1 %v11767_v44 }
 0x5ac   :  { %8198 = vmatpush1.bf16.msra.mxu0 %v11671_v58  ;;  %v11743_v58 = vld [vmem:[#allocation14 + $0x850] ss:$24 sps:$4 sm:$0xff]  }
 0x5ad   :  { %8199 = vmatprep.subr.bf16.mxu0 %v11676_v59  ;;  %9964 = vmatpush3.bf16.msra.mxu1 %v11768_v47  ;;  %v11748_v59 = vld [vmem:[#allocation14 + $0x884] ss:$24 sps:$4 sm:$0xff]  }
 0x5ae   :  { %9965 = vmatprep.subr.bf16.mxu1 %v11769_v10 }
 0x5b0   :  { %8200 = vmatpush1.bf16.msra.mxu0 %v11674_v60  ;;  %v11746_v60 = vld [vmem:[#allocation14 + $0x880] ss:$24 sps:$4 sm:$0xff]  }
 0x5b1   :  { %8201 = vmatprep.subr.bf16.mxu0 %v11679_v18  ;;  %9966 = vmatpush3.bf16.msra.mxu1 %v11770_v11  ;;  %v11751_v18 = vld [vmem:[#allocation14 + $0x8b4] ss:$24 sps:$4 sm:$0xff]  }
 0x5b2   :  { %9973 = vmatprep.subr.bf16.mxu1 %v11771_v16 }
 0x5b4   :  { %8202 = vmatpush1.bf16.msra.mxu0 %v11677_v62  ;;  %v11749_v62 = vld [vmem:[#allocation14 + $0x8b0] ss:$24 sps:$4 sm:$0xff]  }
 0x5b5   :  { %8203 = vmatprep.subr.bf16.mxu0 %v11682_v42  ;;  %v11752_v42 = vld [vmem:[#allocation14 + $0x8e0] ss:$24 sps:$4 sm:$0xff]  }
 0x5b8   :  { %8204 = vmatpush1.bf16.msra.mxu0 %v11680_v1  ;;  %v6435_v1 = vrot.slane %v12593_v0, %v12427_v33 }
 0x5b9   :  { %8205 = vmatprep.subr.bf16.mxu0 %v11685_v8  ;;  %v6447_v8 = vrot.slane %v12593_v0, %v12449_v32  ;;  %v11773_v32 = vld [vmem:[#allocation17 + $0xc8] sm:$0xff]  }
 0x5bc   :  { %8206 = vmatpush1.bf16.msra.mxu0 %v11683_v5 }
 0x5bd   :  { %8207 = vmatprep.subr.bf16.mxu0 %v11688_v3 }
 0x5c0   :  { %8208 = vmatpush1.bf16.msra.mxu0 %v11686_v14 }
 0x5c1   :  { %8209 = vmatprep.subr.bf16.mxu0 %v11691_v55 }
 0x5c4   :  { %8210 = vmatpush1.bf16.msra.mxu0 %v11689_v52 }
 0x5c5   :  { %8211 = vmatprep.subr.bf16.mxu0 %v11694_v30 }
 0x5c8   :  { %8212 = vmatpush1.bf16.msra.mxu0 %v11692_v19 }
 0x5c9   :  { %8213 = vmatprep.subr.bf16.mxu0 %v11697_v20 }
 0x5cc   :  { %8214 = vmatpush1.bf16.msra.mxu0 %v11695_v45 }
 0x5cd   :  { %8215 = vmatprep.subr.bf16.mxu0 %v11700_v21  ;;  %v11774_v21 = vld [vmem:[#allocation17 + $0x88] sm:$0xff]  }
 0x5d0   :  { %8216 = vmatpush1.bf16.msra.mxu0 %v11698_v22  ;;  %v11775_v22 = vld [vmem:[#allocation17 + $0xd0] sm:$0xff]  }
 0x5d1   :  { %8217 = vmatprep.subr.bf16.mxu0 %v11703_v23  ;;  %v11776_v23 = vld [vmem:[#allocation17 + $0x90] sm:$0xff]  }
 0x5d4   :  { %8218 = vmatpush1.bf16.msra.mxu0 %v11701_v24  ;;  %v11777_v24 = vld [vmem:[#allocation17 + $0xd8] sm:$0xff]  }
 0x5d5   :  { %8219 = vmatprep.subr.bf16.mxu0 %v11706_v25  ;;  %v6443_v25 = vrot.slane %v12593_v0, %v12446_v31  ;;  %v11786_v31 = vld [vmem:[#allocation17 + $0xb8] sm:$0xff]  }
 0x5d8   :  { %8220 = vmatpush1.bf16.msra.mxu0 %v11704_v26  ;;  %v11778_v26 = vld [vmem:[#allocation17 + $0x98] sm:$0xff]  }
 0x5d9   :  { %8230 = vmatprep.subr.bf16.mxu0 %v11709_v27  ;;  %v11779_v27 = vld [vmem:[#allocation17 + $0xe0] sm:$0xff]  }
 0x5db   :  { %8222 = vmatmul.mubr.bf16.vlgmr.msra.gmra.mrb[20].mxu0 %v12566_v17  ;;  %v11722_v17 = vld [vmem:[#allocation14 + $0x700] ss:$24 sps:$4 sm:$0xff]  }
 0x5dc   :  { %8231 = vmatpush1.bf16.msra.mxu0 %v11707_v29  ;;  %8262 = vmatprep.mubr.bf16.mxu0 %v12581_v43  ;;  %v11725_v43 = vld [vmem:[#allocation14 + $0x730] ss:$24 sps:$4 sm:$0xff]  }
 0x5dd   :  { %8232 = vmatprep.subr.bf16.mxu0 %v11712_v50  ;;  %v11780_v50 = vld [vmem:[#allocation17 + $0xa0] sm:$0xff]  }
 0x5e0   :  { %8233 = vmatpush1.bf16.msra.mxu0 %v11710_v4  ;;  %v11781_v4 = vld [vmem:[#allocation17 + $0xe8] sm:$0xff]  }
 0x5e1   :  { %8234 = vmatprep.subr.bf16.mxu0 %v11715_v7 }
 0x5e4   :  { %8235 = vmatpush1.bf16.msra.mxu0 %v11713_v13  ;;  %v11782_v13 = vld [vmem:[#allocation17 + $0xa8] sm:$0xff]  }
 0x5e5   :  { %8236 = vmatprep.subr.bf16.mxu0 %v11718_v12  ;;  %v11783_v12 = vld [vmem:[#allocation17 + $0xf0] sm:$0xff]  }
 0x5e8   :  { %8237 = vmatpush1.bf16.msra.mxu0 %v11716_v57  ;;  %v11784_v57 = vld [vmem:[#allocation17 + $0xb0] sm:$0xff]  }
 0x5e9   :  { %8238 = vmatprep.subr.bf16.mxu0 %v11721_v38  ;;  %v11785_v38 = vld [vmem:[#allocation17 + $0xf8] sm:$0xff]  }
 0x5ec   :  { %8239 = vmatpush1.bf16.msra.mxu0 %v11719_v61  ;;  %v11787_v61 = vld [vmem:[#allocation17 + $0x140] sm:$0xff]  }
 0x5ed   :  { %8240 = vmatprep.subr.bf16.mxu0 %v11724_v39  ;;  %v11788_v39 = vld [vmem:[#allocation17 + $0x100] sm:$0xff]  }
 0x5f0   :  { %8241 = vmatpush1.bf16.msra.mxu0 %v11722_v17  ;;  %v11789_v17 = vld [vmem:[#allocation17 + $0x148] sm:$0xff]  }
 0x5f1   :  { %8242 = vmatprep.subr.bf16.mxu0 %v11727_v40 }
 0x5f4   :  { %8243 = vmatpush1.bf16.msra.mxu0 %v11725_v43  ;;  %v11790_v43 = vld [vmem:[#allocation17 + $0x108] sm:$0xff]  }
 0x5f5   :  { %8244 = vmatprep.subr.bf16.mxu0 %v11730_v36  ;;  %v11791_v36 = vld [vmem:[#allocation17 + $0x150] sm:$0xff]  }
 0x5f8   :  { %8245 = vmatpush1.bf16.msra.mxu0 %v11728_v41  ;;  %v11792_v41 = vld [vmem:[#allocation17 + $0x110] sm:$0xff]  }
 0x5f9   :  { %8246 = vmatprep.subr.bf16.mxu0 %v11733_v15  ;;  %v11793_v15 = vld [vmem:[#allocation17 + $0x158] sm:$0xff]  }
 0x5fc   :  { %8247 = vmatpush1.bf16.msra.mxu0 %v11731_v46  ;;  %v11794_v46 = vld [vmem:[#allocation17 + $0x118] sm:$0xff]  }
 0x5fd   :  { %8248 = vmatprep.subr.bf16.mxu0 %v11736_v48  ;;  %v11795_v48 = vld [vmem:[#allocation17 + $0x160] sm:$0xff]  }
 0x600   :  { %8249 = vmatpush1.bf16.msra.mxu0 %v11734_v51  ;;  %v11796_v51 = vld [vmem:[#allocation17 + $0x120] sm:$0xff]  }
 0x601   :  { %8250 = vmatprep.subr.bf16.mxu0 %v11739_v6  ;;  %v11797_v6 = vld [vmem:[#allocation17 + $0x168] sm:$0xff]  }
 0x604   :  { %8251 = vmatpush1.bf16.msra.mxu0 %v11737_v53  ;;  %v11798_v53 = vld [vmem:[#allocation17 + $0x128] sm:$0xff]  }
 0x605   :  { %8252 = vmatprep.subr.bf16.mxu0 %v11742_v54  ;;  %v11799_v54 = vld [vmem:[#allocation17 + $0x170] sm:$0xff]  }
 0x608   :  { %8253 = vmatpush1.bf16.msra.mxu0 %v11740_v34  ;;  %v11800_v34 = vld [vmem:[#allocation17 + $0x130] sm:$0xff]  }
 0x609   :  { %8254 = vmatprep.subr.bf16.mxu0 %v11745_v56  ;;  %v11801_v56 = vld [vmem:[#allocation17 + $0x178] sm:$0xff]  }
 0x60c   :  { %8255 = vmatpush1.bf16.msra.mxu0 %v11743_v58  ;;  %v11802_v58 = vld [vmem:[#allocation17 + $0x138] sm:$0xff]  }
 0x60d   :  { %8256 = vmatprep.subr.bf16.mxu0 %v11748_v59  ;;  %v6451_v59 = vrot.slane %v12593_v0, %v12458_v49 }
 0x610   :  { %8257 = vmatpush1.bf16.msra.mxu0 %v11746_v60  ;;  %v6455_v60 = vrot.slane %v12593_v0, %v12461_v37  ;;  %v9898_v37 = vld [vmem:[#allocation19] ss:$0 sm:$0xff] }
 0x611   :  { %8258 = vmatprep.subr.bf16.mxu0 %v11751_v18 }
 0x614   :  { %8259 = vmatpush1.bf16.msra.mxu0 %v11749_v62 }
 0x615   :  { %8260 = vmatprep.subr.bf16.mxu0 %v11754_v9 }
 0x618   :  { %8261 = vmatpush1.bf16.msra.mxu0 %v11752_v42 }
 0x61b   :  { %8263 = vmatmul.mubr.bf16.vlgmr.msra.gmra.mrb[20].mxu0 %v12579_v63 }
 0x62e   :  { %v8018_v2 = vpop.f32.mrb[16].mxu0  ;;  %v8141_v44 = vpop.f32.mrb[20].mxu1 }
 0x62f   :  { %v10047_v47 = vadd.f32 %v8018_v2, %v6435_v1  ;;  %v8020_v5 = vpop.f32.mrb[17].mxu0  ;;  %v8143_v10 = vpop.f32.mrb[21].mxu1  ;;  %v10049_v29 = vadd.f32 %v8141_v44, %v6443_v25 }
 0x630   :  { %v10048_v3 = vadd.f32 %v8020_v5, %v6439_v28  ;;  %v10050_v11 = vadd.f32 %v8143_v10, %v6447_v8  ;;  %v8022_v14 = vpop.f32.mrb[18].mxu0  ;;  %v8145_v63 = vpop.f32.mrb[22].mxu1 }
 0x631   :  { %v8023_v55 = vpop.f32.mrb[19].mxu0  ;;  %v8146_v52 = vpop.f32.mrb[23].mxu1  ;;  %v8271_v16 = vpack.c.bf16 %v10047_v47, %v10047_v47  ;;  %v8273_v7 = vpack.c.bf16 %v10049_v29, %v10049_v29 }
 0x632   :  { %v8272_v30 = vpack.c.bf16 %v10048_v3, %v10048_v3  ;;  %v8274_v33 = vpack.c.bf16 %v10050_v11, %v10050_v11 }
 0x634   :  { %11827 = vtanh.bf16 %v8272_v30 }
 0x635   :  { %11829 = vtanh.bf16 %v8271_v16 }
 0x636   :  { %11831 = vtanh.bf16 %v8274_v33 }
 0x637   :  { %11833 = vtanh.bf16 %v8273_v7 }
 0x63f   :  { %v11828_v19 = vpop.eup %11827 }
 0x640   :  { %v11830_v20 = vpop.eup %11829  ;;  %8706 = vmatprep.mubr.bf16.mxu1 %v11828_v19 }
 0x641   :  { %v11832_v45 = vpop.eup %11831  ;;  %8707 = vmatmul.mubr.bf16.vlgmr.msra.gmra.mrb[24].mxu1 %v11830_v20 }
 0x642   :  { %9974 = vmatpush3.bf16.msra.mxu1 %v11772_v35  ;;  %8746 = vmatprep.mubr.bf16.mxu1 %v11832_v45  ;;  %v11834_v40 = vpop.eup %11833 }
 0x643   :  { %9975 = vmatprep.subr.bf16.mxu1 %v11773_v32 }
 0x646   :  { %9976 = vmatpush3.bf16.msra.mxu1 %v11774_v21 }
 0x647   :  { %9977 = vmatprep.subr.bf16.mxu1 %v11775_v22 }
 0x64a   :  { %9978 = vmatpush3.bf16.msra.mxu1 %v11776_v23 }
 0x64b   :  { %9979 = vmatprep.subr.bf16.mxu1 %v11777_v24 }
 0x64e   :  { %9980 = vmatpush3.bf16.msra.mxu1 %v11778_v26 }
 0x64f   :  { %9981 = vmatprep.subr.bf16.mxu1 %v11779_v27 }
 0x652   :  { %9982 = vmatpush3.bf16.msra.mxu1 %v11780_v50 }
 0x653   :  { %9983 = vmatprep.subr.bf16.mxu1 %v11781_v4 }
 0x656   :  { %9984 = vmatpush3.bf16.msra.mxu1 %v11782_v13 }
 0x657   :  { %9985 = vmatprep.subr.bf16.mxu1 %v11783_v12 }
 0x65a   :  { %9986 = vmatpush3.bf16.msra.mxu1 %v11784_v57 }
 0x65b   :  { %9987 = vmatprep.subr.bf16.mxu1 %v11785_v38 }
 0x65e   :  { %9988 = vmatpush3.bf16.msra.mxu1 %v11786_v31 }
 0x65f   :  { %9995 = vmatprep.subr.bf16.mxu1 %v11787_v61 }
 0x661   :  { %8747 = vmatmul.mubr.bf16.vlgmr.msra.gmra.mrb[28].mxu1 %v11834_v40 }
 0x662   :  { %9996 = vmatpush3.bf16.msra.mxu1 %v11788_v39 }
 0x663   :  { %9997 = vmatprep.subr.bf16.mxu1 %v11789_v17 }
 0x666   :  { %9998 = vmatpush3.bf16.msra.mxu1 %v11790_v43 }
 0x667   :  { %9999 = vmatprep.subr.bf16.mxu1 %v11791_v36 }
 0x66a   :  { %10000 = vmatpush3.bf16.msra.mxu1 %v11792_v41 }
 0x66b   :  { %10001 = vmatprep.subr.bf16.mxu1 %v11793_v15 }
 0x66e   :  { %10002 = vmatpush3.bf16.msra.mxu1 %v11794_v46 }
 0x66f   :  { %10003 = vmatprep.subr.bf16.mxu1 %v11795_v48 }
 0x672   :  { %10004 = vmatpush3.bf16.msra.mxu1 %v11796_v51 }
 0x673   :  { %10005 = vmatprep.subr.bf16.mxu1 %v11797_v6 }
 0x676   :  { %10006 = vmatpush3.bf16.msra.mxu1 %v11798_v53 }
 0x677   :  { %10007 = vmatprep.subr.bf16.mxu1 %v11799_v54 }
 0x67a   :  { %10008 = vmatpush3.bf16.msra.mxu1 %v11800_v34 }
 0x67b   :  { %10009 = vmatprep.subr.bf16.mxu1 %v11801_v56 }
 0x67e   :  { %10010 = vmatpush3.bf16.msra.mxu1 %v11802_v58 }
 0x6ee   :  { %v8264_v18 = vpop.f32.mrb[20].mxu0 }
 0x6ef   :  { %v10051_v62 = vadd.f32 %v8264_v18, %v6451_v59  ;;  %v8266_v9 = vpop.f32.mrb[21].mxu0 }
 0x6f0   :  { %v10052_v42 = vadd.f32 %v8266_v9, %v6455_v60  ;;  %v8268_v1 = vpop.f32.mrb[22].mxu0 }
 0x6f1   :  { %v8275_v28 = vpack.c.bf16 %v10051_v62, %v10051_v62  ;;  %v8269_v8 = vpop.f32.mrb[23].mxu0 }
 0x6f2   :  { %v8276_v2 = vpack.c.bf16 %v10052_v42, %v10052_v42 }
 0x6f4   :  { %11835 = vtanh.bf16 %v8276_v2 }
 0x6f5   :  { %11837 = vtanh.bf16 %v8275_v28 }
 0x6ff   :  { %v11836_v44 = vpop.eup %11835 }
 0x700   :  { %v11838_v47 = vpop.eup %11837  ;;  %8786 = vmatprep.mubr.bf16.mxu1 %v11836_v44 }
 0x701   :  { %8787 = vmatmul.mubr.bf16.vlgmr.msra.gmra.mrb[32].mxu1 %v11838_v47 }
 0x714   :  { %v9967_v5 = vpop.f32.mrb[24].mxu1 }
 0x715   :  { %v9968_v10 = vpop.f32.mrb[25].mxu1 }
 0x716   :  { %v9969_v49 = vadd.f32 %v9968_v10, %v9967_v5  ;;  %v9970_v3 = vpop.f32.mrb[26].mxu1 }
 0x717   :  { %v9971_v11 = vpop.f32.mrb[27].mxu1 }
 0x718   :  { %v8709_v63 = vadd.f32 %v9969_v49, %v9898_v37 }
 0x734   :  { %v9989_v0 = vpop.f32.mrb[28].mxu1 }
 0x735   :  { %v9990_v14 = vpop.f32.mrb[29].mxu1 }
 0x736   :  { %v9991_v55 = vadd.f32 %v9990_v14, %v9989_v0  ;;  %v9992_v52 = vpop.f32.mrb[30].mxu1 }
 0x737   :  { %v9993_v16 = vpop.f32.mrb[31].mxu1 }
 0x738   :  { %v8749_v30 = vadd.f32 %v9991_v55, %v8709_v63 }
 0x739   :  { %12097 = shalt.err (!%p12094_p8)
}
 0x73a   :  { %s12098_s8 = scalar_lea.hbm %s12646_s12, 512 }
 0x73b   :  { %p12099_p9 = scmp.ne.s32.totalorder %s12646_s12, %s12098_s8  ;;  %p12102_p10 = scmp.lt.u32.totalorder %s12098_s8, %s12646_s12 }
 0x73d   :  { %p12104_p11 = pnand %p12102_p10, %p12099_p9 }
 0x73f   :  { %12107 = shalt.err (!%p12104_p11)
}
 0x740   :  { %8806 = dma.vmem_to_hbm [thread:$0]  %s8801_s20, 512, %s12646_s12, [#allocation4], %s12151_s4, %s12151_s4, %s12152_s21  }
 0x741   :  { %s12167_s25 = smov [#allocation21]  }
 0x742   :  { %s8813_s27 = sshll.u32 %s12167_s25, 4  ;;  %s8814_s27 = int_to_ptr.vmem [resolvable:$true] %s8813_s27 }
 0x743   :  { %s12108_s23 = scalar_lea.vmem %s8814_s27, 32  ;;  %p12113_p13 = scmp.lt.s32.totalorder %s8814_s27, %s8814_s27 }
 0x744   :  { %p12109_p12 = scmp.ne.s32.totalorder %s8814_s27, %s12108_s23  ;;  %p12114_p0 = scmp.lt.s32.totalorder %s12108_s23, %s12108_s23 }
 0x746   :  { %p12115_p1 = por %p12114_p0, %p12113_p13 }
 0x748   :  { %p12116_p2 = pnand %p12115_p1, %p12109_p12 }
 0x7d4   :  { %v10011_v33 = vpop.f32.mrb[32].mxu1 }
 0x7d5   :  { %v10012_v35 = vpop.f32.mrb[33].mxu1 }
 0x7d6   :  { %v10013_v19 = vadd.f32 %v10012_v35, %v10011_v33  ;;  %v10014_v32 = vpop.f32.mrb[34].mxu1 }
 0x7d7   :  { %v10015_v20 = vpop.f32.mrb[35].mxu1 }
 0x7d8   :  { %v8789_v45 = vadd.f32 %v10013_v19, %v8749_v30 }
 0x7da   :  { %8794 = vst [vmem:[#allocation21] sm:$0x3] %v8789_v45 }
 0x7db   :  { %12119 = shalt.err (!%p12116_p2)
}
 0x7dc   :  { %s12120_s12 = scalar_lea.hbm %s12647_s13, 32 }
 0x7dd   :  { %p12121_p3 = scmp.ne.s32.totalorder %s12647_s13, %s12120_s12  ;;  %p12124_p4 = scmp.lt.u32.totalorder %s12120_s12, %s12647_s13 }
 0x7df   :  { %p12126_p5 = pnand %p12124_p4, %p12121_p3 }
 0x7e1   :  { %12129 = shalt.err (!%p12126_p5)
}
 0x7e2   :  { %8816 = dma.vmem_to_hbm [thread:$0]  %s8814_s27, 32, %s12647_s13, [#allocation22]  }
 0x7e3   :  { %12142 = dma.done.wait [#allocation4], 512  }
 0x7e4   :  { %12143 = vsyncadd [#allocation4], 4294966784 }
 0x7e5   :  { %12144 = dma.done.wait [#allocation22], 32  }
 0x7e6   :  { %12145 = vsyncadd [#allocation22], 4294967264 }
 0x7e7   :  { %8823 = vsyncpa [#allocation3], 1 }
 0x7e8   :  { %8824 = vsyncpa [#allocation6], 1 }
 0x7e9   :  { %8825 = vsyncpa [#allocation9], 1 }
 0x7ea   :  { %8826 = vsyncpa [#allocation12], 1 }
 0x7eb   :  { %8827 = vsyncpa [#allocation15], 1 }
 0x7ec   :  { %8828 = vsyncpa [#allocation18], 1 }
 0x7ed   :  { %8829 = vsyncpa [#allocation4], 1 }
 0x7ee   :  { %8830 = vsyncpa [#allocation22], 1 }

</bundles_post_ra>
